<compile_context>
chip_gen: v7x
topology: tpu7x:2x2x1
jax: 0.10.0
libtpu: 0.0.40
codegen_flags: <defaults>
</compile_context>

<pallas_src>
import numpy as np
import jax
import jax.numpy as jnp
from jax import lax
from jax.experimental import pallas as pl
from jax.experimental.pallas import tpu as pltpu


# --------------------------------------------------------------------------
# In-kernel helpers (traced inside the Pallas kernel)
# --------------------------------------------------------------------------
def _zero_pad_hw(a):
    """(H, W, C) -> (H+2, W+2, C) with a zero border (conv padding=1)."""
    h, w, c = a.shape
    zr = jnp.zeros((1, w, c), a.dtype)
    a = jnp.concatenate([zr, a, zr], axis=0)           # pad H (untiled axis)
    zc = jnp.zeros((h + 2, 1, c), a.dtype)
    return jnp.concatenate([zc, a, zc], axis=1)        # pad W (sublane axis)


def _im2col_3x3(apad, h, w):
    """(H+2, W+2, C) -> (H*W, 9*C); tap order (dh, dw) outer, channel inner."""
    c = apad.shape[-1]
    cols = []
    for dh in range(3):
        for dw in range(3):
            cols.append(apad[dh:dh + h, dw:dw + w, :].reshape(h * w, c))
    return jnp.concatenate(cols, axis=-1)


# --------------------------------------------------------------------------
# Fused UAFM kernel: one batch element per grid step, everything stays in VMEM
# --------------------------------------------------------------------------
def _uafm_kernel(x_ref, yr_ref, rw_ref,
                 w1_ref, s1_ref, b1_ref,
                 w2t_ref, s2_ref, b2_ref, o_ref):
    H, W, cx = x_ref.shape            # x block:        (H, W, x_ch)
    _, Wy, cy = yr_ref.shape          # row-interp'd y: (H, Wy, y_ch)
    f32 = jnp.float32

    # ---- conv_x: ReLU(BN(Conv3x3(x))) -> x_feat, kept in VMEM ----
    xpad = _zero_pad_hw(x_ref[...].astype(f32))            # (H+2, W+2, cx)
    p1 = _im2col_3x3(xpad, H, W)                           # (H*W, 9*cx)
    xf = jnp.dot(p1, w1_ref[...], preferred_element_type=f32)   # (H*W, cy)
    xf = jnp.maximum(xf * s1_ref[...] + b1_ref[...], 0.0)       # BN + ReLU

    # ---- finish bilinear upsample of y (W direction), batched over rows ----
    rwb = jnp.broadcast_to(rw_ref[...], (H, W, Wy))
    yup = jnp.einsum('hwq,hqc->hwc', rwb, yr_ref[...].astype(f32),
                     preferred_element_type=f32)           # (H, W, cy)

    # ---- fuse: z = x_feat + y_up ; conv_out: ReLU(BN(Conv3x3(z))) ----
    z = xf.reshape(H, W, cy) + yup
    p2 = _im2col_3x3(_zero_pad_hw(z), H, W)                # (H*W, 9*cy)
    # Compute directly in (Cout, H*W) orientation -> lane-dense store, NCHW out.
    out_t = jnp.dot(w2t_ref[...], p2.T,
                    preferred_element_type=f32)            # (cout, H*W)
    out_t = jnp.maximum(out_t * s2_ref[...] + b2_ref[...], 0.0)
    o_ref[...] = out_t.astype(o_ref.dtype)


# --------------------------------------------------------------------------
# Wrapper glue: BN fold, interp matrices, weight flattening, pallas_call
# --------------------------------------------------------------------------
def fold_bn(gamma, beta, mean, var, eps=1e-5):
    scale = gamma / jnp.sqrt(var + eps)
    bias = beta - mean * scale
    return scale, bias


def _bilinear_matrix(out_size, in_size):
    """(out_size, in_size) interp matrix, half-pixel centers
    (matches F.interpolate(mode='bilinear', align_corners=False))."""
    if in_size == 1:
        return jnp.ones((out_size, 1), jnp.float32)
    i = np.arange(out_size, dtype=np.float64)
    src = (i + 0.5) * (in_size / out_size) - 0.5
    src = np.clip(src, 0.0, in_size - 1)
    lo = np.floor(src).astype(np.int64)
    hi = np.minimum(lo + 1, in_size - 1)
    frac = src - lo
    m = np.zeros((out_size, in_size), np.float64)
    m[np.arange(out_size), lo] += 1.0 - frac
    m[np.arange(out_size), hi] += frac
    return jnp.asarray(m, jnp.float32)


def uafm_forward(x_nchw, y_nchw, params, eps=1e-5):
    # check()
    assert x_nchw.ndim == 4 and y_nchw.ndim == 4
    N, cx, H, W = x_nchw.shape
    Ny, cy_in, Hy, Wy = y_nchw.shape
    assert N == Ny and H >= Hy and W >= Wy

    w_x = params["w_x"]                  # (3, 3, x_ch, y_ch)   HWIO
    w_out = params["w_out"]              # (3, 3, y_ch, out_ch) HWIO
    cy = w_x.shape[-1]
    cout = w_out.shape[-1]
    assert cy == cy_in

    # Pre-flattened weights matching the in-kernel im2col order (tap-major,
    # channel-minor); conv_out's weights are pre-transposed for the (Cout, HW)
    # output orientation.
    w1m = w_x.reshape(9 * cx, cy)                           # (9*cx, cy)
    w2t = jnp.transpose(w_out.reshape(9 * cy, cout))        # (cout, 9*cy)

    s1, b1 = fold_bn(params["bn_x_gamma"], params["bn_x_beta"],
                     params["bn_x_mean"], params["bn_x_var"], eps)
    s2, b2 = fold_bn(params["bn_o_gamma"], params["bn_o_beta"],
                     params["bn_o_mean"], params["bn_o_var"], eps)
    s1, b1 = s1.reshape(1, cy), b1.reshape(1, cy)           # rows of (HW, cy)
    s2, b2 = s2.reshape(cout, 1), b2.reshape(cout, 1)       # cols of (cout, HW)

    # Bilinear interpolation matrices (half-pixel centers).
    rh = _bilinear_matrix(H, Hy)                            # (H, Hy)
    rw = _bilinear_matrix(W, Wy)                            # (W, Wy)

    # Layout: NHWC for the conv path; apply the H-direction interp here (small),
    # the W-direction interp runs inside the kernel.
    x_nhwc = jnp.transpose(x_nchw, (0, 2, 3, 1))            # (N, H, W, cx)
    y_nhwc = jnp.transpose(y_nchw, (0, 2, 3, 1))            # (N, Hy, Wy, cy)
    y_rows = jnp.einsum('hp,npqc->nhqc', rh, y_nhwc,
                        precision=lax.Precision.HIGHEST)    # (N, H, Wy, cy)

    out = pl.pallas_call(
        _uafm_kernel,
        out_shape=jax.ShapeDtypeStruct((N, cout, H * W), jnp.float32),
        grid=(N,),
        in_specs=[
            pl.BlockSpec((None, H, W, cx), lambda n: (n, 0, 0, 0)),
            pl.BlockSpec((None, H, Wy, cy), lambda n: (n, 0, 0, 0)),
            pl.BlockSpec((W, Wy), lambda n: (0, 0)),
            pl.BlockSpec((9 * cx, cy), lambda n: (0, 0)),
            pl.BlockSpec((1, cy), lambda n: (0, 0)),
            pl.BlockSpec((1, cy), lambda n: (0, 0)),
            pl.BlockSpec((cout, 9 * cy), lambda n: (0, 0)),
            pl.BlockSpec((cout, 1), lambda n: (0, 0)),
            pl.BlockSpec((cout, 1), lambda n: (0, 0)),
        ],
        out_specs=pl.BlockSpec((None, cout, H * W), lambda n: (n, 0, 0)),
        compiler_params=pltpu.CompilerParams(
            dimension_semantics=("parallel",)),
    )(x_nhwc, y_rows, rw, w1m, s1, b1, w2t, s2, b2)

    # (N, cout, H*W) is already channel-major: a free reshape gives NCHW.
    return out.reshape(N, cout, H, W)


# --------------------------------------------------------------------------
# Pure-JAX reference (same math, XLA ops) for a correctness check
# --------------------------------------------------------------------------
def uafm_reference(x, y, params, eps=1e-5):
    hp = lax.Precision.HIGHEST
    _, _, H, W = x.shape
    _, _, Hy, Wy = y.shape

    s1, b1 = fold_bn(params["bn_x_gamma"], params["bn_x_beta"],
                     params["bn_x_mean"], params["bn_x_var"], eps)
    s2, b2 = fold_bn(params["bn_o_gamma"], params["bn_o_beta"],
                     params["bn_o_mean"], params["bn_o_var"], eps)

    def conv_bn_relu(a, w, s, b):
        c = lax.conv_general_dilated(
            a, w, window_strides=(1, 1), padding=((1, 1), (1, 1)),
            dimension_numbers=("NCHW", "HWIO", "NCHW"), precision=hp)
        c = c * s[None, :, None, None] + b[None, :, None, None]
        return jnp.maximum(c, 0.0)

    x_feat = conv_bn_relu(x, params["w_x"], s1, b1)
    rh = _bilinear_matrix(H, Hy)
    rw = _bilinear_matrix(W, Wy)
    y_up = jnp.einsum('hp,wq,ncpq->nchw', rh, rw, y, precision=hp)
    return conv_bn_relu(x_feat + y_up, params["w_out"], s2, b2)


# --------------------------------------------------------------------------
# Main
# --------------------------------------------------------------------------
if __name__ == "__main__":
    # Shapes consistent with the module:
    #   x (low level):  (2, x_ch=4, 16, 16)
    #   y (high level): (2, y_ch=8,  8,  8)  -> upsampled to 16x16
    #   out:            (2, out_ch=8, 16, 16)
    x_ch, y_ch, out_ch = 4, 8, 8
    N, H, W = 2, 16, 16
    Hy, Wy = H // 2, W // 2

    key = jax.random.PRNGKey(0)
    keys = jax.random.split(key, 4)

    x = jax.random.normal(keys[0], (N, x_ch, H, W), jnp.float32)
    y = jax.random.normal(keys[1], (N, y_ch, Hy, Wy), jnp.float32)

    params = {
        "w_x": 0.1 * jax.random.normal(keys[2], (3, 3, x_ch, y_ch), jnp.float32),
        "bn_x_gamma": 1.0 + 0.05 * jnp.arange(y_ch, dtype=jnp.float32),
        "bn_x_beta": 0.02 * jnp.arange(y_ch, dtype=jnp.float32),
        "bn_x_mean": 0.01 * jnp.arange(y_ch, dtype=jnp.float32),
        "bn_x_var": 0.5 + 0.1 * jnp.arange(y_ch, dtype=jnp.float32),
        "w_out": 0.1 * jax.random.normal(keys[3], (3, 3, y_ch, out_ch), jnp.float32),
        "bn_o_gamma": 1.0 - 0.03 * jnp.arange(out_ch, dtype=jnp.float32),
        "bn_o_beta": -0.01 * jnp.arange(out_ch, dtype=jnp.float32),
        "bn_o_mean": 0.005 * jnp.arange(out_ch, dtype=jnp.float32),
        "bn_o_var": 0.8 + 0.05 * jnp.arange(out_ch, dtype=jnp.float32),
    }

    fwd = jax.jit(uafm_forward)
    out = jax.block_until_ready(fwd(x, y, params))
    assert out.shape == (N, out_ch, H, W), out.shape
    assert bool(jnp.all(jnp.isfinite(out)))

    ref = jax.block_until_ready(uafm_reference(x, y, params))
    err = float(jnp.max(jnp.abs(out - ref)))
    assert err < 1e-3, f"max abs error vs reference: {err}"

    print("KERNEL_OK")
</pallas_src>

<mosaic_0001>
module attributes {stable_mosaic.version = 11 : i64} {
  func.func @_uafm_kernel(%arg0: i32, %arg1: memref<1x16x16x4xf32, #tpu.memory_space<vmem>>, %arg2: memref<1x16x8x8xf32, #tpu.memory_space<vmem>>, %arg3: memref<16x8xf32, #tpu.memory_space<vmem>>, %arg4: memref<36x8xf32, #tpu.memory_space<vmem>>, %arg5: memref<1x8xf32, #tpu.memory_space<vmem>>, %arg6: memref<1x8xf32, #tpu.memory_space<vmem>>, %arg7: memref<8x72xf32, #tpu.memory_space<vmem>>, %arg8: memref<8x1xf32, #tpu.memory_space<vmem>>, %arg9: memref<8x1xf32, #tpu.memory_space<vmem>>, %arg10: memref<1x8x256xf32, #tpu.memory_space<vmem>>) attributes {dimension_semantics = [#tpu.dimension_semantics<parallel>], iteration_bounds = array<i64: 2>, scalar_prefetch = 0 : i64, scratch_operands = 0 : i64, tpu.core_type = #tpu.core_type<tc>, window_params = [{transform_indices = @transform_0, window_bounds = array<i64: 1, 16, 16, 4>}, {transform_indices = @transform_1, window_bounds = array<i64: 1, 16, 8, 8>}, {pipeline_mode = #tpu.pipeline_mode<synchronous>, transform_indices = @transform_2, window_bounds = array<i64: 16, 8>}, {pipeline_mode = #tpu.pipeline_mode<synchronous>, transform_indices = @transform_3, window_bounds = array<i64: 36, 8>}, {pipeline_mode = #tpu.pipeline_mode<synchronous>, transform_indices = @transform_4, window_bounds = array<i64: 1, 8>}, {pipeline_mode = #tpu.pipeline_mode<synchronous>, transform_indices = @transform_5, window_bounds = array<i64: 1, 8>}, {pipeline_mode = #tpu.pipeline_mode<synchronous>, transform_indices = @transform_6, window_bounds = array<i64: 8, 72>}, {pipeline_mode = #tpu.pipeline_mode<synchronous>, transform_indices = @transform_7, window_bounds = array<i64: 8, 1>}, {pipeline_mode = #tpu.pipeline_mode<synchronous>, transform_indices = @transform_8, window_bounds = array<i64: 8, 1>}, {transform_indices = @transform_9, window_bounds = array<i64: 1, 8, 256>}]} {
    %c0 = arith.constant 0 : index
    %c0_0 = arith.constant 0 : index
    %c0_1 = arith.constant 0 : index
    %c0_2 = arith.constant 0 : index
    %0 = vector.load %arg1[%c0, %c0_0, %c0_1, %c0_2] : memref<1x16x16x4xf32, #tpu.memory_space<vmem>>, vector<1x16x16x4xf32>
    %1 = vector.shape_cast %0 : vector<1x16x16x4xf32> to vector<16x16x4xf32>
    %cst = arith.constant 0.000000e+00 : f32
    %2 = vector.broadcast %cst : f32 to vector<1x16x4xf32>
    %3 = tpu.concatenate %2, %1, %2 in 0 : vector<1x16x4xf32>, vector<16x16x4xf32>, vector<1x16x4xf32> -> vector<18x16x4xf32>
    %cst_3 = arith.constant 0.000000e+00 : f32
    %4 = vector.broadcast %cst_3 : f32 to vector<18x1x4xf32>
    %5 = tpu.concatenate %4, %3, %4 in 1 : vector<18x1x4xf32>, vector<18x16x4xf32>, vector<18x1x4xf32> -> vector<18x18x4xf32>
    %6 = vector.extract_strided_slice %5 {offsets = [0, 0, 0], sizes = [16, 16, 4], strides = [1, 1, 1]} : vector<18x18x4xf32> to vector<16x16x4xf32>
    %7 = vector.shape_cast %6 : vector<16x16x4xf32> to vector<256x4xf32>
    %8 = vector.extract_strided_slice %5 {offsets = [0, 1, 0], sizes = [16, 16, 4], strides = [1, 1, 1]} : vector<18x18x4xf32> to vector<16x16x4xf32>
    %9 = vector.shape_cast %8 : vector<16x16x4xf32> to vector<256x4xf32>
    %10 = vector.extract_strided_slice %5 {offsets = [0, 2, 0], sizes = [16, 16, 4], strides = [1, 1, 1]} : vector<18x18x4xf32> to vector<16x16x4xf32>
    %11 = vector.shape_cast %10 : vector<16x16x4xf32> to vector<256x4xf32>
    %12 = vector.extract_strided_slice %5 {offsets = [1, 0, 0], sizes = [16, 16, 4], strides = [1, 1, 1]} : vector<18x18x4xf32> to vector<16x16x4xf32>
    %13 = vector.shape_cast %12 : vector<16x16x4xf32> to vector<256x4xf32>
    %14 = vector.extract_strided_slice %5 {offsets = [1, 1, 0], sizes = [16, 16, 4], strides = [1, 1, 1]} : vector<18x18x4xf32> to vector<16x16x4xf32>
    %15 = vector.shape_cast %14 : vector<16x16x4xf32> to vector<256x4xf32>
    %16 = vector.extract_strided_slice %5 {offsets = [1, 2, 0], sizes = [16, 16, 4], strides = [1, 1, 1]} : vector<18x18x4xf32> to vector<16x16x4xf32>
    %17 = vector.shape_cast %16 : vector<16x16x4xf32> to vector<256x4xf32>
    %18 = vector.extract_strided_slice %5 {offsets = [2, 0, 0], sizes = [16, 16, 4], strides = [1, 1, 1]} : vector<18x18x4xf32> to vector<16x16x4xf32>
    %19 = vector.shape_cast %18 : vector<16x16x4xf32> to vector<256x4xf32>
    %20 = vector.extract_strided_slice %5 {offsets = [2, 1, 0], sizes = [16, 16, 4], strides = [1, 1, 1]} : vector<18x18x4xf32> to vector<16x16x4xf32>
    %21 = vector.shape_cast %20 : vector<16x16x4xf32> to vector<256x4xf32>
    %22 = vector.extract_strided_slice %5 {offsets = [2, 2, 0], sizes = [16, 16, 4], strides = [1, 1, 1]} : vector<18x18x4xf32> to vector<16x16x4xf32>
    %23 = vector.shape_cast %22 : vector<16x16x4xf32> to vector<256x4xf32>
    %24 = tpu.concatenate %7, %9, %11, %13, %15, %17, %19, %21, %23 in 1 : vector<256x4xf32>, vector<256x4xf32>, vector<256x4xf32>, vector<256x4xf32>, vector<256x4xf32>, vector<256x4xf32>, vector<256x4xf32>, vector<256x4xf32>, vector<256x4xf32> -> vector<256x36xf32>
    %c0_4 = arith.constant 0 : index
    %c0_5 = arith.constant 0 : index
    %25 = vector.load %arg4[%c0_4, %c0_5] : memref<36x8xf32, #tpu.memory_space<vmem>>, vector<36x8xf32>
    %cst_6 = arith.constant dense<0.000000e+00> : vector<256x8xf32>
    %26 = tpu.matmul %24, %25, %cst_6 {dimension_numbers = #tpu.dot_dimension_numbers<[1], [0], [0], [1], [0, 0, 1, 1], [], []>} : vector<256x36xf32>, vector<36x8xf32>, vector<256x8xf32> -> vector<256x8xf32>
    %c0_7 = arith.constant 0 : index
    %c0_8 = arith.constant 0 : index
    %27 = vector.load %arg5[%c0_7, %c0_8] : memref<1x8xf32, #tpu.memory_space<vmem>>, vector<1x8xf32>
    %28 = vector.broadcast %27 : vector<1x8xf32> to vector<256x8xf32>
    %29 = arith.mulf %26, %28 : vector<256x8xf32>
    %c0_9 = arith.constant 0 : index
    %c0_10 = arith.constant 0 : index
    %30 = vector.load %arg6[%c0_9, %c0_10] : memref<1x8xf32, #tpu.memory_space<vmem>>, vector<1x8xf32>
    %31 = vector.broadcast %30 : vector<1x8xf32> to vector<256x8xf32>
    %32 = arith.addf %29, %31 : vector<256x8xf32>
    %cst_11 = arith.constant 0.000000e+00 : f32
    %33 = vector.broadcast %cst_11 : f32 to vector<256x8xf32>
    %34 = arith.maximumf %32, %33 : vector<256x8xf32>
    %c0_12 = arith.constant 0 : index
    %c0_13 = arith.constant 0 : index
    %35 = vector.load %arg3[%c0_12, %c0_13] : memref<16x8xf32, #tpu.memory_space<vmem>>, vector<16x8xf32>
    %36 = vector.shape_cast %35 : vector<16x8xf32> to vector<1x16x8xf32>
    %37 = vector.broadcast %36 : vector<1x16x8xf32> to vector<16x16x8xf32>
    %c0_14 = arith.constant 0 : index
    %c0_15 = arith.constant 0 : index
    %c0_16 = arith.constant 0 : index
    %c0_17 = arith.constant 0 : index
    %38 = vector.load %arg2[%c0_14, %c0_15, %c0_16, %c0_17] : memref<1x16x8x8xf32, #tpu.memory_space<vmem>>, vector<1x16x8x8xf32>
    %39 = vector.shape_cast %38 : vector<1x16x8x8xf32> to vector<16x8x8xf32>
    "tpu.trace_start"() <{level = 10 : i32, message = "hwq,hqc->hwc"}> : () -> ()
    %cst_18 = arith.constant dense<0.000000e+00> : vector<16x16x8xf32>
    %40 = tpu.matmul %37, %39, %cst_18 {dimension_numbers = #tpu.dot_dimension_numbers<[2], [1], [1], [2], [0, 0, 0, 1, 1, 2], [0], [0]>} : vector<16x16x8xf32>, vector<16x8x8xf32>, vector<16x16x8xf32> -> vector<16x16x8xf32>
    "tpu.trace_stop"() : () -> ()
    %41 = vector.shape_cast %34 : vector<256x8xf32> to vector<16x16x8xf32>
    %42 = arith.addf %41, %40 : vector<16x16x8xf32>
    %cst_19 = arith.constant 0.000000e+00 : f32
    %43 = vector.broadcast %cst_19 : f32 to vector<1x16x8xf32>
    %44 = tpu.concatenate %43, %42, %43 in 0 : vector<1x16x8xf32>, vector<16x16x8xf32>, vector<1x16x8xf32> -> vector<18x16x8xf32>
    %cst_20 = arith.constant 0.000000e+00 : f32
    %45 = vector.broadcast %cst_20 : f32 to vector<18x1x8xf32>
    %46 = tpu.concatenate %45, %44, %45 in 1 : vector<18x1x8xf32>, vector<18x16x8xf32>, vector<18x1x8xf32> -> vector<18x18x8xf32>
    %47 = vector.extract_strided_slice %46 {offsets = [0, 0, 0], sizes = [16, 16, 8], strides = [1, 1, 1]} : vector<18x18x8xf32> to vector<16x16x8xf32>
    %48 = vector.shape_cast %47 : vector<16x16x8xf32> to vector<256x8xf32>
    %49 = vector.extract_strided_slice %46 {offsets = [0, 1, 0], sizes = [16, 16, 8], strides = [1, 1, 1]} : vector<18x18x8xf32> to vector<16x16x8xf32>
    %50 = vector.shape_cast %49 : vector<16x16x8xf32> to vector<256x8xf32>
    %51 = vector.extract_strided_slice %46 {offsets = [0, 2, 0], sizes = [16, 16, 8], strides = [1, 1, 1]} : vector<18x18x8xf32> to vector<16x16x8xf32>
    %52 = vector.shape_cast %51 : vector<16x16x8xf32> to vector<256x8xf32>
    %53 = vector.extract_strided_slice %46 {offsets = [1, 0, 0], sizes = [16, 16, 8], strides = [1, 1, 1]} : vector<18x18x8xf32> to vector<16x16x8xf32>
    %54 = vector.shape_cast %53 : vector<16x16x8xf32> to vector<256x8xf32>
    %55 = vector.extract_strided_slice %46 {offsets = [1, 1, 0], sizes = [16, 16, 8], strides = [1, 1, 1]} : vector<18x18x8xf32> to vector<16x16x8xf32>
    %56 = vector.shape_cast %55 : vector<16x16x8xf32> to vector<256x8xf32>
    %57 = vector.extract_strided_slice %46 {offsets = [1, 2, 0], sizes = [16, 16, 8], strides = [1, 1, 1]} : vector<18x18x8xf32> to vector<16x16x8xf32>
    %58 = vector.shape_cast %57 : vector<16x16x8xf32> to vector<256x8xf32>
    %59 = vector.extract_strided_slice %46 {offsets = [2, 0, 0], sizes = [16, 16, 8], strides = [1, 1, 1]} : vector<18x18x8xf32> to vector<16x16x8xf32>
    %60 = vector.shape_cast %59 : vector<16x16x8xf32> to vector<256x8xf32>
    %61 = vector.extract_strided_slice %46 {offsets = [2, 1, 0], sizes = [16, 16, 8], strides = [1, 1, 1]} : vector<18x18x8xf32> to vector<16x16x8xf32>
    %62 = vector.shape_cast %61 : vector<16x16x8xf32> to vector<256x8xf32>
    %63 = vector.extract_strided_slice %46 {offsets = [2, 2, 0], sizes = [16, 16, 8], strides = [1, 1, 1]} : vector<18x18x8xf32> to vector<16x16x8xf32>
    %64 = vector.shape_cast %63 : vector<16x16x8xf32> to vector<256x8xf32>
    %65 = tpu.concatenate %48, %50, %52, %54, %56, %58, %60, %62, %64 in 1 : vector<256x8xf32>, vector<256x8xf32>, vector<256x8xf32>, vector<256x8xf32>, vector<256x8xf32>, vector<256x8xf32>, vector<256x8xf32>, vector<256x8xf32>, vector<256x8xf32> -> vector<256x72xf32>
    %c0_21 = arith.constant 0 : index
    %c0_22 = arith.constant 0 : index
    %66 = vector.load %arg7[%c0_21, %c0_22] : memref<8x72xf32, #tpu.memory_space<vmem>>, vector<8x72xf32>
    %67 = tpu.transpose %65, [1, 0] : vector<256x72xf32> -> vector<72x256xf32>
    %cst_23 = arith.constant dense<0.000000e+00> : vector<8x256xf32>
    %68 = tpu.matmul %66, %67, %cst_23 {dimension_numbers = #tpu.dot_dimension_numbers<[1], [0], [0], [1], [0, 0, 1, 1], [], []>} : vector<8x72xf32>, vector<72x256xf32>, vector<8x256xf32> -> vector<8x256xf32>
    %c0_24 = arith.constant 0 : index
    %c0_25 = arith.constant 0 : index
    %69 = vector.load %arg8[%c0_24, %c0_25] : memref<8x1xf32, #tpu.memory_space<vmem>>, vector<8x1xf32>
    %70 = vector.broadcast %69 : vector<8x1xf32> to vector<8x256xf32>
    %71 = arith.mulf %68, %70 : vector<8x256xf32>
    %c0_26 = arith.constant 0 : index
    %c0_27 = arith.constant 0 : index
    %72 = vector.load %arg9[%c0_26, %c0_27] : memref<8x1xf32, #tpu.memory_space<vmem>>, vector<8x1xf32>
    %73 = vector.broadcast %72 : vector<8x1xf32> to vector<8x256xf32>
    %74 = arith.addf %71, %73 : vector<8x256xf32>
    %cst_28 = arith.constant 0.000000e+00 : f32
    %75 = vector.broadcast %cst_28 : f32 to vector<8x256xf32>
    %76 = arith.maximumf %74, %75 : vector<8x256xf32>
    %c0_29 = arith.constant 0 : index
    %c0_30 = arith.constant 0 : index
    %c0_31 = arith.constant 0 : index
    %77 = vector.load %arg10[%c0_29, %c0_30, %c0_31] : memref<1x8x256xf32, #tpu.memory_space<vmem>>, vector<1x8x256xf32>
    %78 = vector.shape_cast %77 : vector<1x8x256xf32> to vector<8x256xf32>
    %79 = vector.shape_cast %76 : vector<8x256xf32> to vector<1x8x256xf32>
    tpu.vector_store %arg10[%c0_29, %c0_30, %c0_31], %79 {strides = array<i32>} : memref<1x8x256xf32, #tpu.memory_space<vmem>>, vector<1x8x256xf32>,
    return
  }
  func.func @transform_0(%arg0: i32) -> (i32, i32, i32, i32) {
    %c0_i32 = arith.constant 0 : i32
    %c0_i32_0 = arith.constant 0 : i32
    %c0_i32_1 = arith.constant 0 : i32
    %c0_i32_2 = arith.constant 0 : i32
    return %arg0, %c0_i32, %c0_i32_0, %c0_i32_1 : i32, i32, i32, i32
  }
  func.func @transform_1(%arg0: i32) -> (i32, i32, i32, i32) {
    %c0_i32 = arith.constant 0 : i32
    %c0_i32_0 = arith.constant 0 : i32
    %c0_i32_1 = arith.constant 0 : i32
    %c0_i32_2 = arith.constant 0 : i32
    return %arg0, %c0_i32, %c0_i32_0, %c0_i32_1 : i32, i32, i32, i32
  }
  func.func @transform_2(%arg0: i32) -> (i32, i32) {
    %c0_i32 = arith.constant 0 : i32
    %c0_i32_0 = arith.constant 0 : i32
    %c0_i32_1 = arith.constant 0 : i32
    return %c0_i32, %c0_i32_0 : i32, i32
  }
  func.func @transform_3(%arg0: i32) -> (i32, i32) {
    %c0_i32 = arith.constant 0 : i32
    %c0_i32_0 = arith.constant 0 : i32
    %c0_i32_1 = arith.constant 0 : i32
    return %c0_i32, %c0_i32_0 : i32, i32
  }
  func.func @transform_4(%arg0: i32) -> (i32, i32) {
    %c0_i32 = arith.constant 0 : i32
    %c0_i32_0 = arith.constant 0 : i32
    %c0_i32_1 = arith.constant 0 : i32
    return %c0_i32, %c0_i32_0 : i32, i32
  }
  func.func @transform_5(%arg0: i32) -> (i32, i32) {
    %c0_i32 = arith.constant 0 : i32
    %c0_i32_0 = arith.constant 0 : i32
    %c0_i32_1 = arith.constant 0 : i32
    return %c0_i32, %c0_i32_0 : i32, i32
  }
  func.func @transform_6(%arg0: i32) -> (i32, i32) {
    %c0_i32 = arith.constant 0 : i32
    %c0_i32_0 = arith.constant 0 : i32
    %c0_i32_1 = arith.constant 0 : i32
    return %c0_i32, %c0_i32_0 : i32, i32
  }
  func.func @transform_7(%arg0: i32) -> (i32, i32) {
    %c0_i32 = arith.constant 0 : i32
    %c0_i32_0 = arith.constant 0 : i32
    %c0_i32_1 = arith.constant 0 : i32
    return %c0_i32, %c0_i32_0 : i32, i32
  }
  func.func @transform_8(%arg0: i32) -> (i32, i32) {
    %c0_i32 = arith.constant 0 : i32
    %c0_i32_0 = arith.constant 0 : i32
    %c0_i32_1 = arith.constant 0 : i32
    return %c0_i32, %c0_i32_0 : i32, i32
  }
  func.func @transform_9(%arg0: i32) -> (i32, i32, i32) {
    %c0_i32 = arith.constant 0 : i32
    %c0_i32_0 = arith.constant 0 : i32
    %c0_i32_1 = arith.constant 0 : i32
    return %arg0, %c0_i32, %c0_i32_0 : i32, i32, i32
  }
}

</mosaic_0001>

<bundles_post_ra>
// kernel: uafm_forward.1
= control target key start
LH: loop header
LB: loop body
LE: loop exit
PB: predicated region body
PF: predicated region fallthrough
CT: control target
= control target key end

     0   :  { %s6315_s30 = smov 0   ;;  %s9650_s0 = inlined_call_operand.vmem [shape: f32[2,16,16,4], index: 0, kind: input, shape index: {}]   ;;  %s9651_s1 = inlined_call_operand.vmem [shape: f32[2,16,8,8], index: 1, kind: input, shape index: {}]   ;;  %s9652_s2 = inlined_call_operand.vmem [shape: f32[16,8], index: 2, kind: input, shape index: {}]   ;;  %s9653_s3 = inlined_call_operand.vmem [shape: f32[36,8], index: 3, kind: input, shape index: {}]   ;;  %s9654_s4 = inlined_call_operand.vmem [shape: f32[1,8], index: 4, kind: input, shape index: {}]   ;;  %s9655_s5 = inlined_call_operand.vmem [shape: f32[1,8], index: 5, kind: input, shape index: {}]   ;;  %s9656_s6 = inlined_call_operand.vmem [shape: f32[8,72], index: 6, kind: input, shape index: {}]   ;;  %s9657_s7 = inlined_call_operand.vmem [shape: f32[8,1], index: 7, kind: input, shape index: {}]   ;;  %s9658_s8 = inlined_call_operand.vmem [shape: f32[8,1], index: 8, kind: input, shape index: {}]   ;;  %s9659_s9 = inlined_call_operand.vmem [shape: f32[2,8,256], index: 9, kind: output, shape index: {}]  }
   0x1 LB: > { %s5125_s10 = sadd.s32 4294967295, %s6249_s30   ;;  %p5129_p0 = scmp.ge.s32.totalorder %s6249_s30, 1  ;;  %s6249_s30 = sphi %s6315_s30, %s19_s30  }
   0x2   : > { %p297_p1 = scmp.lt.s32.totalorder %s6249_s30, 3 }
   0x4   : > { %p298_p2 = pnand %p5129_p0, %p297_p1 }
   0x6   : > { %301 = sbr.rel (%p298_p2) target bundleno = 1434 (0x59a), region = 56 }
   0xd   : > { %vm418_vm0 = vcmask 1040384   ;;  %p338_p3 = scmp.lt.s32.totalorder %s5125_s10, 1  ;;  %v6251_v0 = vmov 0.0   ;;  %vm584_vm1 = vcmask 1046528   ;;  %s6252_s15 = smov 4   ;;  %vm665_vm2 = vcmask 1045504  }
   0xe   : > { %v6323_v1 = vrot.slane %v6251_v0, 7  ;;  %s6253_s16 = smov 8   ;;  %s6254_s17 = smov 12   ;;  %vm1526_vm3 = vcmask 31744   ;;  %vm1559_vm4 = vcmask 64512   ;;  %vm1592_vm5 = vcmask 97280  }
   0xf   : > { %s10340_s10 = smov (!%p338_p3, %s5125_s10), 1  ;;  %s6255_s18 = smov 16   ;;  %vm1892_vm6 = vcmask 1043456   ;;  %vm1625_vm7 = vcmask 130048   ;;  %vm1658_vm8 = vcmask 162816   ;;  %vm1691_vm9 = vcmask 195584  }
  0x10   : > { %9871 = vst [vmem:[#allocation2_spill] sm:$0xff] %v6323_v1  ;;  %v6329_v2 = vsel %vm418_vm0, 0.0, %v6323_v1  ;;  %v6333_v3 = vsel %vm418_vm0, %v6323_v1, 0.0  ;;  %v586_v4 = vrot.slane %v6323_v1, 1  ;;  %s5238_s11 = sshll.u32 %s10340_s10, 8  ;;  %s6256_s19 = smov 20  }
  0x11   : > { %9872 = vst [vmem:[#allocation3_spill] sm:$0xff] %v6329_v2  ;;  %v585_v5 = vrot.slane %v6329_v2, 1  ;;  %v588_v6 = vrot.slane %v6333_v3, 1  ;;  %s6342_s14 = scalar_lea.vmem %s9650_s0, %s5238_s11  ;;  %s6257_s20 = smov 24   ;;  %vm1724_vm10 = vcmask 228352   ;;  %vm1757_vm11 = vcmask 261120  }
  0x12   : > { %v353_v9 = vld [vmem:[%s6342_s14] sm:$0xff]  ;;  %v354_v10 = vld [vmem:[%s6342_s14 + $0x8] sm:$0xff]  ;;  %v355_v11 = vld [vmem:[%s6342_s14 + $0x10] sm:$0xff]  ;;  %s5239_s12 = sshll.u32 %s10340_s10, 7  ;;  %s6259_s24 = smov 32   ;;  %vm1795_vm12 = vcmask 293888  }
  0x13   : > { %v587_v7 = vsel %vm584_vm1, %v585_v5, %v586_v4  ;;  %v589_v8 = vsel %vm584_vm1, %v586_v4, %v588_v6  ;;  %v421_v13 = vrot.slane %v353_v9, 7  ;;  %v422_v14 = vrot.slane %v354_v10, 7  ;;  %v356_v15 = vld [vmem:[%s6342_s14 + $0x18] sm:$0xff]  ;;  %v357_v17 = vld [vmem:[%s6342_s14 + $0x20] sm:$0xff]  ;;  %v358_v18 = vld [vmem:[%s6342_s14 + $0x28] sm:$0xff]  ;;  %s6262_s29 = smov 56  }
  0x14   : > { %v6349_v12 = vpack.i.bf16 %v589_v8, %v587_v7  ;;  %v424_v16 = vrot.slane %v355_v11, 7  ;;  %v425_v19 = vrot.slane %v356_v15, 7  ;;  %v427_v20 = vrot.slane %v357_v17, 7  ;;  %v359_v34 = vld [vmem:[%s6342_s14 + $0x30] sm:$0xff]  ;;  %v360_v35 = vld [vmem:[%s6342_s14 + $0x38] sm:$0xff]  ;;  %v361_v40 = vld [vmem:[%s6342_s14 + $0x40] sm:$0xff] }
  0x15   : > { %v428_v21 = vrot.slane %v358_v18, 7  ;;  %v6357_v22 = vsel %vm418_vm0, %v421_v13, %v422_v14  ;;  %v6360_v23 = vsel %vm418_vm0, %v422_v14, 0.0  ;;  %v6363_v24 = vsel %vm418_vm0, 0.0, %v421_v13  ;;  %v362_v41 = vld [vmem:[%s6342_s14 + $0x48] sm:$0xff]  ;;  %v363_v50 = vld [vmem:[%s6342_s14 + $0x50] sm:$0xff]  ;;  %v364_v57 = vld [vmem:[%s6342_s14 + $0x58] sm:$0xff] }
  0x16   : > { %9873 = vst [vmem:[#allocation4_spill] sm:$0xff] %v6349_v12  ;;  %5577 = vrot.lane.b32.xlu0 %v6349_v12, %s6252_s15  ;;  %9874 = vst [vmem:[#allocation5_spill] sm:$0xff] %v6357_v22  ;;  %v6366_v25 = vsel %vm418_vm0, 0.0, %v424_v16  ;;  %v591_v26 = vrot.slane %v6357_v22, 1  ;;  %v593_v27 = vrot.slane %v6360_v23, 1  ;;  %v590_v28 = vrot.slane %v6363_v24, 1 }
  0x17   : > { %9875 = vst [vmem:[#allocation6_spill] sm:$0xff] %v6363_v24  ;;  %9876 = vst [vmem:[#allocation7_spill] sm:$0xff] %v6366_v25  ;;  %v6372_v29 = vsel %vm418_vm0, %v424_v16, %v425_v19  ;;  %v595_v30 = vrot.slane %v6366_v25, 1  ;;  %v6377_v32 = vsel %vm418_vm0, %v425_v19, 0.0  ;;  %v6380_v33 = vsel %vm418_vm0, %v427_v20, %v428_v21  ;;  %v365_v5 = vld [vmem:[%s6342_s14 + $0x60] sm:$0xff]  ;;  %v366_v7 = vld [vmem:[%s6342_s14 + $0x68] sm:$0xff] }
  0x18   : > { %9877 = vst [vmem:[#allocation8_spill] sm:$0xff] %v6372_v29  ;;  %v596_v31 = vrot.slane %v6372_v29, 1  ;;  %9878 = vst [vmem:[#allocation9_spill] sm:$0xff] %v6380_v33  ;;  %v6385_v36 = vsel %vm584_vm1, %v591_v26, %v593_v27  ;;  %v6388_v37 = vsel %vm584_vm1, %v590_v28, %v591_v26  ;;  %v598_v38 = vrot.slane %v6377_v32, 1  ;;  %v367_v13 = vld [vmem:[%s6342_s14 + $0x70] sm:$0xff]  ;;  %v368_v18 = vld [vmem:[%s6342_s14 + $0x78] sm:$0xff] }
  0x19   : > { %v6392_v39 = vsel %vm418_vm0, 0.0, %v427_v20  ;;  %764 = vrot.lane.b32.xlu1 %v6385_v36, %s6252_s15  ;;  %v601_v44 = vrot.slane %v6380_v33, 1  ;;  %v6406_v45 = vsel %vm418_vm0, %v428_v21, 0.0  ;;  %v430_v48 = vrot.slane %v359_v34, 7  ;;  %v369_v34 = vld [vmem:[%s6342_s14 + $0x80] sm:$0xff]  ;;  %s6263_s11 = smov 64  }
  0x1a   : > { %9879 = vst [vmem:[#allocation10_spill] sm:$0xff] %v6392_v39  ;;  %762 = vrot.lane.b32.xlu0 %v6388_v37, %s6252_s15  ;;  %v6401_v42 = vsel %vm584_vm1, %v595_v30, %v596_v31  ;;  %v600_v43 = vrot.slane %v6392_v39, 1  ;;  %v6409_v46 = vsel %vm584_vm1, %v596_v31, %v598_v38  ;;  %v603_v47 = vrot.slane %v6406_v45, 1 }
  0x1b   : > { %9880 = vst [vmem:[#allocation11_spill] sm:$0xff] %v6401_v42  ;;  %9881 = vst [vmem:[#allocation12_spill] sm:$0xff] %v6409_v46  ;;  %v431_v49 = vrot.slane %v360_v35, 7  ;;  %v433_v51 = vrot.slane %v361_v40, 7  ;;  %v434_v52 = vrot.slane %v362_v41, 7  ;;  %v6420_v55 = vsel %vm418_vm0, 0.0, %v430_v48 }
  0x1c   : > { %v6414_v53 = vsel %vm584_vm1, %v600_v43, %v601_v44  ;;  %9884 = vst [vmem:[#allocation15_spill] sm:$0xff] %v6420_v55  ;;  %v6431_v58 = vsel %vm584_vm1, %v601_v44, %v603_v47  ;;  %v605_v59 = vrot.slane %v6420_v55, 1  ;;  %v436_v61 = vrot.slane %v363_v50, 7  ;;  %v370_v43 = vld [vmem:[%s6342_s14 + $0x88] sm:$0xff] }
  0x1d   : > { %9882 = vst [vmem:[#allocation13_spill] sm:$0xff] %v6414_v53  ;;  %v6417_v54 = vsel %vm418_vm0, %v430_v48, %v431_v49  ;;  %v6423_v56 = vsel %vm418_vm0, %v431_v49, 0.0  ;;  %766 = vrot.lane.b32.xlu1 %v6401_v42, %s6252_s15  ;;  %9885 = vst [vmem:[#allocation16_spill] sm:$0xff] %v6431_v58  ;;  %v6435_v60 = vsel %vm418_vm0, %v433_v51, %v434_v52  ;;  %v6440_v0 = vsel %vm418_vm0, 0.0, %v433_v51 }
  0x1e   : > { %9883 = vst [vmem:[#allocation14_spill] sm:$0xff] %v6417_v54  ;;  %768 = vrot.lane.b32.xlu0 %v6409_v46, %s6252_s15  ;;  %9886 = vst [vmem:[#allocation17_spill] sm:$0xff] %v6435_v60  ;;  %v606_v62 = vrot.slane %v6417_v54, 1  ;;  %v608_v63 = vrot.slane %v6423_v56, 1  ;;  %v6443_v4 = vsel %vm418_vm0, %v434_v52, 0.0  ;;  %v437_v6 = vrot.slane %v364_v57, 7 }
  0x1f   : > { %9887 = vst [vmem:[#allocation18_spill] sm:$0xff] %v6440_v0  ;;  %v610_v8 = vrot.slane %v6440_v0, 1  ;;  %v611_v9 = vrot.slane %v6435_v60, 1  ;;  %v613_v10 = vrot.slane %v6443_v4, 1  ;;  %v439_v11 = vrot.slane %v365_v5, 7 }
  0x20   : > { %v6456_v14 = vsel %vm584_vm1, %v605_v59, %v606_v62  ;;  %v6459_v15 = vsel %vm584_vm1, %v606_v62, %v608_v63  ;;  %v6462_v16 = vsel %vm418_vm0, 0.0, %v436_v61  ;;  %v440_v17 = vrot.slane %v366_v7, 7  ;;  %v371_v62 = vld [vmem:[%s6342_s14 + $0x90] sm:$0xff]  ;;  %v372_v63 = vld [vmem:[%s6342_s14 + $0x98] sm:$0xff] }
  0x21   : > { %770 = vrot.lane.b32.xlu1 %v6414_v53, %s6252_s15  ;;  %9888 = vst [vmem:[#allocation19_spill] sm:$0xff] %v6456_v14  ;;  %9889 = vst [vmem:[#allocation20_spill] sm:$0xff] %v6459_v15  ;;  %v6466_v19 = vsel %vm418_vm0, %v436_v61, %v437_v6  ;;  %v6469_v20 = vsel %vm418_vm0, %v437_v6, 0.0  ;;  %v6472_v21 = vsel %vm584_vm1, %v610_v8, %v611_v9  ;;  %v442_v26 = vrot.slane %v367_v13, 7 }
  0x22   : > { %772 = vrot.lane.b32.xlu0 %v6431_v58, %s6252_s15  ;;  %9890 = vst [vmem:[#allocation21_spill] sm:$0xff] %v6462_v16  ;;  %9891 = vst [vmem:[#allocation22_spill] sm:$0xff] %v6466_v19  ;;  %v6479_v27 = vsel %vm584_vm1, %v611_v9, %v613_v10  ;;  %v615_v28 = vrot.slane %v6462_v16, 1  ;;  %v6483_v30 = vsel %vm418_vm0, 0.0, %v439_v11  ;;  %v443_v31 = vrot.slane %v368_v18, 7 }
  0x23   : > { %9892 = vst [vmem:[#allocation23_spill] sm:$0xff] %v6472_v21  ;;  %9893 = vst [vmem:[#allocation24_spill] sm:$0xff] %v6479_v27  ;;  %v616_v35 = vrot.slane %v6466_v19, 1  ;;  %v618_v38 = vrot.slane %v6469_v20, 1  ;;  %v6489_v40 = vsel %vm418_vm0, %v439_v11, %v440_v17  ;;  %v6492_v41 = vsel %vm418_vm0, %v440_v17, 0.0 }
  0x24   : > { %9894 = vst [vmem:[#allocation25_spill] sm:$0xff] %v6483_v30  ;;  %9895 = vst [vmem:[#allocation26_spill] sm:$0xff] %v6489_v40  ;;  %v620_v44 = vrot.slane %v6483_v30, 1  ;;  %v6497_v47 = vsel %vm418_vm0, 0.0, %v442_v26  ;;  %v445_v48 = vrot.slane %v369_v34, 7  ;;  %v621_v49 = vrot.slane %v6489_v40, 1 }
  0x25   : > { %774 = vrot.lane.b32.xlu1 %v6456_v14, %s6252_s15  ;;  %9896 = vst [vmem:[#allocation27_spill] sm:$0xff] %v6497_v47  ;;  %v623_v50 = vrot.slane %v6492_v41, 1  ;;  %v6506_v51 = vsel %vm418_vm0, %v442_v26, %v443_v31  ;;  %v446_v52 = vrot.slane %v370_v43, 7  ;;  %v6509_v57 = vsel %vm584_vm1, %v615_v28, %v616_v35  ;;  %v373_v26 = vld [vmem:[%s6342_s14 + $0xa0] sm:$0xff]  ;;  %v374_v28 = vld [vmem:[%s6342_s14 + $0xa8] sm:$0xff] }
  0x26   : > { %776 = vrot.lane.b32.xlu0 %v6459_v15, %s6252_s15  ;;  %9897 = vst [vmem:[#allocation28_spill] sm:$0xff] %v6509_v57  ;;  %v6512_v59 = vsel %vm584_vm1, %v616_v35, %v618_v38  ;;  %v6515_v61 = vsel %vm418_vm0, %v443_v31, 0.0  ;;  %v625_v5 = vrot.slane %v6497_v47, 1  ;;  %v626_v6 = vrot.slane %v6506_v51, 1  ;;  %v382_v15 = vld [vmem:[%s6342_s14 + $0xe8] sm:$0xff] }
  0x27   : > { %9898 = vst [vmem:[#allocation29_spill] sm:$0xff] %v6512_v59  ;;  %v6526_v7 = vsel %vm584_vm1, %v620_v44, %v621_v49  ;;  %v6529_v8 = vsel %vm584_vm1, %v621_v49, %v623_v50  ;;  %v6532_v9 = vsel %vm418_vm0, %v445_v48, %v446_v52  ;;  %v6535_v10 = vsel %vm418_vm0, 0.0, %v445_v48  ;;  %v375_v44 = vld [vmem:[%s6342_s14 + $0xb0] sm:$0xff] }
  0x28   : > { %9899 = vst [vmem:[#allocation30_spill] sm:$0xff] %v6526_v7  ;;  %9900 = vst [vmem:[#allocation31_spill] sm:$0xff] %v6529_v8  ;;  %v628_v11 = vrot.slane %v6515_v61, 1  ;;  %v6539_v13 = vsel %vm418_vm0, %v446_v52, 0.0  ;;  %v448_v17 = vrot.slane %v371_v62, 7  ;;  %v449_v18 = vrot.slane %v372_v63, 7 }
  0x29   : > { %778 = vrot.lane.b32.xlu1 %v6472_v21, %s6252_s15  ;;  %v630_v31 = vrot.slane %v6535_v10, 1  ;;  %v631_v34 = vrot.slane %v6532_v9, 1  ;;  %v6550_v35 = vsel %vm584_vm1, %v625_v5, %v626_v6  ;;  %v633_v38 = vrot.slane %v6539_v13, 1  ;;  %v376_v63 = vld [vmem:[%s6342_s14 + $0xb8] sm:$0xff] }
  0x2a   : > { %780 = vrot.lane.b32.xlu0 %v6479_v27, %s6252_s15  ;;  %9901 = vst [vmem:[#allocation32_spill] sm:$0xff] %v6550_v35  ;;  %v451_v43 = vrot.slane %v373_v26, 7  ;;  %v6555_v48 = vsel %vm584_vm1, %v626_v6, %v628_v11  ;;  %v6558_v49 = vsel %vm418_vm0, %v448_v17, %v449_v18  ;;  %v6561_v50 = vsel %vm418_vm0, 0.0, %v448_v17 }
  0x2b   : > { %9902 = vst [vmem:[#allocation33_spill] sm:$0xff] %v6555_v48  ;;  %v452_v52 = vrot.slane %v374_v28, 7  ;;  %v6564_v62 = vsel %vm418_vm0, %v449_v18, 0.0  ;;  %v6568_v5 = vsel %vm584_vm1, %v630_v31, %v631_v34  ;;  %v454_v26 = vrot.slane %v375_v44, 7 }
  0x2c   : > { %9903 = vst [vmem:[#allocation34_spill] sm:$0xff] %v6568_v5  ;;  %v6575_v6 = vsel %vm584_vm1, %v631_v34, %v633_v38  ;;  %v635_v11 = vrot.slane %v6561_v50, 1  ;;  %v636_v17 = vrot.slane %v6558_v49, 1  ;;  %v6580_v18 = vsel %vm418_vm0, 0.0, %v451_v43  ;;  %v377_v34 = vld [vmem:[%s6342_s14 + $0xc0] sm:$0xff] }
  0x2d   : > { %782 = vrot.lane.b32.xlu1 %v6509_v57, %s6252_s15  ;;  %9904 = vst [vmem:[#allocation35_spill] sm:$0xff] %v6575_v6  ;;  %v638_v28 = vrot.slane %v6564_v62, 1  ;;  %v6584_v31 = vsel %vm418_vm0, %v451_v43, %v452_v52  ;;  %v6587_v44 = vsel %vm418_vm0, %v452_v52, 0.0  ;;  %v455_v12 = vrot.slane %v376_v63, 7  ;;  %v380_v57 = vld [vmem:[%s6342_s14 + $0xd8] sm:$0xff] }
  0x2e   : > { %784 = vrot.lane.b32.xlu0 %v6512_v59, %s6252_s15  ;;  %v640_v38 = vrot.slane %v6580_v18, 1  ;;  %v641_v43 = vrot.slane %v6584_v31, 1  ;;  %v643_v52 = vrot.slane %v6587_v44, 1  ;;  %v6602_v63 = vsel %vm418_vm0, 0.0, %v454_v26  ;;  %v379_v59 = vld [vmem:[%s6342_s14 + $0xd0] sm:$0xff] }
  0x2f   : > { %v460_v27 = vrot.slane %v379_v59, 7  ;;  %v464_v14 = vrot.slane %v382_v15, 7  ;;  %vm4734_vm13 = vcmask 326656   ;;  %vm4767_vm14 = vcmask 392192  }
  0x30   : > { %vm4800_vm15 = vcmask 457728  }
  0x31   : > { %786 = vrot.lane.b32.xlu1 %v6526_v7, %s6252_s15  ;;  %v6608_v7 = vsel %vm418_vm0, %v454_v26, %v455_v12  ;;  %v645_v26 = vrot.slane %v6602_v63, 1 }
  0x32   : > { %788 = vrot.lane.b32.xlu0 %v6529_v8, %s6252_s15  ;;  %v6605_v8 = vsel %vm584_vm1, %v636_v17, %v638_v28 }
  0x33   : > { %9906 = vst [vmem:[#allocation37_spill] sm:$0xff] %v6605_v8 }
  0x35   : > { %790 = vrot.lane.b32.xlu1 %v6550_v35, %s6252_s15  ;;  %v6597_v35 = vsel %vm584_vm1, %v635_v11, %v636_v17  ;;  %v6620_v17 = vsel %vm584_vm1, %v640_v38, %v641_v43 }
  0x36   : > { %792 = vrot.lane.b32.xlu0 %v6555_v48, %s6252_s15  ;;  %v378_v48 = vld [vmem:[%s6342_s14 + $0xc8] sm:$0xff]  ;;  %9905 = vst [vmem:[#allocation36_spill] sm:$0xff] %v6597_v35  ;;  %9907 = vst [vmem:[#allocation38_spill] sm:$0xff] %v6620_v17 }
  0x37   : > { %v458_v11 = vrot.slane %v378_v48, 7  ;;  %v6626_v48 = vsel %vm584_vm1, %v641_v43, %v643_v52 }
  0x38   : > { %9908 = vst [vmem:[#allocation39_spill] sm:$0xff] %v6626_v48 }
  0x39   : > { %794 = vrot.lane.b32.xlu1 %v6568_v5, %s6252_s15  ;;  %v6611_v5 = vsel %vm418_vm0, %v455_v12, 0.0  ;;  %v646_v12 = vrot.slane %v6608_v7, 1  ;;  %v6635_v38 = vsel %vm418_vm0, %v458_v11, 0.0 }
  0x3a   : > { %796 = vrot.lane.b32.xlu0 %v6575_v6, %s6252_s15  ;;  %v457_v6 = vrot.slane %v377_v34, 7  ;;  %v648_v28 = vrot.slane %v6611_v5, 1  ;;  %v653_v52 = vrot.slane %v6635_v38, 1 }
  0x3b   : > { %v6644_v43 = vsel %vm584_vm1, %v645_v26, %v646_v12 }
  0x3c   : > { %v6629_v34 = vsel %vm418_vm0, 0.0, %v457_v6  ;;  %v6632_v21 = vsel %vm418_vm0, %v457_v6, %v458_v11  ;;  %9909 = vst [vmem:[#allocation40_spill] sm:$0xff] %v6644_v43  ;;  %v6647_v59 = vsel %vm584_vm1, %v646_v12, %v648_v28 }
  0x3d   : > { %798 = vrot.lane.b32.xlu1 %v6597_v35, %s6252_s15  ;;  %v461_v35 = vrot.slane %v380_v57, 7  ;;  %9910 = vst [vmem:[#allocation41_spill] sm:$0xff] %v6647_v59  ;;  %v650_v57 = vrot.slane %v6629_v34, 1  ;;  %v651_v6 = vrot.slane %v6632_v21, 1 }
  0x3e   : > { %800 = vrot.lane.b32.xlu0 %v6605_v8, %s6252_s15  ;;  %v381_v8 = vld [vmem:[%s6342_s14 + $0xe0] sm:$0xff] }
  0x3f   : > { %v6653_v11 = vsel %vm418_vm0, %v460_v27, %v461_v35  ;;  %v463_v26 = vrot.slane %v381_v8, 7  ;;  %v6668_v58 = vsel %vm584_vm1, %v650_v57, %v651_v6 }
  0x40   : > { %9911 = vst [vmem:[#allocation42_spill] sm:$0xff] %v6653_v11  ;;  %v656_v28 = vrot.slane %v6653_v11, 1  ;;  %9912 = vst [vmem:[#allocation43_spill] sm:$0xff] %v6668_v58 }
  0x41   : > { %802 = vrot.lane.b32.xlu1 %v6620_v17, %s6252_s15  ;;  %v6656_v17 = vsel %vm418_vm0, 0.0, %v460_v27  ;;  %v6671_v27 = vsel %vm584_vm1, %v651_v6, %v653_v52  ;;  %v6675_v15 = vsel %vm418_vm0, %v463_v26, %v464_v14  ;;  %v6678_v8 = vsel %vm418_vm0, 0.0, %v463_v26 }
  0x42   : > { %804 = vrot.lane.b32.xlu0 %v6626_v48, %s6252_s15  ;;  %v6659_v48 = vsel %vm418_vm0, %v461_v35, 0.0  ;;  %v655_v12 = vrot.slane %v6656_v17, 1  ;;  %9913 = vst [vmem:[#allocation44_spill] sm:$0xff] %v6671_v27  ;;  %9914 = vst [vmem:[#allocation45_spill] sm:$0xff] %v6675_v15  ;;  %v666_v6 = vrot.slane %v6329_v2, 2  ;;  %v667_v52 = vrot.slane %v6323_v1, 2 }
  0x43   : > { %v658_v35 = vrot.slane %v6659_v48, 1  ;;  %9915 = vst [vmem:[#allocation46_spill] sm:$0xff] %v6678_v8 }
  0x44   : > { %v6689_v57 = vsel %vm584_vm1, %v655_v12, %v656_v28  ;;  %v668_v12 = vsel %vm665_vm2, %v666_v6, %v667_v52 }
  0x45   : > { %806 = vrot.lane.b32.xlu1 %v6644_v43, %s6252_s15  ;;  %v669_v43 = vrot.slane %v6333_v3, 2  ;;  %9916 = vst [vmem:[#allocation47_spill] sm:$0xff] %v6689_v57  ;;  %v6694_v26 = vsel %vm584_vm1, %v656_v28, %v658_v35  ;;  %v661_v3 = vrot.slane %v6675_v15, 1  ;;  %v671_v35 = vrot.slane %v6363_v24, 2 }
  0x46   : > { %808 = vrot.lane.b32.xlu0 %v6647_v59, %s6252_s15  ;;  %v6681_v59 = vsel %vm418_vm0, %v464_v14, 0.0  ;;  %9917 = vst [vmem:[#allocation48_spill] sm:$0xff] %v6694_v26  ;;  %v660_v14 = vrot.slane %v6678_v8, 1 }
  0x47   : > { %v663_v53 = vrot.slane %v6681_v59, 1  ;;  %v670_v2 = vsel %vm665_vm2, %v667_v52, %v669_v43  ;;  %v674_v43 = vrot.slane %v6360_v23, 2  ;;  %v677_v52 = vrot.slane %v6372_v29, 2 }
  0x48   : > { %v6706_v1 = vsel %vm584_vm1, %v660_v14, %v661_v3  ;;  %v679_v23 = vrot.slane %v6377_v32, 2  ;;  %v686_v32 = vrot.slane %v6420_v55, 2 }
  0x49   : > { %810 = vrot.lane.b32.xlu1 %v6668_v58, %s6252_s15  ;;  %9918 = vst [vmem:[#allocation49_spill] sm:$0xff] %v6706_v1  ;;  %v6709_v28 = vsel %vm584_vm1, %v661_v3, %v663_v53  ;;  %v676_v53 = vrot.slane %v6366_v25, 2  ;;  %v681_v3 = vrot.slane %v6392_v39, 2 }
  0x4a   : > { %812 = vrot.lane.b32.xlu0 %v6671_v27, %s6252_s15  ;;  %9919 = vst [vmem:[#allocation50_spill] sm:$0xff] %v6709_v28  ;;  %v672_v27 = vrot.slane %v6357_v22, 2 }
  0x4c   : > { %v6721_v6 = vsel %vm665_vm2, %v671_v35, %v672_v27  ;;  %v6730_v14 = vsel %vm665_vm2, %v672_v27, %v674_v43  ;;  %v684_v35 = vrot.slane %v6406_v45, 2  ;;  %v6744_v27 = vsel %vm665_vm2, %v677_v52, %v679_v23 }
  0x4d   : > { %814 = vrot.lane.b32.xlu1 %v6689_v57, %s6252_s15  ;;  %v691_v23 = vrot.slane %v6440_v0, 2 }
  0x4e   : > { %816 = vrot.lane.b32.xlu0 %v6694_v26, %s6252_s15  ;;  %v6717_v26 = vpack.i.bf16 %v670_v2, %v668_v12  ;;  %v6733_v2 = vsel %vm665_vm2, %v676_v53, %v677_v52  ;;  %v682_v12 = vrot.slane %v6380_v33, 2  ;;  %v687_v53 = vrot.slane %v6417_v54, 2 }
  0x4f   : > { %v689_v52 = vrot.slane %v6423_v56, 2  ;;  %v696_v56 = vrot.slane %v6462_v16, 2 }
  0x50   : > { %9920 = vst [vmem:[#allocation51_spill] sm:$0xff] %v6717_v26  ;;  %v6747_v43 = vsel %vm665_vm2, %v681_v3, %v682_v12  ;;  %v6759_v45 = vsel %vm665_vm2, %v686_v32, %v687_v53  ;;  %v692_v3 = vrot.slane %v6435_v60, 2  ;;  %v697_v32 = vrot.slane %v6466_v19, 2 }
  0x51   : > { %818 = vrot.lane.b32.xlu1 %v6706_v1, %s6252_s15  ;;  %9921 = vst [vmem:[#allocation52_spill] sm:$0xff] %v6747_v43  ;;  %9922 = vst [vmem:[#allocation53_spill] sm:$0xff] %v6759_v45 }
  0x52   : > { %820 = vrot.lane.b32.xlu0 %v6709_v28, %s6252_s15  ;;  %s7539_s15 = scalar_lea.vmem %s9651_s1, %s5239_s12 }
  0x55   : > { %5582 = vrot.lane.b32.xlu1 %v6717_v26, %s6253_s16  ;;  %v6756_v26 = vsel %vm665_vm2, %v682_v12, %v684_v35  ;;  %v6770_v12 = vsel %vm665_vm2, %v687_v53, %v689_v52  ;;  %v6773_v35 = vsel %vm665_vm2, %v691_v23, %v692_v3  ;;  %v6786_v53 = vsel %vm665_vm2, %v696_v56, %v697_v32 }
  0x56   : > { %858 = vrot.lane.b32.xlu0 %v6721_v6, %s6253_s16  ;;  %9923 = vst [vmem:[#allocation54_spill] sm:$0xff] %v6773_v35  ;;  %9924 = vst [vmem:[#allocation55_spill] sm:$0xff] %v6786_v53  ;;  %v701_v52 = vrot.slane %v6483_v30, 2  ;;  %v702_v23 = vrot.slane %v6489_v40, 2  ;;  %v707_v56 = vrot.slane %v6506_v51, 2 }
  0x59   : > { %860 = vrot.lane.b32.xlu1 %v6730_v14, %s6253_s16 }
  0x5a   : > { %862 = vrot.lane.b32.xlu0 %v6733_v2, %s6253_s16 }
  0x5d   : > { %864 = vrot.lane.b32.xlu1 %v6744_v27, %s6253_s16 }
  0x5e   : > { %866 = vrot.lane.b32.xlu0 %v6747_v43, %s6253_s16  ;;  %v694_v43 = vrot.slane %v6443_v4, 2 }
  0x60   : > { %v6783_v4 = vsel %vm665_vm2, %v692_v3, %v694_v43  ;;  %v6799_v43 = vsel %vm665_vm2, %v701_v52, %v702_v23  ;;  %v706_v3 = vrot.slane %v6497_v47, 2  ;;  %v712_v52 = vrot.slane %v6532_v9, 2 }
  0x61   : > { %868 = vrot.lane.b32.xlu1 %v6756_v26, %s6253_s16  ;;  %9925 = vst [vmem:[#allocation56_spill] sm:$0xff] %v6799_v43 }
  0x62   : > { %870 = vrot.lane.b32.xlu0 %v6759_v45, %s6253_s16  ;;  %v699_v45 = vrot.slane %v6469_v20, 2 }
  0x64   : > { %v6796_v20 = vsel %vm665_vm2, %v697_v32, %v699_v45  ;;  %v6812_v45 = vsel %vm665_vm2, %v706_v3, %v707_v56  ;;  %v711_v32 = vrot.slane %v6535_v10, 2  ;;  %v717_v3 = vrot.slane %v6558_v49, 2 }
  0x65   : > { %872 = vrot.lane.b32.xlu1 %v6770_v12, %s6253_s16  ;;  %9926 = vst [vmem:[#allocation57_spill] sm:$0xff] %v6812_v45 }
  0x66   : > { %874 = vrot.lane.b32.xlu0 %v6773_v35, %s6253_s16  ;;  %v704_v35 = vrot.slane %v6492_v41, 2 }
  0x68   : > { %v6809_v41 = vsel %vm665_vm2, %v702_v23, %v704_v35  ;;  %v714_v35 = vrot.slane %v6539_v13, 2  ;;  %v716_v23 = vrot.slane %v6561_v50, 2  ;;  %v721_v13 = vrot.slane %v6580_v18, 2 }
  0x69   : > { %876 = vrot.lane.b32.xlu1 %v6783_v4, %s6253_s16 }
  0x6a   : > { %878 = vrot.lane.b32.xlu0 %v6786_v53, %s6253_s16  ;;  %v709_v53 = vrot.slane %v6515_v61, 2  ;;  %v6824_v61 = vsel %vm665_vm2, %v711_v32, %v712_v52  ;;  %v722_v32 = vrot.slane %v6584_v31, 2 }
  0x6b   : > { %9927 = vst [vmem:[#allocation58_spill] sm:$0xff] %v6824_v61 }
  0x6d   : > { %880 = vrot.lane.b32.xlu1 %v6796_v20, %s6253_s16 }
  0x6e   : > { %882 = vrot.lane.b32.xlu0 %v6799_v43, %s6253_s16  ;;  %v6821_v43 = vsel %vm665_vm2, %v707_v56, %v709_v53  ;;  %v6835_v53 = vsel %vm665_vm2, %v712_v52, %v714_v35  ;;  %v6838_v56 = vsel %vm665_vm2, %v716_v23, %v717_v3  ;;  %v6851_v52 = vsel %vm665_vm2, %v721_v13, %v722_v32 }
  0x6f   : > { %9928 = vst [vmem:[#allocation59_spill] sm:$0xff] %v6838_v56  ;;  %9929 = vst [vmem:[#allocation60_spill] sm:$0xff] %v6851_v52  ;;  %v726_v35 = vrot.slane %v6602_v63, 2  ;;  %v727_v23 = vrot.slane %v6608_v7, 2  ;;  %v732_v13 = vrot.slane %v6632_v21, 2 }
  0x71   : > { %884 = vrot.lane.b32.xlu1 %v6809_v41, %s6253_s16 }
  0x72   : > { %886 = vrot.lane.b32.xlu0 %v6812_v45, %s6253_s16  ;;  %v719_v45 = vrot.slane %v6564_v62, 2 }
  0x74   : > { %v6848_v62 = vsel %vm665_vm2, %v717_v3, %v719_v45  ;;  %v6864_v45 = vsel %vm665_vm2, %v726_v35, %v727_v23  ;;  %v731_v3 = vrot.slane %v6629_v34, 2  ;;  %v737_v35 = vrot.slane %v6653_v11, 2 }
  0x75   : > { %888 = vrot.lane.b32.xlu1 %v6821_v43, %s6253_s16  ;;  %9931 = vst [vmem:[#allocation62_spill] sm:$0xff] %v6864_v45 }
  0x76   : > { %890 = vrot.lane.b32.xlu0 %v6824_v61, %s6253_s16  ;;  %v724_v61 = vrot.slane %v6587_v44, 2 }
  0x78   : > { %v6861_v44 = vsel %vm665_vm2, %v722_v32, %v724_v61  ;;  %v734_v61 = vrot.slane %v6635_v38, 2  ;;  %v736_v32 = vrot.slane %v6656_v17, 2  ;;  %v741_v38 = vrot.slane %v6678_v8, 2 }
  0x79   : > { %892 = vrot.lane.b32.xlu1 %v6835_v53, %s6253_s16  ;;  %9930 = vst [vmem:[#allocation61_spill] sm:$0xff] %v6861_v44 }
  0x7a   : > { %894 = vrot.lane.b32.xlu0 %v6838_v56, %s6253_s16  ;;  %v729_v56 = vrot.slane %v6611_v5, 2  ;;  %v6876_v5 = vsel %vm665_vm2, %v731_v3, %v732_v13  ;;  %v742_v3 = vrot.slane %v6675_v15, 2 }
  0x7b   : > { %9933 = vst [vmem:[#allocation64_spill] sm:$0xff] %v6876_v5 }
  0x7d   : > { %896 = vrot.lane.b32.xlu1 %v6848_v62, %s6253_s16 }
  0x7e   : > { %898 = vrot.lane.b32.xlu0 %v6851_v52, %s6253_s16  ;;  %v6873_v52 = vsel %vm665_vm2, %v727_v23, %v729_v56  ;;  %v6887_v56 = vsel %vm665_vm2, %v732_v13, %v734_v61  ;;  %v6890_v23 = vsel %vm665_vm2, %v736_v32, %v737_v35  ;;  %v6904_v13 = vsel %vm665_vm2, %v741_v38, %v742_v3 }
  0x7f   : > { %9932 = vst [vmem:[#allocation63_spill] sm:$0xff] %v6873_v52  ;;  %9934 = vst [vmem:[#allocation65_spill] sm:$0xff] %v6887_v56  ;;  %v744_v61 = vrot.slane %v6681_v59, 2 }
  0x80   : > { %9935 = vst [vmem:[#allocation66_spill] sm:$0xff] %v6890_v23  ;;  %9938 = vst [vmem:[#allocation69_spill] sm:$0xff] %v6904_v13 }
  0x81   : > { %900 = vrot.lane.b32.xlu1 %v6861_v44, %s6253_s16 }
  0x82   : > { %902 = vrot.lane.b32.xlu0 %v6864_v45, %s6253_s16  ;;  %v739_v45 = vrot.slane %v6659_v48, 2 }
  0x84   : > { %v6901_v48 = vsel %vm665_vm2, %v737_v35, %v739_v45 }
  0x85   : > { %904 = vrot.lane.b32.xlu1 %v6873_v52, %s6253_s16  ;;  %9937 = vst [vmem:[#allocation68_spill] sm:$0xff] %v6901_v48  ;;  %v9992_v52 = vld [vmem:[#allocation39_spill] sm:$0xff] }
  0x86   : > { %906 = vrot.lane.b32.xlu0 %v6876_v5, %s6253_s16 }
  0x88   : > { %v6894_v44 = vpop.permute.xlu0 %5577 }
  0x89   : > { %9936 = vst [vmem:[#allocation67_spill] sm:$0xff] %v6894_v44  ;;  %908 = vrot.lane.b32.xlu1 %v6887_v56, %s6253_s16  ;;  %v6916_v44 = vsel %vm665_vm2, %v742_v3, %v744_v61 }
  0x8a   : > { %910 = vrot.lane.b32.xlu0 %v6890_v23, %s6253_s16  ;;  %9941 = vst [vmem:[#allocation72_spill] sm:$0xff] %v6916_v44  ;;  %v9988_v23 = vld [vmem:[#allocation35_spill] sm:$0xff] }
  0x8b   : > { %v6907_v32 = vpop.permute.xlu1 %764 }
  0x8c   : > { %9939 = vst [vmem:[#allocation70_spill] sm:$0xff] %v6907_v32  ;;  %v6909_v5 = vpop.permute.xlu0 %762 }
  0x8d   : > { %9940 = vst [vmem:[#allocation71_spill] sm:$0xff] %v6909_v5  ;;  %912 = vrot.lane.b32.xlu1 %v6901_v48, %s6253_s16 }
  0x8e   : > { %914 = vrot.lane.b32.xlu0 %v6904_v13, %s6253_s16  ;;  %v9986_v13 = vld [vmem:[#allocation33_spill] sm:$0xff] }
  0x8f   : > { %v6918_v45 = vpop.permute.xlu1 %766 }
  0x90   : > { %9942 = vst [vmem:[#allocation73_spill] sm:$0xff] %v6918_v45  ;;  %v6920_v35 = vpop.permute.xlu0 %768 }
  0x91   : > { %9943 = vst [vmem:[#allocation74_spill] sm:$0xff] %v6920_v35  ;;  %916 = vrot.lane.b32.xlu1 %v6916_v44, %s6253_s16 }
  0x92   : > { %950 = vrot.lane.b32.xlu0 %v6363_v24, %s6254_s17 }
  0x93   : > { %v6926_v59 = vpop.permute.xlu1 %770 }
  0x94   : > { %9944 = vst [vmem:[#allocation75_spill] sm:$0xff] %v6926_v59  ;;  %v6928_v38 = vpop.permute.xlu0 %772 }
  0x95   : > { %9945 = vst [vmem:[#allocation76_spill] sm:$0xff] %v6928_v38  ;;  %952 = vrot.lane.b32.xlu1 %v6357_v22, %s6254_s17 }
  0x96   : > { %954 = vrot.lane.b32.xlu0 %v6366_v25, %s6254_s17 }
  0x97   : > { %v6934_v3 = vpop.permute.xlu1 %774 }
  0x98   : > { %9946 = vst [vmem:[#allocation77_spill] sm:$0xff] %v6934_v3  ;;  %v6936_v61 = vpop.permute.xlu0 %776 }
  0x99   : > { %9947 = vst [vmem:[#allocation78_spill] sm:$0xff] %v6936_v61  ;;  %956 = vrot.lane.b32.xlu1 %v6372_v29, %s6254_s17 }
  0x9a   : > { %958 = vrot.lane.b32.xlu0 %v6392_v39, %s6254_s17 }
  0x9b   : > { %v6942_v35 = vpop.permute.xlu1 %778 }
  0x9c   : > { %9948 = vst [vmem:[#allocation79_spill] sm:$0xff] %v6942_v35  ;;  %v6944_v59 = vpop.permute.xlu0 %780 }
  0x9d   : > { %9949 = vst [vmem:[#allocation80_spill] sm:$0xff] %v6944_v59  ;;  %960 = vrot.lane.b32.xlu1 %v6380_v33, %s6254_s17  ;;  %v7036_v33 = vld [vmem:[%s6342_s14 + $0xf8] sm:$0xff] }
  0x9e   : > { %962 = vrot.lane.b32.xlu0 %v6420_v55, %s6254_s17  ;;  %v9768_v29 = vrot.slane %v7036_v33, 7 }
  0x9f   : > { %v6950_v38 = vpop.permute.xlu1 %782 }
  0xa0   : > { %9950 = vst [vmem:[#allocation81_spill] sm:$0xff] %v6950_v38  ;;  %v6952_v3 = vpop.permute.xlu0 %784 }
  0xa1   : > { %9951 = vst [vmem:[#allocation82_spill] sm:$0xff] %v6952_v3  ;;  %964 = vrot.lane.b32.xlu1 %v6417_v54, %s6254_s17 }
  0xa2   : > { %966 = vrot.lane.b32.xlu0 %v6440_v0, %s6254_s17 }
  0xa3   : > { %v6958_v61 = vpop.permute.xlu1 %786 }
  0xa4   : > { %9952 = vst [vmem:[#allocation83_spill] sm:$0xff] %v6958_v61  ;;  %v6960_v35 = vpop.permute.xlu0 %788 }
  0xa5   : > { %9953 = vst [vmem:[#allocation84_spill] sm:$0xff] %v6960_v35  ;;  %968 = vrot.lane.b32.xlu1 %v6435_v60, %s6254_s17  ;;  %v383_v60 = vld [vmem:[%s6342_s14 + $0xf0] sm:$0xff] }
  0xa6   : > { %970 = vrot.lane.b32.xlu0 %v6462_v16, %s6254_s17  ;;  %v466_v0 = vrot.slane %v383_v60, 7 }
  0xa7   : > { %v6966_v59 = vpop.permute.xlu1 %790 }
  0xa8   : > { %9954 = vst [vmem:[#allocation85_spill] sm:$0xff] %v6966_v59  ;;  %v6968_v38 = vpop.permute.xlu0 %792  ;;  %v7043_v39 = vsel %vm418_vm0, 0.0, %v466_v0 }
  0xa9   : > { %972 = vrot.lane.b32.xlu1 %v6466_v19, %s6254_s17  ;;  %9959 = vst [vmem:[#allocation90_spill] sm:$0xff] %v7043_v39 }
  0xaa   : > { %974 = vrot.lane.b32.xlu0 %v6483_v30, %s6254_s17 }
  0xab   : > { %v6974_v3 = vpop.permute.xlu1 %794 }
  0xac   : > { %v6976_v61 = vpop.permute.xlu0 %796 }
  0xad   : > { %976 = vrot.lane.b32.xlu1 %v6489_v40, %s6254_s17 }
  0xae   : > { %978 = vrot.lane.b32.xlu0 %v6497_v47, %s6254_s17 }
  0xaf   : > { %v6982_v35 = vpop.permute.xlu1 %798 }
  0xb0   : > { %v6984_v59 = vpop.permute.xlu0 %800 }
  0xb1   : > { %980 = vrot.lane.b32.xlu1 %v6506_v51, %s6254_s17 }
  0xb2   : > { %982 = vrot.lane.b32.xlu0 %v6535_v10, %s6254_s17 }
  0xb3   : > { %v6990_v45 = vpop.permute.xlu1 %802 }
  0xb4   : > { %v6992_v22 = vpop.permute.xlu0 %804 }
  0xb5   : > { %984 = vrot.lane.b32.xlu1 %v6532_v9, %s6254_s17 }
  0xb6   : > { %986 = vrot.lane.b32.xlu0 %v6561_v50, %s6254_s17 }
  0xb7   : > { %v6998_v32 = vpop.permute.xlu1 %806 }
  0xb8   : > { %v7000_v24 = vpop.permute.xlu0 %808 }
  0xb9   : > { %988 = vrot.lane.b32.xlu1 %v6558_v49, %s6254_s17 }
  0xba   : > { %990 = vrot.lane.b32.xlu0 %v6580_v18, %s6254_s17 }
  0xbb   : > { %v7006_v5 = vpop.permute.xlu1 %810 }
  0xbc   : > { %v7008_v47 = vpop.permute.xlu0 %812 }
  0xbd   : > { %992 = vrot.lane.b32.xlu1 %v6584_v31, %s6254_s17 }
  0xbe   : > { %994 = vrot.lane.b32.xlu0 %v6602_v63, %s6254_s17 }
  0xbf   : > { %v7014_v40 = vpop.permute.xlu1 %814 }
  0xc0   : > { %v7016_v30 = vpop.permute.xlu0 %816 }
  0xc1   : > { %996 = vrot.lane.b32.xlu1 %v6608_v7, %s6254_s17 }
  0xc2   : > { %998 = vrot.lane.b32.xlu0 %v6629_v34, %s6254_s17 }
  0xc3   : > { %v7022_v19 = vpop.permute.xlu1 %818 }
  0xc4   : > { %9955 = vst [vmem:[#allocation86_spill] sm:$0xff] %v7022_v19  ;;  %v7024_v16 = vpop.permute.xlu0 %820  ;;  %v9995_v19 = vld [vmem:[#allocation41_spill] sm:$0xff] }
  0xc5   : > { %9956 = vst [vmem:[#allocation87_spill] sm:$0xff] %v7024_v16  ;;  %1000 = vrot.lane.b32.xlu1 %v6632_v21, %s6254_s17 }
  0xc6   : > { %1002 = vrot.lane.b32.xlu0 %v6656_v17, %s6254_s17 }
  0xc7   : > { %v7031_v54 = vpop.permute.xlu1 %5582 }
  0xc8   : > { %9957 = vst [vmem:[#allocation88_spill] sm:$0xff] %v7031_v54  ;;  %v7033_v55 = vpop.permute.xlu0 %858 }
  0xc9   : > { %9958 = vst [vmem:[#allocation89_spill] sm:$0xff] %v7033_v55  ;;  %1004 = vrot.lane.b32.xlu1 %v6653_v11, %s6254_s17  ;;  %v7057_v55 = vsel %vm418_vm0, %v466_v0, %v9768_v29  ;;  %v9998_v11 = vld [vmem:[#allocation44_spill] sm:$0xff] }
  0xca   : > { %1006 = vrot.lane.b32.xlu0 %v6678_v8, %s6254_s17  ;;  %9962 = vst [vmem:[#allocation93_spill] sm:$0xff] %v7057_v55 }
  0xcb   : > { %v7046_v25 = vpop.permute.xlu1 %860 }
  0xcc   : > { %9960 = vst [vmem:[#allocation91_spill] sm:$0xff] %v7046_v25  ;;  %v7048_v60 = vpop.permute.xlu0 %862 }
  0xcd   : > { %9961 = vst [vmem:[#allocation92_spill] sm:$0xff] %v7048_v60  ;;  %1008 = vrot.lane.b32.xlu1 %v6675_v15, %s6254_s17  ;;  %v9990_v15 = vld [vmem:[#allocation37_spill] sm:$0xff] }
  0xce   : > { %1010 = vrot.lane.b32.xlu0 %v7043_v39, %s6254_s17 }
  0xcf   : > { %v7059_v54 = vpop.permute.xlu1 %864 }
  0xd0   : > { %9963 = vst [vmem:[#allocation94_spill] sm:$0xff] %v7059_v54  ;;  %v7061_v44 = vpop.permute.xlu0 %866 }
  0xd1   : > { %9964 = vst [vmem:[#allocation95_spill] sm:$0xff] %v7061_v44  ;;  %1012 = vrot.lane.b32.xlu1 %v7057_v55, %s6254_s17  ;;  %v9969_v44 = vld [vmem:[#allocation13_spill] sm:$0xff]  ;;  %s6258_s17 = smov 28  }
  0xd2   : > { %1046 = vrot.lane.b32.xlu0 %v6388_v37, %s6255_s18 }
  0xd3   : > { %v7067_v60 = vpop.permute.xlu1 %868 }
  0xd4   : > { %9965 = vst [vmem:[#allocation96_spill] sm:$0xff] %v7067_v60  ;;  %v7069_v25 = vpop.permute.xlu0 %870 }
  0xd5   : > { %9966 = vst [vmem:[#allocation97_spill] sm:$0xff] %v7069_v25  ;;  %1048 = vrot.lane.b32.xlu1 %v6385_v36, %s6255_s18  ;;  %v9972_v25 = vld [vmem:[#allocation16_spill] sm:$0xff]  ;;  %v9973_v36 = vld [vmem:[#allocation19_spill] sm:$0xff] }
  0xd6   : > { %1050 = vrot.lane.b32.xlu0 %v6401_v42, %s6255_s18 }
  0xd7   : > { %v7075_v0 = vpop.permute.xlu1 %872 }
  0xd8   : > { %9967 = vst [vmem:[#allocation98_spill] sm:$0xff] %v7075_v0  ;;  %v7077_v29 = vpop.permute.xlu0 %874 }
  0xd9   : > { %9968 = vst [vmem:[#allocation99_spill] sm:$0xff] %v7077_v29  ;;  %1052 = vrot.lane.b32.xlu1 %v6409_v46, %s6255_s18  ;;  %v9976_v29 = vld [vmem:[#allocation20_spill] sm:$0xff]  ;;  %v9977_v46 = vld [vmem:[#allocation23_spill] sm:$0xff] }
  0xda   : > { %1054 = vrot.lane.b32.xlu0 %v9969_v44, %s6255_s18 }
  0xdb   : > { %v7083_v37 = vpop.permute.xlu1 %876 }
  0xdc   : > { %9970 = vst [vmem:[#allocation100_spill] sm:$0xff] %v7083_v37  ;;  %v7085_v60 = vpop.permute.xlu0 %878 }
  0xdd   : > { %9971 = vst [vmem:[#allocation101_spill] sm:$0xff] %v7085_v60  ;;  %1056 = vrot.lane.b32.xlu1 %v9972_v25, %s6255_s18  ;;  %v9980_v60 = vld [vmem:[#allocation24_spill] sm:$0xff] }
  0xde   : > { %1058 = vrot.lane.b32.xlu0 %v9973_v36, %s6255_s18  ;;  %v9981_v25 = vld [vmem:[#allocation28_spill] sm:$0xff] }
  0xdf   : > { %v7091_v54 = vpop.permute.xlu1 %880 }
  0xe0   : > { %9974 = vst [vmem:[#allocation102_spill] sm:$0xff] %v7091_v54  ;;  %v7093_v0 = vpop.permute.xlu0 %882 }
  0xe1   : > { %9975 = vst [vmem:[#allocation103_spill] sm:$0xff] %v7093_v0  ;;  %1060 = vrot.lane.b32.xlu1 %v9976_v29, %s6255_s18  ;;  %v9982_v0 = vld [vmem:[#allocation29_spill] sm:$0xff]  ;;  %v9983_v29 = vld [vmem:[#allocation30_spill] sm:$0xff] }
  0xe2   : > { %1062 = vrot.lane.b32.xlu0 %v9977_v46, %s6255_s18 }
  0xe3   : > { %v7099_v44 = vpop.permute.xlu1 %884 }
  0xe4   : > { %9978 = vst [vmem:[#allocation104_spill] sm:$0xff] %v7099_v44  ;;  %v7101_v37 = vpop.permute.xlu0 %886 }
  0xe5   : > { %9979 = vst [vmem:[#allocation105_spill] sm:$0xff] %v7101_v37  ;;  %1064 = vrot.lane.b32.xlu1 %v9980_v60, %s6255_s18  ;;  %v9984_v37 = vld [vmem:[#allocation31_spill] sm:$0xff]  ;;  %v9985_v60 = vld [vmem:[#allocation32_spill] sm:$0xff] }
  0xe6   : > { %1066 = vrot.lane.b32.xlu0 %v9981_v25, %s6255_s18 }
  0xe7   : > { %v7107_v36 = vpop.permute.xlu1 %888 }
  0xe8   : > { %v7109_v54 = vpop.permute.xlu0 %890 }
  0xe9   : > { %1068 = vrot.lane.b32.xlu1 %v9982_v0, %s6255_s18  ;;  %v9987_v0 = vld [vmem:[#allocation34_spill] sm:$0xff] }
  0xea   : > { %1070 = vrot.lane.b32.xlu0 %v9983_v29, %s6255_s18 }
  0xeb   : > { %v7115_v46 = vpop.permute.xlu1 %892 }
  0xec   : > { %v7117_v44 = vpop.permute.xlu0 %894 }
  0xed   : > { %1072 = vrot.lane.b32.xlu1 %v9984_v37, %s6255_s18  ;;  %v9989_v37 = vld [vmem:[#allocation36_spill] sm:$0xff] }
  0xee   : > { %1074 = vrot.lane.b32.xlu0 %v9985_v60, %s6255_s18 }
  0xef   : > { %v7123_v25 = vpop.permute.xlu1 %896 }
  0xf0   : > { %v7125_v42 = vpop.permute.xlu0 %898 }
  0xf1   : > { %1076 = vrot.lane.b32.xlu1 %v9986_v13, %s6255_s18  ;;  %v9991_v13 = vld [vmem:[#allocation38_spill] sm:$0xff] }
  0xf2   : > { %1078 = vrot.lane.b32.xlu0 %v9987_v0, %s6255_s18 }
  0xf3   : > { %v7131_v29 = vpop.permute.xlu1 %900 }
  0xf4   : > { %v7133_v48 = vpop.permute.xlu0 %902 }
  0xf5   : > { %1080 = vrot.lane.b32.xlu1 %v9988_v23, %s6255_s18  ;;  %v9993_v23 = vld [vmem:[#allocation40_spill] sm:$0xff] }
  0xf6   : > { %1082 = vrot.lane.b32.xlu0 %v9989_v37, %s6255_s18 }
  0xf7   : > { %v7139_v60 = vpop.permute.xlu1 %904 }
  0xf8   : > { %v7141_v56 = vpop.permute.xlu0 %906 }
  0xf9   : > { %1084 = vrot.lane.b32.xlu1 %v9990_v15, %s6255_s18 }
  0xfa   : > { %1086 = vrot.lane.b32.xlu0 %v9991_v13, %s6255_s18 }
  0xfb   : > { %v7147_v0 = vpop.permute.xlu1 %908 }
  0xfc   : > { %v7149_v16 = vpop.permute.xlu0 %910 }
  0xfd   : > { %1088 = vrot.lane.b32.xlu1 %v9992_v52, %s6255_s18  ;;  %v749_v52 = vrot.slane %v7057_v55, 1 }
  0xfe   : > { %1090 = vrot.lane.b32.xlu0 %v9993_v23, %s6255_s18  ;;  %v748_v23 = vrot.slane %v7043_v39, 1 }
  0xff   : > { %v7155_v37 = vpop.permute.xlu1 %912 }
 0x100   : > { %v7157_v8 = vpop.permute.xlu0 %914 }
 0x101   : > { %9994 = vst [vmem:[#allocation106_spill] sm:$0xff] %v7157_v8  ;;  %1092 = vrot.lane.b32.xlu1 %v9995_v19, %s6255_s18 }
 0x102   : > { %1094 = vrot.lane.b32.xlu0 %v6668_v58, %s6255_s18  ;;  %v10001_v58 = vrot.slane %v7036_v33, 7 }
 0x103   : > { %v7163_v13 = vpop.permute.xlu1 %916 }
 0x104   : > { %9996 = vst [vmem:[#allocation107_spill] sm:$0xff] %v7163_v13  ;;  %v7165_v15 = vpop.permute.xlu0 %950  ;;  %v7180_v13 = vsel %vm418_vm0, %v10001_v58, 0.0 }
 0x105   : > { %9997 = vst [vmem:[#allocation108_spill] sm:$0xff] %v7165_v15  ;;  %1096 = vrot.lane.b32.xlu1 %v9998_v11, %s6255_s18  ;;  %v10002_v15 = vld [vmem:[#allocation48_spill] sm:$0xff]  ;;  %v751_v11 = vrot.slane %v7180_v13, 1 }
 0x106   : > { %1098 = vrot.lane.b32.xlu0 %v6689_v57, %s6255_s18  ;;  %v7187_v57 = vsel %vm584_vm1, %v748_v23, %v749_v52 }
 0x107   : > { %v7173_v8 = vpop.permute.xlu1 %952  ;;  %10003 = vst [vmem:[#allocation111_spill] sm:$0xff] %v7187_v57  ;;  %v7199_v33 = vsel %vm584_vm1, %v749_v52, %v751_v11 }
 0x108   : > { %9999 = vst [vmem:[#allocation109_spill] sm:$0xff] %v7173_v8  ;;  %v7175_v19 = vpop.permute.xlu0 %954  ;;  %10006 = vst [vmem:[#allocation114_spill] sm:$0xff] %v7199_v33 }
 0x109   : > { %10000 = vst [vmem:[#allocation110_spill] sm:$0xff] %v7175_v19  ;;  %1100 = vrot.lane.b32.xlu1 %v10002_v15, %s6255_s18  ;;  %v10042_v15 = vld [vmem:[#allocation93_spill] sm:$0xff] }
 0x10a   : > { %1102 = vrot.lane.b32.xlu0 %v6706_v1, %s6255_s18  ;;  %v10037_v1 = vld [vmem:[#allocation45_spill] sm:$0xff] }
 0x10b   : > { %v7190_v55 = vpop.permute.xlu1 %956 }
 0x10c   : > { %10004 = vst [vmem:[#allocation112_spill] sm:$0xff] %v7190_v55  ;;  %v7192_v8 = vpop.permute.xlu0 %958 }
 0x10d   : > { %10005 = vst [vmem:[#allocation113_spill] sm:$0xff] %v7192_v8  ;;  %1104 = vrot.lane.b32.xlu1 %v6709_v28, %s6255_s18 }
 0x10e   : > { %1106 = vrot.lane.b32.xlu0 %v7187_v57, %s6255_s18 }
 0x10f   : > { %v7201_v58 = vpop.permute.xlu1 %960 }
 0x110   : > { %10007 = vst [vmem:[#allocation115_spill] sm:$0xff] %v7201_v58  ;;  %v7203_v19 = vpop.permute.xlu0 %962 }
 0x111   : > { %10008 = vst [vmem:[#allocation116_spill] sm:$0xff] %v7203_v19  ;;  %1108 = vrot.lane.b32.xlu1 %v7199_v33, %s6255_s18  ;;  %v10013_v19 = vld [vmem:[#allocation52_spill] sm:$0xff] }
 0x112   : > { %1142 = vrot.lane.b32.xlu0 %v6721_v6, %s6256_s19 }
 0x113   : > { %v7209_v23 = vpop.permute.xlu1 %964 }
 0x114   : > { %10009 = vst [vmem:[#allocation117_spill] sm:$0xff] %v7209_v23  ;;  %v7211_v8 = vpop.permute.xlu0 %966 }
 0x115   : > { %10010 = vst [vmem:[#allocation118_spill] sm:$0xff] %v7211_v8  ;;  %1144 = vrot.lane.b32.xlu1 %v6730_v14, %s6256_s19  ;;  %v10016_v14 = vld [vmem:[#allocation53_spill] sm:$0xff] }
 0x116   : > { %1146 = vrot.lane.b32.xlu0 %v6733_v2, %s6256_s19 }
 0x117   : > { %v7217_v11 = vpop.permute.xlu1 %968 }
 0x118   : > { %10011 = vst [vmem:[#allocation119_spill] sm:$0xff] %v7217_v11  ;;  %v7219_v52 = vpop.permute.xlu0 %970 }
 0x119   : > { %10012 = vst [vmem:[#allocation120_spill] sm:$0xff] %v7219_v52  ;;  %1148 = vrot.lane.b32.xlu1 %v6744_v27, %s6256_s19  ;;  %v10019_v52 = vld [vmem:[#allocation54_spill] sm:$0xff] }
 0x11a   : > { %1150 = vrot.lane.b32.xlu0 %v10013_v19, %s6256_s19 }
 0x11b   : > { %v7225_v6 = vpop.permute.xlu1 %972 }
 0x11c   : > { %10014 = vst [vmem:[#allocation52_spill] sm:$0xff] %v7225_v6  ;;  %v7227_v23 = vpop.permute.xlu0 %974 }
 0x11d   : > { %10015 = vst [vmem:[#allocation121_spill] sm:$0xff] %v7227_v23  ;;  %1152 = vrot.lane.b32.xlu1 %v6756_v26, %s6256_s19  ;;  %v10022_v23 = vld [vmem:[#allocation55_spill] sm:$0xff] }
 0x11e   : > { %1154 = vrot.lane.b32.xlu0 %v10016_v14, %s6256_s19 }
 0x11f   : > { %v7233_v8 = vpop.permute.xlu1 %976 }
 0x120   : > { %10017 = vst [vmem:[#allocation53_spill] sm:$0xff] %v7233_v8  ;;  %v7235_v11 = vpop.permute.xlu0 %978  ;;  %v1545_v8 = vsel %vm1526_vm3, %v6535_v10, %v6974_v3  ;;  %v1546_v3 = vsel %vm1526_vm3, %v6532_v9, %v6976_v61  ;;  %v10024_v61 = vld [vmem:[#allocation57_spill] sm:$0xff] }
 0x121   : > { %10018 = vst [vmem:[#allocation122_spill] sm:$0xff] %v7235_v11  ;;  %1156 = vrot.lane.b32.xlu1 %v6770_v12, %s6256_s19  ;;  %v1544_v11 = vsel %vm1526_vm3, %v6506_v51, %v6968_v38  ;;  %v10023_v38 = vld [vmem:[#allocation56_spill] sm:$0xff] }
 0x122   : > { %1158 = vrot.lane.b32.xlu0 %v10019_v52, %s6256_s19 }
 0x123   : > { %v7241_v58 = vpop.permute.xlu1 %980 }
 0x124   : > { %10020 = vst [vmem:[#allocation54_spill] sm:$0xff] %v7241_v58  ;;  %v7243_v6 = vpop.permute.xlu0 %982  ;;  %v1577_v58 = vsel %vm1559_vm4, %v1544_v11, %v7107_v36 }
 0x125   : > { %10021 = vst [vmem:[#allocation123_spill] sm:$0xff] %v7243_v6  ;;  %1160 = vrot.lane.b32.xlu1 %v6783_v4, %s6256_s19  ;;  %v1578_v6 = vsel %vm1559_vm4, %v1545_v8, %v7109_v54  ;;  %v1547_v54 = vsel %vm1526_vm3, %v6561_v50, %v6982_v35  ;;  %v1579_v8 = vsel %vm1559_vm4, %v1546_v3, %v7115_v46 }
 0x126   : > { %1162 = vrot.lane.b32.xlu0 %v10022_v23, %s6256_s19  ;;  %v1548_v46 = vsel %vm1526_vm3, %v6558_v49, %v6984_v59  ;;  %v10025_v59 = vld [vmem:[#allocation58_spill] sm:$0xff] }
 0x127   : > { %v985_v33 = vpop.permute.xlu1 %984  ;;  %v1581_v35 = vsel %vm1559_vm4, %v1548_v46, %v7123_v25  ;;  %v1550_v25 = vsel %vm1526_vm3, %v6584_v31, %v6992_v22  ;;  %v10026_v22 = vld [vmem:[#allocation59_spill] sm:$0xff] }
 0x128   : > { %v987_v57 = vpop.permute.xlu0 %986  ;;  %v7260_v55 = vsel %vm1592_vm5, %v1577_v58, %v985_v33 }
 0x129   : > { %v7263_v28 = vsel %vm1592_vm5, %v1578_v6, %v987_v57  ;;  %1164 = vrot.lane.b32.xlu1 %v6796_v20, %s6256_s19  ;;  %v1580_v57 = vsel %vm1559_vm4, %v1547_v54, %v7117_v44  ;;  %v1549_v44 = vsel %vm1526_vm3, %v6580_v18, %v6990_v45  ;;  %v1583_v45 = vsel %vm1559_vm4, %v1550_v25, %v7131_v29 }
 0x12a   : > { %1166 = vrot.lane.b32.xlu0 %v10023_v38, %s6256_s19  ;;  %v1582_v6 = vsel %vm1559_vm4, %v1549_v44, %v7125_v42  ;;  %v1551_v42 = vsel %vm1526_vm3, %v6602_v63, %v6998_v32  ;;  %v1552_v29 = vsel %vm1526_vm3, %v6608_v7, %v7000_v24  ;;  %v10027_v24 = vld [vmem:[#allocation60_spill] sm:$0xff] }
 0x12b   : > { %v989_v36 = vpop.permute.xlu1 %988  ;;  %v1585_v32 = vsel %vm1559_vm4, %v1552_v29, %v7139_v60 }
 0x12c   : > { %v991_v33 = vpop.permute.xlu0 %990  ;;  %v7280_v58 = vsel %vm1592_vm5, %v1579_v8, %v989_v36  ;;  %v1584_v36 = vsel %vm1559_vm4, %v1551_v42, %v7133_v48  ;;  %v1553_v48 = vsel %vm1526_vm3, %v6629_v34, %v7006_v5  ;;  %v1554_v5 = vsel %vm1526_vm3, %v6632_v21, %v7008_v47  ;;  %v10028_v47 = vld [vmem:[#allocation61_spill] sm:$0xff] }
 0x12d   : > { %v7283_v11 = vsel %vm1592_vm5, %v1580_v57, %v991_v33  ;;  %1168 = vrot.lane.b32.xlu1 %v6809_v41, %s6256_s19  ;;  %v1587_v60 = vsel %vm1559_vm4, %v1554_v5, %v7147_v0 }
 0x12e   : > { %1170 = vrot.lane.b32.xlu0 %v10024_v61, %s6256_s19 }
 0x12f   : > { %v993_v3 = vpop.permute.xlu1 %992 }
 0x130   : > { %v995_v54 = vpop.permute.xlu0 %994  ;;  %v7300_v8 = vsel %vm1592_vm5, %v1581_v35, %v993_v3 }
 0x131   : > { %v7303_v57 = vsel %vm1592_vm5, %v1582_v6, %v995_v54  ;;  %1172 = vrot.lane.b32.xlu1 %v6821_v43, %s6256_s19  ;;  %v1586_v6 = vsel %vm1559_vm4, %v1553_v48, %v7141_v56  ;;  %v1555_v56 = vsel %vm1526_vm3, %v6656_v17, %v7014_v40  ;;  %v10029_v48 = vld [vmem:[#allocation62_spill] sm:$0xff] }
 0x132   : > { %1174 = vrot.lane.b32.xlu0 %v10025_v59, %s6256_s19  ;;  %v10030_v40 = vld [vmem:[#allocation42_spill] sm:$0xff] }
 0x133   : > { %v997_v33 = vpop.permute.xlu1 %996  ;;  %v1556_v0 = vsel %vm1526_vm3, %v10030_v40, %v7016_v30  ;;  %v10034_v30 = vld [vmem:[#allocation63_spill] sm:$0xff]  ;;  %v754_v40 = vrot.slane %v10042_v15, 2  ;;  %v10050_v15 = vld [vmem:[#allocation72_spill] sm:$0xff] }
 0x134   : > { %v999_v46 = vpop.permute.xlu0 %998  ;;  %v7320_v44 = vsel %vm1592_vm5, %v1583_v45, %v997_v33  ;;  %v1588_v45 = vsel %vm1559_vm4, %v1555_v56, %v7149_v16  ;;  %v10032_v16 = vld [vmem:[#allocation46_spill] sm:$0xff] }
 0x135   : > { %v7323_v35 = vsel %vm1592_vm5, %v1584_v36, %v999_v46  ;;  %1176 = vrot.lane.b32.xlu1 %v6835_v53, %s6256_s19 }
 0x136   : > { %1178 = vrot.lane.b32.xlu0 %v10026_v22, %s6256_s19 }
 0x137   : > { %v1001_v3 = vpop.permute.xlu1 %1000 }
 0x138   : > { %v1003_v54 = vpop.permute.xlu0 %1002  ;;  %v7340_v25 = vsel %vm1592_vm5, %v1585_v32, %v1001_v3  ;;  %v10031_v32 = vld [vmem:[#allocation86_spill] sm:$0xff]  ;;  %v1589_v3 = vsel %vm1559_vm4, %v1556_v0, %v7155_v37  ;;  %v10038_v0 = vld [vmem:[#allocation107_spill] sm:$0xff] }
 0x139   : > { %v7343_v42 = vsel %vm1592_vm5, %v1586_v6, %v1003_v54  ;;  %1180 = vrot.lane.b32.xlu1 %v6848_v62, %s6256_s19  ;;  %v1557_v6 = vsel %vm1526_vm3, %v10032_v16, %v10031_v32  ;;  %v10033_v54 = vld [vmem:[#allocation106_spill] sm:$0xff]  ;;  %v10036_v32 = vld [vmem:[#allocation87_spill] sm:$0xff] }
 0x13a   : > { %1182 = vrot.lane.b32.xlu0 %v10027_v24, %s6256_s19  ;;  %v1590_v5 = vsel %vm1559_vm4, %v1557_v6, %v10033_v54  ;;  %v1558_v37 = vsel %vm1526_vm3, %v10037_v1, %v10036_v32 }
 0x13b   : > { %v1005_v36 = vpop.permute.xlu1 %1004  ;;  %v1591_v6 = vsel %vm1559_vm4, %v1558_v37, %v10038_v0  ;;  %v10045_v37 = vld [vmem:[#allocation68_spill] sm:$0xff]  ;;  %v10046_v0 = vld [vmem:[#allocation69_spill] sm:$0xff] }
 0x13c   : > { %v1007_v33 = vpop.permute.xlu0 %1006  ;;  %v7360_v46 = vsel %vm1592_vm5, %v1587_v60, %v1005_v36 }
 0x13d   : > { %v7363_v29 = vsel %vm1592_vm5, %v1588_v45, %v1007_v33  ;;  %1184 = vrot.lane.b32.xlu1 %v10028_v47, %s6256_s19  ;;  %v10035_v33 = vld [vmem:[#allocation64_spill] sm:$0xff] }
 0x13e   : > { %1186 = vrot.lane.b32.xlu0 %v10029_v48, %s6256_s19 }
 0x13f   : > { %v1009_v56 = vpop.permute.xlu1 %1008 }
 0x140   : > { %v1011_v60 = vpop.permute.xlu0 %1010  ;;  %v7380_v45 = vsel %vm1592_vm5, %v1589_v3, %v1009_v56  ;;  %v10041_v56 = vld [vmem:[#allocation66_spill] sm:$0xff] }
 0x141   : > { %v7383_v36 = vsel %vm1592_vm5, %v1590_v5, %v1011_v60  ;;  %1188 = vrot.lane.b32.xlu1 %v10034_v30, %s6256_s19  ;;  %v10040_v5 = vld [vmem:[#allocation65_spill] sm:$0xff]  ;;  %v753_v60 = vrot.slane %v7043_v39, 2 }
 0x142   : > { %1190 = vrot.lane.b32.xlu0 %v10035_v33, %s6256_s19 }
 0x143   : > { %v1013_v54 = vpop.permute.xlu1 %1012 }
 0x144   : > { %v7394_v16 = vpop.permute.xlu0 %1046  ;;  %v7397_v3 = vsel %vm1592_vm5, %v1591_v6, %v1013_v54  ;;  %v7414_v6 = vsel %vm665_vm2, %v753_v60, %v754_v40  ;;  %v756_v54 = vrot.slane %v7180_v13, 2  ;;  %v10054_v13 = vld [vmem:[#allocation7_spill] sm:$0xff] }
 0x145   : > { %10039 = vst [vmem:[#allocation55_spill] sm:$0xff] %v7394_v16  ;;  %1192 = vrot.lane.b32.xlu1 %v10040_v5, %s6256_s19  ;;  %10047 = vst [vmem:[#allocation58_spill] sm:$0xff] %v7414_v6 }
 0x146   : > { %1194 = vrot.lane.b32.xlu0 %v10041_v56, %s6256_s19 }
 0x147   : > { %v7405_v32 = vpop.permute.xlu1 %1048 }
 0x148   : > { %10043 = vst [vmem:[#allocation56_spill] sm:$0xff] %v7405_v32  ;;  %v7407_v1 = vpop.permute.xlu0 %1050 }
 0x149   : > { %10044 = vst [vmem:[#allocation57_spill] sm:$0xff] %v7407_v1  ;;  %1196 = vrot.lane.b32.xlu1 %v10045_v37, %s6256_s19  ;;  %v7426_v1 = vsel %vm665_vm2, %v754_v40, %v756_v54  ;;  %v10058_v40 = vld [vmem:[#allocation10_spill] sm:$0xff]  ;;  %v10079_v37 = vld [vmem:[#allocation13_spill] sm:$0xff] }
 0x14a   : > { %1198 = vrot.lane.b32.xlu0 %v10046_v0, %s6256_s19  ;;  %10051 = vst [vmem:[#allocation61_spill] sm:$0xff] %v7426_v1 }
 0x14b   : > { %v7417_v16 = vpop.permute.xlu1 %1052 }
 0x14c   : > { %10048 = vst [vmem:[#allocation59_spill] sm:$0xff] %v7417_v16  ;;  %v7419_v39 = vpop.permute.xlu0 %1054  ;;  %v1792_v16 = vld [vmem:[%s9653_s3 + $0x10] sm:$0xff] }
 0x14d   : > { %10049 = vst [vmem:[#allocation60_spill] sm:$0xff] %v7419_v39  ;;  %1200 = vrot.lane.b32.xlu1 %v10050_v15, %s6256_s19  ;;  %v1793_v15 = vld [vmem:[%s9653_s3 + $0x18] sm:$0xff] }
 0x14e   : > { %1202 = vrot.lane.b32.xlu0 %v7414_v6, %s6256_s19  ;;  %v10057_v6 = vld [vmem:[#allocation8_spill] sm:$0xff] }
 0x14f   : > { %v7428_v32 = vpop.permute.xlu1 %1056 }
 0x150   : > { %10052 = vst [vmem:[#allocation62_spill] sm:$0xff] %v7428_v32  ;;  %v7430_v0 = vpop.permute.xlu0 %1058  ;;  %v10062_v32 = vld [vmem:[#allocation15_spill] sm:$0xff] }
 0x151   : > { %10053 = vst [vmem:[#allocation86_spill] sm:$0xff] %v7430_v0  ;;  %1204 = vrot.lane.b32.xlu1 %v7426_v1, %s6256_s19  ;;  %v10061_v1 = vld [vmem:[#allocation9_spill] sm:$0xff]  ;;  %s5240_s19 = sshll.u32 %s10340_s10, 4 }
 0x152   : > { %1238 = vrot.lane.b32.xlu0 %v10054_v13, %s6257_s20  ;;  %s352_s23 = scalar_lea.vmem %s9659_s9, %s5240_s19 }
 0x153   : > { %v7436_v60 = vpop.permute.xlu1 %1060 }
 0x154   : > { %10055 = vst [vmem:[#allocation106_spill] sm:$0xff] %v7436_v60  ;;  %v7438_v39 = vpop.permute.xlu0 %1062 }
 0x155   : > { %10056 = vst [vmem:[#allocation63_spill] sm:$0xff] %v7438_v39  ;;  %1240 = vrot.lane.b32.xlu1 %v10057_v6, %s6257_s20  ;;  %v10065_v39 = vld [vmem:[#allocation14_spill] sm:$0xff] }
 0x156   : > { %1242 = vrot.lane.b32.xlu0 %v10058_v40, %s6257_s20  ;;  %v10066_v6 = vld [vmem:[#allocation18_spill] sm:$0xff] }
 0x157   : > { %v7444_v54 = vpop.permute.xlu1 %1064 }
 0x158   : > { %10059 = vst [vmem:[#allocation64_spill] sm:$0xff] %v7444_v54  ;;  %v7446_v0 = vpop.permute.xlu0 %1066 }
 0x159   : > { %10060 = vst [vmem:[#allocation87_spill] sm:$0xff] %v7446_v0  ;;  %1244 = vrot.lane.b32.xlu1 %v10061_v1, %s6257_s20  ;;  %v10069_v0 = vld [vmem:[#allocation17_spill] sm:$0xff] }
 0x15a   : > { %1246 = vrot.lane.b32.xlu0 %v10062_v32, %s6257_s20  ;;  %v10070_v1 = vld [vmem:[#allocation21_spill] sm:$0xff] }
 0x15b   : > { %v7452_v13 = vpop.permute.xlu1 %1068 }
 0x15c   : > { %10063 = vst [vmem:[#allocation107_spill] sm:$0xff] %v7452_v13  ;;  %v7454_v60 = vpop.permute.xlu0 %1070 }
 0x15d   : > { %10064 = vst [vmem:[#allocation65_spill] sm:$0xff] %v7454_v60  ;;  %1248 = vrot.lane.b32.xlu1 %v10065_v39, %s6257_s20  ;;  %v10073_v60 = vld [vmem:[#allocation22_spill] sm:$0xff]  ;;  %v10074_v39 = vld [vmem:[#allocation25_spill] sm:$0xff] }
 0x15e   : > { %1250 = vrot.lane.b32.xlu0 %v10066_v6, %s6257_s20 }
 0x15f   : > { %v7460_v40 = vpop.permute.xlu1 %1072 }
 0x160   : > { %10067 = vst [vmem:[#allocation124_spill] sm:$0xff] %v7460_v40  ;;  %v7462_v54 = vpop.permute.xlu0 %1074 }
 0x161   : > { %10068 = vst [vmem:[#allocation125_spill] sm:$0xff] %v7462_v54  ;;  %1252 = vrot.lane.b32.xlu1 %v10069_v0, %s6257_s20  ;;  %v10075_v54 = vld [vmem:[#allocation26_spill] sm:$0xff]  ;;  %v10076_v0 = vld [vmem:[#allocation27_spill] sm:$0xff] }
 0x162   : > { %1254 = vrot.lane.b32.xlu0 %v10070_v1, %s6257_s20 }
 0x163   : > { %v7468_v32 = vpop.permute.xlu1 %1076 }
 0x164   : > { %10071 = vst [vmem:[#allocation126_spill] sm:$0xff] %v7468_v32  ;;  %v7470_v13 = vpop.permute.xlu0 %1078 }
 0x165   : > { %10072 = vst [vmem:[#allocation127_spill] sm:$0xff] %v7470_v13  ;;  %1256 = vrot.lane.b32.xlu1 %v10073_v60, %s6257_s20  ;;  %v1790_v13 = vld [vmem:[%s9653_s3] sm:$0xff] }
 0x166   : > { %1258 = vrot.lane.b32.xlu0 %v10074_v39, %s6257_s20  ;;  %v1791_v39 = vld [vmem:[%s9653_s3 + $0x8] sm:$0xff] }
 0x167   : > { %v7476_v6 = vpop.permute.xlu1 %1080 }
 0x168   : > { %v7478_v40 = vpop.permute.xlu0 %1082 }
 0x169   : > { %1260 = vrot.lane.b32.xlu1 %v10075_v54, %s6257_s20  ;;  %v5498_v54 = vpack.c.bf16 %v1791_v39, %v1790_v13  ;;  %v5502_v39 = vpack.c.bf16 %v1793_v15, %v1792_v16  ;;  %v7549_v16 = vld [vmem:[%s9652_s2] sm:$0xff]  ;;  %v7554_v13 = vld [vmem:[%s9652_s2 + $0x8] sm:$0xff] }
 0x16a   : > { %1262 = vrot.lane.b32.xlu0 %v10076_v0, %s6257_s20  ;;  %5420 = vmatprep.mubr.msk.f32.mxu1 %vm1559_vm4, %v7549_v16 }
 0x16b   : > { %v7484_v1 = vpop.permute.xlu1 %1084  ;;  %5499 = vmatprep.subr.bf16.mxu0 %v5498_v54 }
 0x16c   : > { %v7486_v32 = vpop.permute.xlu0 %1086  ;;  %5501 = vmatpush3.bf16.msra.mxu0 %v5498_v54 }
 0x16d   : > { %1264 = vrot.lane.b32.xlu1 %v6506_v51, %s6257_s20  ;;  %5503 = vmatprep.subr.bf16.mxu0 %v5502_v39 }
 0x16e   : > { %1266 = vrot.lane.b32.xlu0 %v6535_v10, %s6257_s20 }
 0x16f   : > { %v7498_v0 = vpop.permute.xlu1 %1088 }
 0x170   : > { %v7500_v60 = vpop.permute.xlu0 %1090  ;;  %5505 = vmatpush3.bf16.msra.mxu0 %v5502_v39  ;;  %v10078_v39 = vld [vmem:[#allocation12_spill] sm:$0xff] }
 0x171   : > { %1268 = vrot.lane.b32.xlu1 %v6532_v9, %s6257_s20  ;;  %v1794_v9 = vld [vmem:[%s9653_s3 + $0x20] sm:$0xf] }
 0x172   : > { %1270 = vrot.lane.b32.xlu0 %v6561_v50, %s6257_s20  ;;  %5368 = vmatprep.subr.msk.mxu0 %vm1892_vm6, %v1794_v9 }
 0x173   : > { %v7512_v51 = vpop.permute.xlu1 %1092 }
 0x174   : > { %v7514_v10 = vpop.permute.xlu0 %1094  ;;  %5369 = vmatpush3.msk.msra.mxu0 %vm1892_vm6, %v1794_v9 }
 0x175   : > { %1272 = vrot.lane.b32.xlu1 %v6558_v49, %s6257_s20 }
 0x176   : > { %1274 = vrot.lane.b32.xlu0 %v6580_v18, %s6257_s20 }
 0x177   : > { %v7523_v50 = vpop.permute.xlu1 %1096 }
 0x178   : > { %v7525_v15 = vpop.permute.xlu0 %1098 }
 0x179   : > { %1276 = vrot.lane.b32.xlu1 %v6584_v31, %s6257_s20  ;;  %v10077_v31 = vld [vmem:[#allocation11_spill] sm:$0xff] }
 0x17a   : > { %1278 = vrot.lane.b32.xlu0 %v6602_v63, %s6257_s20  ;;  %v2233_v63 = vld [vmem:[%s7539_s15] sm:$0xff] }
 0x17b   : > { %v7531_v49 = vpop.permute.xlu1 %1100  ;;  %5418 = vmatprep.subr.mxu1 %v2233_v63 }
 0x17c   : > { %v7533_v18 = vpop.permute.xlu0 %1102  ;;  %5419 = vmatpush3.msra.mxu1 %v2233_v63  ;;  %v2234_v63 = vld [vmem:[%s7539_s15 + $0x8] sm:$0xff] }
 0x17d   : > { %1280 = vrot.lane.b32.xlu1 %v6608_v7, %s6257_s20  ;;  %5421 = vmatmul.mubr.msk.f32.vlgmr.msra.gmra.mrb[0].mxu1 %vm1559_vm4, %v7554_v13 }
 0x17e   : > { %1334 = vrot.lane.b32.xlu0 %v10077_v31, %s6258_s17  ;;  %5425 = vmatprep.mubr.msk.f32.mxu1 %vm1559_vm4, %v7549_v16 }
 0x17f   : > { %v7556_v54 = vpop.permute.xlu1 %1104  ;;  %5423 = vmatprep.subr.mxu1 %v2234_v63 }
 0x180   : > { %v7558_v7 = vpop.permute.xlu0 %1106  ;;  %5424 = vmatpush3.msra.mxu1 %v2234_v63  ;;  %v10083_v63 = vld [vmem:[#allocation19_spill] sm:$0xff] }
 0x181   : > { %1336 = vrot.lane.b32.xlu1 %v10078_v39, %s6258_s17  ;;  %5426 = vmatmul.mubr.msk.f32.vlgmr.msra.gmra.mrb[2].mxu1 %vm1559_vm4, %v7554_v13 }
 0x182   : > { %1430 = vrot.lane.b32.xlu0 %v6733_v2, %s6259_s24  ;;  %v10082_v2 = vld [vmem:[#allocation16_spill] sm:$0xff]  ;;  %5430 = vmatprep.mubr.msk.f32.mxu1 %vm1559_vm4, %v7549_v16 }
 0x183   : > { %v7570_v9 = vpop.permute.xlu1 %1108 }
 0x184   : > { %v7572_v31 = vpop.permute.xlu0 %1142 }
 0x185   : > { %1432 = vrot.lane.b32.xlu1 %v6744_v27, %s6259_s24 }
 0x186   : > { %1338 = vrot.lane.b32.xlu0 %v10079_v37, %s6258_s17 }
 0x187   : > { %v7579_v39 = vpop.permute.xlu1 %1144 }
 0x188   : > { %10080 = vst [vmem:[#allocation11_spill] sm:$0xff] %v7579_v39  ;;  %v7581_v56 = vpop.permute.xlu0 %1146 }
 0x189   : > { %10081 = vst [vmem:[#allocation12_spill] sm:$0xff] %v7581_v56  ;;  %1340 = vrot.lane.b32.xlu1 %v10082_v2, %s6258_s17  ;;  %v2235_v56 = vld [vmem:[%s7539_s15 + $0x10] sm:$0xff] }
 0x18a   : > { %1434 = vrot.lane.b32.xlu0 %v10013_v19, %s6259_s24  ;;  %5428 = vmatprep.subr.mxu1 %v2235_v56  ;;  %v10086_v19 = vld [vmem:[#allocation20_spill] sm:$0xff] }
 0x18b   : > { %v7591_v27 = vpop.permute.xlu1 %1148  ;;  %5429 = vmatpush3.msra.mxu1 %v2235_v56  ;;  %v10087_v56 = vld [vmem:[#allocation23_spill] sm:$0xff] }
 0x18c   : > { %v7593_v37 = vpop.permute.xlu0 %1150  ;;  %5431 = vmatmul.mubr.msk.f32.vlgmr.msra.gmra.mrb[4].mxu1 %vm1559_vm4, %v7554_v13 }
 0x18d   : > { %1436 = vrot.lane.b32.xlu1 %v6756_v26, %s6259_s24  ;;  %5435 = vmatprep.mubr.msk.f32.mxu1 %vm1559_vm4, %v7549_v16 }
 0x18e   : > { %1342 = vrot.lane.b32.xlu0 %v10083_v63, %s6258_s17 }
 0x18f   : > { %v7600_v2 = vpop.permute.xlu1 %1152 }
 0x190   : > { %10084 = vst [vmem:[#allocation13_spill] sm:$0xff] %v7600_v2  ;;  %v7602_v39 = vpop.permute.xlu0 %1154 }
 0x191   : > { %10085 = vst [vmem:[#allocation16_spill] sm:$0xff] %v7602_v39  ;;  %1344 = vrot.lane.b32.xlu1 %v10086_v19, %s6258_s17  ;;  %v2236_v39 = vld [vmem:[%s7539_s15 + $0x18] sm:$0xff] }
 0x192   : > { %1438 = vrot.lane.b32.xlu0 %v10016_v14, %s6259_s24  ;;  %5433 = vmatprep.subr.mxu1 %v2236_v39  ;;  %v10090_v14 = vld [vmem:[#allocation24_spill] sm:$0xff] }
 0x193   : > { %v7612_v26 = vpop.permute.xlu1 %1156  ;;  %5434 = vmatpush3.msra.mxu1 %v2236_v39  ;;  %v10091_v39 = vld [vmem:[#allocation28_spill] sm:$0xff] }
 0x194   : > { %v7614_v63 = vpop.permute.xlu0 %1158  ;;  %5436 = vmatmul.mubr.msk.f32.vlgmr.msra.gmra.mrb[6].mxu1 %vm1559_vm4, %v7554_v13 }
 0x195   : > { %1440 = vrot.lane.b32.xlu1 %v6770_v12, %s6259_s24  ;;  %5440 = vmatprep.mubr.msk.f32.mxu1 %vm1559_vm4, %v7549_v16 }
 0x196   : > { %1346 = vrot.lane.b32.xlu0 %v10087_v56, %s6258_s17 }
 0x197   : > { %v7621_v19 = vpop.permute.xlu1 %1160 }
 0x198   : > { %10088 = vst [vmem:[#allocation19_spill] sm:$0xff] %v7621_v19  ;;  %v7623_v2 = vpop.permute.xlu0 %1162 }
 0x199   : > { %10089 = vst [vmem:[#allocation20_spill] sm:$0xff] %v7623_v2  ;;  %1348 = vrot.lane.b32.xlu1 %v10090_v14, %s6258_s17  ;;  %v2237_v2 = vld [vmem:[%s7539_s15 + $0x20] sm:$0xff] }
 0x19a   : > { %1442 = vrot.lane.b32.xlu0 %v10019_v52, %s6259_s24  ;;  %5438 = vmatprep.subr.mxu1 %v2237_v2  ;;  %v10093_v52 = vld [vmem:[#allocation29_spill] sm:$0xff] }
 0x19b   : > { %v7633_v12 = vpop.permute.xlu1 %1164  ;;  %5439 = vmatpush3.msra.mxu1 %v2237_v2  ;;  %v10096_v2 = vld [vmem:[#allocation30_spill] sm:$0xff] }
 0x19c   : > { %v7635_v56 = vpop.permute.xlu0 %1166  ;;  %5441 = vmatmul.mubr.msk.f32.vlgmr.msra.gmra.mrb[8].mxu1 %vm1559_vm4, %v7554_v13 }
 0x19d   : > { %1444 = vrot.lane.b32.xlu1 %v6783_v4, %s6259_s24  ;;  %5445 = vmatprep.mubr.msk.f32.mxu1 %vm1559_vm4, %v7549_v16 }
 0x19e   : > { %1350 = vrot.lane.b32.xlu0 %v10091_v39, %s6258_s17 }
 0x19f   : > { %v7642_v14 = vpop.permute.xlu1 %1168 }
 0x1a0   : > { %v7644_v19 = vpop.permute.xlu0 %1170 }
 0x1a1   : > { %10092 = vst [vmem:[#allocation23_spill] sm:$0xff] %v7644_v19  ;;  %1352 = vrot.lane.b32.xlu1 %v10093_v52, %s6258_s17  ;;  %v2238_v19 = vld [vmem:[%s7539_s15 + $0x28] sm:$0xff]  ;;  %v1644_v52 = vsel %vm1625_vm7, %v7263_v28, %v7478_v40  ;;  %v1645_v28 = vsel %vm1625_vm7, %v7280_v58, %v7484_v1  ;;  %v1647_v1 = vsel %vm1625_vm7, %v7300_v8, %v7498_v0 }
 0x1a2   : > { %1446 = vrot.lane.b32.xlu0 %v10022_v23, %s6259_s24  ;;  %5443 = vmatprep.subr.mxu1 %v2238_v19  ;;  %v1643_v23 = vsel %vm1625_vm7, %v7260_v55, %v7476_v6  ;;  %v10097_v55 = vld [vmem:[#allocation31_spill] sm:$0xff]  ;;  %v1646_v6 = vsel %vm1625_vm7, %v7283_v11, %v7486_v32  ;;  %v1648_v58 = vsel %vm1625_vm7, %v7303_v57, %v7500_v60 }
 0x1a3   : > { %v7654_v4 = vpop.permute.xlu1 %1172  ;;  %5444 = vmatpush3.msra.mxu1 %v2238_v19  ;;  %v1649_v8 = vsel %vm1625_vm7, %v7320_v44, %v7512_v51  ;;  %v1650_v57 = vsel %vm1625_vm7, %v7323_v35, %v7514_v10  ;;  %v1651_v44 = vsel %vm1625_vm7, %v7340_v25, %v7523_v50  ;;  %v1652_v35 = vsel %vm1625_vm7, %v7343_v42, %v7525_v15 }
 0x1a4   : > { %10094 = vst [vmem:[#allocation24_spill] sm:$0xff] %v7654_v4  ;;  %v7656_v39 = vpop.permute.xlu0 %1174  ;;  %5446 = vmatmul.mubr.msk.f32.vlgmr.msra.gmra.mrb[10].mxu1 %vm1559_vm4, %v7554_v13  ;;  %v1653_v25 = vsel %vm1625_vm7, %v7360_v46, %v7531_v49  ;;  %v1654_v42 = vsel %vm1625_vm7, %v7363_v29, %v7533_v18  ;;  %v1655_v46 = vsel %vm1625_vm7, %v7380_v45, %v7556_v54 }
 0x1a5   : > { %10095 = vst [vmem:[#allocation28_spill] sm:$0xff] %v7656_v39  ;;  %1448 = vrot.lane.b32.xlu1 %v6796_v20, %s6259_s24  ;;  %5450 = vmatprep.mubr.msk.f32.mxu1 %vm1559_vm4, %v7549_v16  ;;  %v1656_v29 = vsel %vm1625_vm7, %v7383_v36, %v7558_v7  ;;  %v1657_v45 = vsel %vm1625_vm7, %v7397_v3, %v7570_v9  ;;  %v10105_v3 = vld [vmem:[#allocation39_spill] sm:$0xff] }
 0x1a6   : > { %1354 = vrot.lane.b32.xlu0 %v10096_v2, %s6258_s17 }
 0x1a7   : > { %v1177_v4 = vpop.permute.xlu1 %1176 }
 0x1a8   : > { %v1179_v39 = vpop.permute.xlu0 %1178  ;;  %v7670_v20 = vsel %vm1658_vm8, %v1643_v23, %v1177_v4  ;;  %v2239_v23 = vld [vmem:[%s7539_s15 + $0x30] sm:$0xff] }
 0x1a9   : > { %v7673_v2 = vsel %vm1658_vm8, %v1644_v52, %v1179_v39  ;;  %1356 = vrot.lane.b32.xlu1 %v10097_v55, %s6258_s17  ;;  %5448 = vmatprep.subr.mxu1 %v2239_v23  ;;  %v10099_v55 = vld [vmem:[#allocation33_spill] sm:$0xff] }
 0x1aa   : > { %1450 = vrot.lane.b32.xlu0 %v10023_v38, %s6259_s24  ;;  %v10098_v38 = vld [vmem:[#allocation32_spill] sm:$0xff]  ;;  %5449 = vmatpush3.msra.mxu1 %v2239_v23 }
 0x1ab   : > { %v1181_v40 = vpop.permute.xlu1 %1180  ;;  %5451 = vmatmul.mubr.msk.f32.vlgmr.msra.gmra.mrb[12].mxu1 %vm1559_vm4, %v7554_v13 }
 0x1ac   : > { %v1183_v19 = vpop.permute.xlu0 %1182  ;;  %v7690_v4 = vsel %vm1658_vm8, %v1645_v28, %v1181_v40  ;;  %5455 = vmatprep.mubr.msk.f32.mxu1 %vm1559_vm4, %v7549_v16  ;;  %v2240_v40 = vld [vmem:[%s7539_s15 + $0x38] sm:$0xff] }
 0x1ad   : > { %v7693_v39 = vsel %vm1658_vm8, %v1646_v6, %v1183_v19  ;;  %1452 = vrot.lane.b32.xlu1 %v6809_v41, %s6259_s24  ;;  %5453 = vmatprep.subr.mxu1 %v2240_v40 }
 0x1ae   : > { %1358 = vrot.lane.b32.xlu0 %v10098_v38, %s6258_s17  ;;  %5454 = vmatpush3.msra.mxu1 %v2240_v40  ;;  %v10101_v38 = vld [vmem:[#allocation35_spill] sm:$0xff] }
 0x1af   : > { %v1185_v11 = vpop.permute.xlu1 %1184  ;;  %5456 = vmatmul.mubr.msk.f32.vlgmr.msra.gmra.mrb[14].mxu1 %vm1559_vm4, %v7554_v13 }
 0x1b0   : > { %v1187_v32 = vpop.permute.xlu0 %1186  ;;  %v7707_v52 = vsel %vm1658_vm8, %v1647_v1, %v1185_v11  ;;  %5460 = vmatprep.mubr.msk.f32.mxu1 %vm1559_vm4, %v7549_v16 }
 0x1b1   : > { %v7710_v41 = vsel %vm1658_vm8, %v1648_v58, %v1187_v32  ;;  %1360 = vrot.lane.b32.xlu1 %v10099_v55, %s6258_s17  ;;  %v2241_v58 = vld [vmem:[%s7539_s15 + $0x40] sm:$0xff]  ;;  %v10103_v32 = vld [vmem:[#allocation37_spill] sm:$0xff] }
 0x1b2   : > { %1454 = vrot.lane.b32.xlu0 %v10024_v61, %s6259_s24  ;;  %v10100_v61 = vld [vmem:[#allocation34_spill] sm:$0xff]  ;;  %5458 = vmatprep.subr.mxu1 %v2241_v58 }
 0x1b3   : > { %v1189_v0 = vpop.permute.xlu1 %1188  ;;  %5459 = vmatpush3.msra.mxu1 %v2241_v58  ;;  %v10104_v55 = vld [vmem:[#allocation38_spill] sm:$0xff] }
 0x1b4   : > { %v1191_v60 = vpop.permute.xlu0 %1190  ;;  %v7727_v28 = vsel %vm1658_vm8, %v1649_v8, %v1189_v0  ;;  %5461 = vmatmul.mubr.msk.f32.vlgmr.msra.gmra.mrb[16].mxu1 %vm1559_vm4, %v7554_v13  ;;  %v2243_v0 = vld [vmem:[%s7539_s15 + $0x50] sm:$0xff] }
 0x1b5   : > { %v7730_v6 = vsel %vm1658_vm8, %v1650_v57, %v1191_v60  ;;  %1456 = vrot.lane.b32.xlu1 %v6821_v43, %s6259_s24  ;;  %5465 = vmatprep.mubr.msk.f32.mxu1 %vm1559_vm4, %v7549_v16  ;;  %v10106_v60 = vld [vmem:[#allocation40_spill] sm:$0xff] }
 0x1b6   : > { %1362 = vrot.lane.b32.xlu0 %v10100_v61, %s6258_s17 }
 0x1b7   : > { %v1193_v51 = vpop.permute.xlu1 %1192 }
 0x1b8   : > { %v1195_v10 = vpop.permute.xlu0 %1194  ;;  %v7744_v19 = vsel %vm1658_vm8, %v1651_v44, %v1193_v51 }
 0x1b9   : > { %v7747_v43 = vsel %vm1658_vm8, %v1652_v35, %v1195_v10  ;;  %1364 = vrot.lane.b32.xlu1 %v10101_v38, %s6258_s17  ;;  %v2244_v10 = vld [vmem:[%s7539_s15 + $0x58] sm:$0xff] }
 0x1ba   : > { %1458 = vrot.lane.b32.xlu0 %v10025_v59, %s6259_s24  ;;  %v10102_v59 = vld [vmem:[#allocation36_spill] sm:$0xff] }
 0x1bb   : > { %v1197_v50 = vpop.permute.xlu1 %1196 }
 0x1bc   : > { %v1199_v15 = vpop.permute.xlu0 %1198  ;;  %v7764_v23 = vsel %vm1658_vm8, %v1653_v25, %v1197_v50 }
 0x1bd   : > { %v7767_v1 = vsel %vm1658_vm8, %v1654_v42, %v1199_v15  ;;  %1460 = vrot.lane.b32.xlu1 %v6835_v53, %s6259_s24  ;;  %v2245_v15 = vld [vmem:[%s7539_s15 + $0x60] sm:$0xff] }
 0x1be   : > { %1366 = vrot.lane.b32.xlu0 %v10102_v59, %s6258_s17  ;;  %v10111_v59 = vld [vmem:[#allocation47_spill] sm:$0xff] }
 0x1bf   : > { %v1201_v49 = vpop.permute.xlu1 %1200 }
 0x1c0   : > { %v1203_v18 = vpop.permute.xlu0 %1202  ;;  %v7781_v11 = vsel %vm1658_vm8, %v1655_v46, %v1201_v49  ;;  %v10114_v49 = vld [vmem:[#allocation66_spill] sm:$0xff] }
 0x1c1   : > { %v7784_v53 = vsel %vm1658_vm8, %v1656_v29, %v1203_v18  ;;  %1368 = vrot.lane.b32.xlu1 %v10103_v32, %s6258_s17  ;;  %v10113_v29 = vld [vmem:[#allocation48_spill] sm:$0xff] }
 0x1c2   : > { %1462 = vrot.lane.b32.xlu0 %v10026_v22, %s6259_s24  ;;  %v2242_v22 = vld [vmem:[%s7539_s15 + $0x48] sm:$0xff]  ;;  %v10115_v18 = vld [vmem:[#allocation88_spill] sm:$0xff] }
 0x1c3   : > { %v1205_v36 = vpop.permute.xlu1 %1204  ;;  %5463 = vmatprep.subr.mxu1 %v2242_v22  ;;  %v5584_v32 = vunpack.i.l.bf16 %v10115_v18 }
 0x1c4   : > { %v7797_v54 = vpop.permute.xlu0 %1238  ;;  %v7800_v7 = vsel %vm1658_vm8, %v1657_v45, %v1205_v36  ;;  %5464 = vmatpush3.msra.mxu1 %v2242_v22  ;;  %v10116_v22 = vld [vmem:[#allocation3_spill] sm:$0xff] }
 0x1c5   : > { %1464 = vrot.lane.b32.xlu1 %v6848_v62, %s6259_s24  ;;  %5466 = vmatmul.mubr.msk.f32.vlgmr.msra.gmra.mrb[18].mxu1 %vm1559_vm4, %v7554_v13 }
 0x1c6   : > { %1370 = vrot.lane.b32.xlu0 %v10104_v55, %s6258_s17  ;;  %5470 = vmatprep.mubr.msk.f32.mxu1 %vm1559_vm4, %v7549_v16 }
 0x1c7   : > { %v7807_v8 = vpop.permute.xlu1 %1240  ;;  %5468 = vmatprep.subr.mxu1 %v2243_v0 }
 0x1c8   : > { %v7809_v57 = vpop.permute.xlu0 %1242  ;;  %5469 = vmatpush3.msra.mxu1 %v2243_v0  ;;  %v10117_v0 = vld [vmem:[#allocation68_spill] sm:$0xff] }
 0x1c9   : > { %1372 = vrot.lane.b32.xlu1 %v10105_v3, %s6258_s17  ;;  %5471 = vmatmul.mubr.msk.f32.vlgmr.msra.gmra.mrb[20].mxu1 %vm1559_vm4, %v7554_v13 }
 0x1ca   : > { %1466 = vrot.lane.b32.xlu0 %v10027_v24, %s6259_s24  ;;  %v10107_v24 = vld [vmem:[#allocation41_spill] sm:$0xff]  ;;  %5475 = vmatprep.mubr.msk.f32.mxu1 %vm1559_vm4, %v7549_v16 }
 0x1cb   : > { %v7819_v62 = vpop.permute.xlu1 %1244  ;;  %5473 = vmatprep.subr.mxu1 %v2244_v10 }
 0x1cc   : > { %v7821_v9 = vpop.permute.xlu0 %1246  ;;  %5474 = vmatpush3.msra.mxu1 %v2244_v10 }
 0x1cd   : > { %1468 = vrot.lane.b32.xlu1 %v10028_v47, %s6259_s24  ;;  %5476 = vmatmul.mubr.msk.f32.vlgmr.msra.gmra.mrb[22].mxu1 %vm1559_vm4, %v7554_v13 }
 0x1ce   : > { %1374 = vrot.lane.b32.xlu0 %v10106_v60, %s6258_s17  ;;  %5480 = vmatprep.mubr.msk.f32.mxu1 %vm1559_vm4, %v7549_v16  ;;  %v10118_v60 = vld [vmem:[#allocation46_spill] sm:$0xff] }
 0x1cf   : > { %v7828_v61 = vpop.permute.xlu1 %1248  ;;  %5478 = vmatprep.subr.mxu1 %v2245_v15 }
 0x1d0   : > { %v7830_v40 = vpop.permute.xlu0 %1250  ;;  %5479 = vmatpush3.msra.mxu1 %v2245_v15 }
 0x1d1   : > { %1376 = vrot.lane.b32.xlu1 %v10107_v24, %s6258_s17  ;;  %5481 = vmatmul.mubr.msk.f32.vlgmr.msra.gmra.mrb[24].mxu1 %vm1559_vm4, %v7554_v13  ;;  %v5585_v24 = vunpack.i.h.bf16 %v10115_v18 }
 0x1d2   : > { %1470 = vrot.lane.b32.xlu0 %v10029_v48, %s6259_s24  ;;  %v10108_v48 = vld [vmem:[#allocation43_spill] sm:$0xff]  ;;  %5485 = vmatprep.mubr.msk.f32.mxu1 %vm1559_vm4, %v7549_v16 }
 0x1d3   : > { %v7840_v47 = vpop.permute.xlu1 %1252 }
 0x1d4   : > { %v7842_v44 = vpop.permute.xlu0 %1254 }
 0x1d5   : > { %1472 = vrot.lane.b32.xlu1 %v10034_v30, %s6259_s24 }
 0x1d6   : > { %1282 = vrot.lane.b32.xlu0 %v6629_v34, %s6257_s20  ;;  %v10109_v34 = vld [vmem:[#allocation44_spill] sm:$0xff] }
 0x1d7   : > { %v7848_v35 = vpop.permute.xlu1 %1256 }
 0x1d8   : > { %v7850_v51 = vpop.permute.xlu0 %1258 }
 0x1d9   : > { %1284 = vrot.lane.b32.xlu1 %v6632_v21, %s6257_s20 }
 0x1da   : > { %1378 = vrot.lane.b32.xlu0 %v10108_v48, %s6258_s17  ;;  %v10119_v48 = vld [vmem:[#allocation108_spill] sm:$0xff] }
 0x1db   : > { %v7857_v38 = vpop.permute.xlu1 %1260 }
 0x1dc   : > { %v7859_v25 = vpop.permute.xlu0 %1262 }
 0x1dd   : > { %1380 = vrot.lane.b32.xlu1 %v10109_v34, %s6258_s17 }
 0x1de   : > { %1474 = vrot.lane.b32.xlu0 %v10035_v33, %s6259_s24  ;;  %v10110_v33 = vld [vmem:[#allocation42_spill] sm:$0xff] }
 0x1df   : > { %v7869_v21 = vpop.permute.xlu1 %1264 }
 0x1e0   : > { %v7871_v30 = vpop.permute.xlu0 %1266 }
 0x1e1   : > { %1476 = vrot.lane.b32.xlu1 %v10040_v5, %s6259_s24 }
 0x1e2   : > { %1286 = vrot.lane.b32.xlu0 %v6656_v17, %s6257_s20  ;;  %v10112_v17 = vld [vmem:[#allocation67_spill] sm:$0xff] }
 0x1e3   : > { %v7877_v42 = vpop.permute.xlu1 %1268  ;;  %v5579_v5 = vunpack.i.l.bf16 %v10112_v17  ;;  %v5580_v55 = vunpack.i.h.bf16 %v10112_v17 }
 0x1e4   : > { %v7879_v50 = vpop.permute.xlu0 %1270 }
 0x1e5   : > { %1288 = vrot.lane.b32.xlu1 %v10110_v33, %s6257_s20  ;;  %v1527_v3 = vsel %vm1526_vm3, %v10116_v22, %v5579_v5  ;;  %v2246_v5 = vld [vmem:[%s7539_s15 + $0x68] sm:$0xff] }
 0x1e6   : > { %1382 = vrot.lane.b32.xlu0 %v10111_v59, %s6258_s17  ;;  %v1560_v10 = vsel %vm1559_vm4, %v1527_v3, %v5584_v32  ;;  %v10120_v59 = vld [vmem:[#allocation55_spill] sm:$0xff]  ;;  %v10122_v32 = vld [vmem:[#allocation45_spill] sm:$0xff]  ;;  %5483 = vmatprep.subr.mxu1 %v2246_v5 }
 0x1e7   : > { %v7886_v58 = vpop.permute.xlu1 %1272  ;;  %v1593_v34 = vsel %vm1592_vm5, %v1560_v10, %v10119_v48  ;;  %v10123_v3 = vld [vmem:[#allocation49_spill] sm:$0xff]  ;;  %5484 = vmatpush3.msra.mxu1 %v2246_v5 }
 0x1e8   : > { %v7888_v46 = vpop.permute.xlu0 %1274  ;;  %v1626_v17 = vsel %vm1625_vm7, %v1593_v34, %v10120_v59  ;;  %v10124_v10 = vld [vmem:[#allocation109_spill] sm:$0xff]  ;;  %v10125_v59 = vld [vmem:[#allocation56_spill] sm:$0xff]  ;;  %5486 = vmatmul.mubr.msk.f32.vlgmr.msra.gmra.mrb[26].mxu1 %vm1559_vm4, %v7554_v13 }
 0x1e9   : > { %1384 = vrot.lane.b32.xlu1 %v10113_v29, %s6258_s17  ;;  %v10121_v29 = vld [vmem:[#allocation2_spill] sm:$0xff]  ;;  %v1659_v18 = vsel %vm1658_vm8, %v1626_v17, %v7572_v31  ;;  %v10130_v5 = vld [vmem:[#allocation69_spill] sm:$0xff]  ;;  %5490 = vmatprep.mubr.msk.f32.mxu1 %vm1559_vm4, %v7549_v16 }
 0x1ea   : > { %1478 = vrot.lane.b32.xlu0 %v10114_v49, %s6259_s24  ;;  %v1528_v49 = vsel %vm1526_vm3, %v10121_v29, %v5580_v55 }
 0x1eb   : > { %v7900_v45 = vpop.permute.xlu1 %1276 }
 0x1ec   : > { %v7902_v36 = vpop.permute.xlu0 %1278 }
 0x1ed   : > { %1480 = vrot.lane.b32.xlu1 %v10117_v0, %s6259_s24  ;;  %v1561_v0 = vsel %vm1559_vm4, %v1528_v49, %v5585_v24  ;;  %v10126_v24 = vld [vmem:[#allocation71_spill] sm:$0xff] }
 0x1ee   : > { %1290 = vrot.lane.b32.xlu0 %v10118_v60, %s6257_s20  ;;  %v1692_v60 = vsel %vm1691_vm9, %v1659_v18, %v7797_v54  ;;  %v1594_v48 = vsel %vm1592_vm5, %v1561_v0, %v10124_v10  ;;  %v10127_v54 = vld [vmem:[#allocation6_spill] sm:$0xff]  ;;  %v10128_v18 = vld [vmem:[#allocation11_spill] sm:$0xff]  ;;  %v10131_v0 = vld [vmem:[#allocation89_spill] sm:$0xff] }
 0x1ef   : > { %v7915_v15 = vpop.permute.xlu1 %1280  ;;  %v1627_v17 = vsel %vm1625_vm7, %v1594_v48, %v10125_v59  ;;  %v1529_v49 = vsel %vm1526_vm3, %v10127_v54, %v10126_v24  ;;  %v10132_v48 = vld [vmem:[#allocation110_spill] sm:$0xff]  ;;  %v10133_v24 = vld [vmem:[#allocation57_spill] sm:$0xff] }
 0x1f0   : > { %v1335_v33 = vpop.permute.xlu0 %1334 }
 0x1f1   : > { %1292 = vrot.lane.b32.xlu1 %v10122_v32, %s6257_s20  ;;  %v1725_v55 = vsel %vm1724_vm10, %v1692_v60, %v1335_v33  ;;  %v10129_v33 = vld [vmem:[#allocation50_spill] sm:$0xff]  ;;  %v1562_v60 = vsel %vm1559_vm4, %v1529_v49, %v10131_v0 }
 0x1f2   : > { %1386 = vrot.lane.b32.xlu0 %v10123_v3, %s6258_s17  ;;  %v1660_v3 = vsel %vm1658_vm8, %v1627_v17, %v10128_v18  ;;  %v10134_v18 = vld [vmem:[#allocation70_spill] sm:$0xff] }
 0x1f3   : > { %v1337_v34 = vpop.permute.xlu1 %1336  ;;  %v1693_v10 = vsel %vm1691_vm9, %v1660_v3, %v7807_v8  ;;  %v10138_v0 = vld [vmem:[#allocation90_spill] sm:$0xff] }
 0x1f4   : > { %v1431_v31 = vpop.permute.xlu0 %1430 }
 0x1f5   : > { %v1758_v32 = vsel %vm1757_vm11, %v1725_v55, %v1431_v31  ;;  %1388 = vrot.lane.b32.xlu1 %v10129_v33, %s6258_s17  ;;  %v1595_v55 = vsel %vm1592_vm5, %v1562_v60, %v10132_v48  ;;  %v1726_v31 = vsel %vm1724_vm10, %v1693_v10, %v1337_v34  ;;  %v10135_v33 = vld [vmem:[#allocation5_spill] sm:$0xff]  ;;  %v2247_v34 = vld [vmem:[%s7539_s15 + $0x70] sm:$0xff]  ;;  %v10139_v60 = vld [vmem:[#allocation91_spill] sm:$0xff] }
 0x1f6   : > { %1482 = vrot.lane.b32.xlu0 %v10130_v5, %s6259_s24  ;;  %5370 = vmatprep.mubr.msk.f32.mxu0 %vm1795_vm12, %v1758_v32  ;;  %v1628_v54 = vsel %vm1625_vm7, %v1595_v55, %v10133_v24  ;;  %v1530_v8 = vsel %vm1526_vm3, %v10135_v33, %v10134_v18  ;;  %v10136_v32 = vld [vmem:[#allocation12_spill] sm:$0xff]  ;;  %v10141_v18 = vld [vmem:[#allocation59_spill] sm:$0xff] }
 0x1f7   : > { %v1433_v59 = vpop.permute.xlu1 %1432  ;;  %v1661_v3 = vsel %vm1658_vm8, %v1628_v54, %v10136_v32  ;;  %v10137_v5 = vld [vmem:[#allocation72_spill] sm:$0xff]  ;;  %v1563_v10 = vsel %vm1559_vm4, %v1530_v8, %v10139_v60  ;;  %5488 = vmatprep.subr.mxu1 %v2247_v34  ;;  %v10143_v8 = vld [vmem:[#allocation7_spill] sm:$0xff] }
 0x1f8   : > { %v1339_v17 = vpop.permute.xlu0 %1338  ;;  %v1759_v49 = vsel %vm1757_vm11, %v1726_v31, %v1433_v59  ;;  %v1694_v48 = vsel %vm1691_vm9, %v1661_v3, %v7809_v57  ;;  %v10140_v55 = vld [vmem:[#allocation112_spill] sm:$0xff]  ;;  %5489 = vmatpush3.msra.mxu1 %v2247_v34  ;;  %v10142_v57 = vld [vmem:[#allocation73_spill] sm:$0xff] }
 0x1f9   : > { %1484 = vrot.lane.b32.xlu1 %v10137_v5, %s6259_s24  ;;  %5371 = vmatmul.mubr.msk.f32.vlgmr.msra.gmra.mrb[0].mxu0 %vm1795_vm12, %v1759_v49  ;;  %v1596_v31 = vsel %vm1592_vm5, %v1563_v10, %v10140_v55  ;;  %v1727_v59 = vsel %vm1724_vm10, %v1694_v48, %v1339_v17  ;;  %v1531_v49 = vsel %vm1526_vm3, %v10143_v8, %v10142_v57  ;;  %v10144_v17 = vld [vmem:[#allocation93_spill] sm:$0xff]  ;;  %v10145_v5 = vld [vmem:[#allocation111_spill] sm:$0xff]  ;;  %v10150_v57 = vld [vmem:[#allocation8_spill] sm:$0xff] }
 0x1fa   : > { %1294 = vrot.lane.b32.xlu0 %v10138_v0, %s6257_s20  ;;  %v1629_v33 = vsel %vm1625_vm7, %v1596_v31, %v10141_v18  ;;  %5491 = vmatmul.mubr.msk.f32.vlgmr.msra.gmra.mrb[28].mxu1 %vm1559_vm4, %v7554_v13  ;;  %v10146_v0 = vld [vmem:[#allocation92_spill] sm:$0xff]  ;;  %v10147_v10 = vld [vmem:[#allocation113_spill] sm:$0xff]  ;;  %v10152_v8 = vld [vmem:[#allocation58_spill] sm:$0xff] }
 0x1fb   : > { %v1341_v24 = vpop.permute.xlu1 %1340  ;;  %v1662_v3 = vsel %vm1658_vm8, %v1629_v33, %v7591_v27  ;;  %v1564_v34 = vsel %vm1559_vm4, %v1531_v49, %v10146_v0  ;;  %5495 = vmatprep.mubr.msk.f32.mxu1 %vm1559_vm4, %v7549_v16  ;;  %v10149_v33 = vld [vmem:[#allocation74_spill] sm:$0xff]  ;;  %v2248_v49 = vld [vmem:[%s7539_s15 + $0x78] sm:$0xff] }
 0x1fc   : > { %v1435_v54 = vpop.permute.xlu0 %1434  ;;  %v1695_v60 = vsel %vm1691_vm9, %v1662_v3, %v7819_v62  ;;  %v1597_v27 = vsel %vm1592_vm5, %v1564_v34, %v10147_v10  ;;  %v1532_v62 = vsel %vm1526_vm3, %v10150_v57, %v10149_v33  ;;  %v10151_v16 = vld [vmem:[#allocation114_spill] sm:$0xff]  ;;  %5493 = vmatprep.subr.mxu1 %v2248_v49  ;;  %v10161_v57 = vld [vmem:[#allocation95_spill] sm:$0xff] }
 0x1fd   : > { %v1760_v32 = vsel %vm1757_vm11, %v1727_v59, %v1435_v54  ;;  %1296 = vrot.lane.b32.xlu1 %v10144_v17, %s6257_s20  ;;  %v1728_v48 = vsel %vm1724_vm10, %v1695_v60, %v1341_v24  ;;  %v10148_v59 = vld [vmem:[#allocation60_spill] sm:$0xff]  ;;  %v8017_v24 = vpack.i.bf16 %v10121_v29, %v10116_v22  ;;  %v10154_v3 = vld [vmem:[#allocation94_spill] sm:$0xff]  ;;  %5494 = vmatpush3.msra.mxu1 %v2248_v49 }
 0x1fe   : > { %1390 = vrot.lane.b32.xlu0 %v10145_v5, %s6258_s17  ;;  %5373 = vmatprep.mubr.msk.f32.mxu0 %vm1795_vm12, %v1760_v32  ;;  %v1630_v54 = vsel %vm1625_vm7, %v1597_v27, %v10148_v59  ;;  %v1565_v17 = vsel %vm1559_vm4, %v1532_v62, %v10154_v3  ;;  %v10156_v27 = vld [vmem:[#allocation62_spill] sm:$0xff] }
 0x1ff   : > { %v1437_v55 = vpop.permute.xlu1 %1436  ;;  %v1663_v32 = vsel %vm1658_vm8, %v1630_v54, %v7593_v37  ;;  %10153 = vst [vmem:[#allocation29_spill] sm:$0xff] %v8017_v24  ;;  %v10155_v37 = vld [vmem:[#allocation115_spill] sm:$0xff]  ;;  %5496 = vmatmul.mubr.msk.f32.vlgmr.msra.gmra.mrb[30].mxu1 %vm1559_vm4, %v7554_v13  ;;  %v10158_v59 = vld [vmem:[#allocation10_spill] sm:$0xff]  ;;  %v10162_v13 = vld [vmem:[#allocation116_spill] sm:$0xff] }
 0x200   : > { %v1343_v31 = vpop.permute.xlu0 %1342  ;;  %v1761_v18 = vsel %vm1757_vm11, %v1728_v48, %v1437_v55  ;;  %v1696_v5 = vsel %vm1691_vm9, %v1663_v32, %v7821_v9  ;;  %v1598_v0 = vsel %vm1592_vm5, %v1565_v17, %v10155_v37  ;;  %v10157_v9 = vld [vmem:[#allocation75_spill] sm:$0xff]  ;;  %v10163_v17 = vld [vmem:[#allocation86_spill] sm:$0xff] }
 0x201   : > { %1392 = vrot.lane.b32.xlu1 %v10151_v16, %s6258_s17  ;;  %5374 = vmatmul.mubr.msk.f32.gmra.mrb[2].mxu0 %vm1795_vm12, %v1761_v18  ;;  %v1729_v34 = vsel %vm1724_vm10, %v1696_v5, %v1343_v31  ;;  %v1631_v48 = vsel %vm1625_vm7, %v1598_v0, %v10156_v27  ;;  %v1533_v54 = vsel %vm1526_vm3, %v10158_v59, %v10157_v9  ;;  %v10159_v18 = vld [vmem:[#allocation13_spill] sm:$0xff]  ;;  %v10164_v0 = vld [vmem:[#allocation76_spill] sm:$0xff]  ;;  %v10169_v59 = vld [vmem:[#allocation51_spill] sm:$0xff] }
 0x202   : > { %1486 = vrot.lane.b32.xlu0 %v10152_v8, %s6259_s24  ;;  %v1664_v33 = vsel %vm1658_vm8, %v1631_v48, %v10159_v18  ;;  %v10160_v31 = vld [vmem:[#allocation61_spill] sm:$0xff]  ;;  %v1566_v62 = vsel %vm1559_vm4, %v1533_v54, %v10161_v57  ;;  %v10166_v27 = vld [vmem:[#allocation16_spill] sm:$0xff] }
 0x203   : > { %v1345_v60 = vpop.permute.xlu1 %1344  ;;  %v1697_v32 = vsel %vm1691_vm9, %v1664_v33, %v7828_v61  ;;  %v1599_v16 = vsel %vm1592_vm5, %v1566_v62, %v10162_v13  ;;  %v10167_v48 = vld [vmem:[#allocation4_spill] sm:$0xff]  ;;  %v10170_v54 = vld [vmem:[#allocation117_spill] sm:$0xff]  ;;  %v10171_v62 = vld [vmem:[#allocation106_spill] sm:$0xff] }
 0x204   : > { %v1439_v10 = vpop.permute.xlu0 %1438  ;;  %v1730_v8 = vsel %vm1724_vm10, %v1697_v32, %v1345_v60  ;;  %v1632_v5 = vsel %vm1625_vm7, %v1599_v16, %v10163_v17  ;;  %v10168_v60 = vld [vmem:[#allocation96_spill] sm:$0xff]  ;;  %v10172_v16 = vld [vmem:[#allocation77_spill] sm:$0xff] }
 0x205   : > { %v1762_v55 = vsel %vm1757_vm11, %v1729_v34, %v1439_v10  ;;  %1488 = vrot.lane.b32.xlu1 %v10160_v31, %s6259_s24  ;;  %v10165_v34 = vld [vmem:[#allocation9_spill] sm:$0xff]  ;;  %v1665_v61 = vsel %vm1658_vm8, %v1632_v5, %v10166_v27 }
 0x206   : > { %5587 = vrot.lane.b32.xlu0 %v8017_v24, %s6257_s20  ;;  %5376 = vmatprep.mubr.msk.f32.mxu0 %vm1795_vm12, %v1762_v55  ;;  %v1534_v10 = vsel %vm1526_vm3, %v10165_v34, %v10164_v0  ;;  %v1698_v9 = vsel %vm1691_vm9, %v1665_v61, %v7830_v40  ;;  %v10174_v17 = vld [vmem:[#allocation97_spill] sm:$0xff]  ;;  %v10176_v61 = vld [vmem:[#allocation63_spill] sm:$0xff] }
 0x207   : > { %v1441_v49 = vpop.permute.xlu1 %1440  ;;  %v1567_v55 = vsel %vm1559_vm4, %v1534_v10, %v10168_v60 }
 0x208   : > { %v1347_v3 = vpop.permute.xlu0 %1346  ;;  %v1763_v37 = vsel %vm1757_vm11, %v1730_v8, %v1441_v49  ;;  %v1600_v18 = vsel %vm1592_vm5, %v1567_v55, %v10170_v54  ;;  %v10173_v8 = vld [vmem:[#allocation15_spill] sm:$0xff]  ;;  %v10177_v55 = vld [vmem:[#allocation78_spill] sm:$0xff] }
 0x209   : > { %5592 = vrot.lane.b32.xlu1 %v10167_v48, %s6258_s17  ;;  %5377 = vmatmul.mubr.msk.f32.gmra.mrb[4].mxu0 %vm1795_vm12, %v1763_v37  ;;  %v1731_v33 = vsel %vm1724_vm10, %v1698_v9, %v1347_v3  ;;  %v1633_v32 = vsel %vm1625_vm7, %v1600_v18, %v10171_v62  ;;  %v1535_v49 = vsel %vm1526_vm3, %v10173_v8, %v10172_v16  ;;  %v10175_v37 = vld [vmem:[#allocation118_spill] sm:$0xff]  ;;  %v10181_v8 = vld [vmem:[#allocation64_spill] sm:$0xff] }
 0x20a   : > { %5597 = vrot.lane.b32.xlu0 %v10169_v59, %s6259_s24  ;;  %v1666_v40 = vsel %vm1658_vm8, %v1633_v32, %v7612_v26  ;;  %v1568_v5 = vsel %vm1559_vm4, %v1535_v49, %v10174_v17  ;;  %v10178_v9 = vld [vmem:[#allocation14_spill] sm:$0xff] }
 0x20b   : > { %v1349_v31 = vpop.permute.xlu1 %1348  ;;  %v1699_v3 = vsel %vm1691_vm9, %v1666_v40, %v7840_v47  ;;  %v1601_v0 = vsel %vm1592_vm5, %v1568_v5, %v10175_v37  ;;  %v1536_v54 = vsel %vm1526_vm3, %v10178_v9, %v10177_v55  ;;  %v10179_v47 = vld [vmem:[#allocation98_spill] sm:$0xff]  ;;  %v10182_v40 = vld [vmem:[#allocation79_spill] sm:$0xff] }
 0x20c   : > { %v1443_v57 = vpop.permute.xlu0 %1442  ;;  %v1732_v34 = vsel %vm1724_vm10, %v1699_v3, %v1349_v31  ;;  %v1634_v60 = vsel %vm1625_vm7, %v1601_v0, %v10176_v61  ;;  %v10183_v17 = vld [vmem:[#allocation18_spill] sm:$0xff]  ;;  %v10184_v3 = vld [vmem:[#allocation19_spill] sm:$0xff] }
 0x20d   : > { %v1764_v13 = vsel %vm1757_vm11, %v1731_v33, %v1443_v57  ;;  %v1667_v18 = vsel %vm1658_vm8, %v1634_v60, %v7614_v63  ;;  %v1569_v33 = vsel %vm1559_vm4, %v1536_v54, %v10179_v47  ;;  %v10180_v57 = vld [vmem:[#allocation119_spill] sm:$0xff]  ;;  %v1537_v5 = vsel %vm1526_vm3, %v10183_v17, %v10182_v40  ;;  %v10189_v47 = vld [vmem:[#allocation17_spill] sm:$0xff]  ;;  %5602 = vrot.lane.b32.xlu1 %v10167_v48, %s6253_s16 }
 0x20e   : > { %5379 = vmatprep.mubr.msk.f32.mxu0 %vm1795_vm12, %v1764_v13  ;;  %v1700_v31 = vsel %vm1691_vm9, %v1667_v18, %v7842_v44  ;;  %v1602_v62 = vsel %vm1592_vm5, %v1569_v33, %v10180_v57  ;;  %v10185_v44 = vld [vmem:[#allocation99_spill] sm:$0xff]  ;;  %v10188_v18 = vld [vmem:[#allocation80_spill] sm:$0xff] }
 0x20f   : > { %v1445_v10 = vpop.permute.xlu1 %1444  ;;  %v1635_v49 = vsel %vm1625_vm7, %v1602_v62, %v10181_v8  ;;  %v1570_v0 = vsel %vm1559_vm4, %v1537_v5, %v10185_v44  ;;  %v10187_v55 = vld [vmem:[#allocation87_spill] sm:$0xff]  ;;  %v1538_v33 = vsel %vm1526_vm3, %v10189_v47, %v10188_v18  ;;  %v10199_v18 = vld [vmem:[#allocation82_spill] sm:$0xff] }
 0x210   : > { %v1351_v27 = vpop.permute.xlu0 %1350  ;;  %v1765_v26 = vsel %vm1757_vm11, %v1732_v34, %v1445_v10  ;;  %v1668_v37 = vsel %vm1658_vm8, %v1635_v49, %v10184_v3  ;;  %v10186_v10 = vld [vmem:[#allocation120_spill] sm:$0xff]  ;;  %v10193_v40 = vld [vmem:[#allocation107_spill] sm:$0xff]  ;;  %v10194_v3 = vld [vmem:[#allocation81_spill] sm:$0xff] }
 0x211   : > { %5380 = vmatmul.mubr.msk.f32.gmra.mrb[6].mxu0 %vm1795_vm12, %v1765_v26  ;;  %v1733_v32 = vsel %vm1724_vm10, %v1700_v31, %v1351_v27  ;;  %v1701_v34 = vsel %vm1691_vm9, %v1668_v37, %v7848_v35  ;;  %v1603_v27 = vsel %vm1592_vm5, %v1570_v0, %v10186_v10  ;;  %v10190_v31 = vld [vmem:[#allocation20_spill] sm:$0xff]  ;;  %v10195_v37 = vld [vmem:[#allocation21_spill] sm:$0xff]  ;;  %v10200_v47 = vld [vmem:[#allocation22_spill] sm:$0xff] }
 0x212   : > { %v1636_v9 = vsel %vm1625_vm7, %v1603_v27, %v10187_v55  ;;  %v10191_v35 = vld [vmem:[#allocation100_spill] sm:$0xff]  ;;  %v1539_v44 = vsel %vm1526_vm3, %v10195_v37, %v10194_v3  ;;  %v10197_v27 = vld [vmem:[#allocation121_spill] sm:$0xff] }
 0x213   : > { %v1353_v13 = vpop.permute.xlu1 %1352  ;;  %v1669_v57 = vsel %vm1658_vm8, %v1636_v9, %v10190_v31  ;;  %v1571_v62 = vsel %vm1559_vm4, %v1538_v33, %v10191_v35  ;;  %v10198_v9 = vld [vmem:[#allocation65_spill] sm:$0xff]  ;;  %v1540_v33 = vsel %vm1526_vm3, %v10200_v47, %v10199_v18 }
 0x214   : > { %v1447_v16 = vpop.permute.xlu0 %1446  ;;  %v1734_v61 = vsel %vm1724_vm10, %v1701_v34, %v1353_v13  ;;  %v10192_v13 = vld [vmem:[#allocation52_spill] sm:$0xff] }
 0x215   : > { %v1766_v63 = vsel %vm1757_vm11, %v1733_v32, %v1447_v16  ;;  %v1702_v32 = vsel %vm1691_vm9, %v1669_v57, %v7850_v51  ;;  %v1604_v16 = vsel %vm1592_vm5, %v1571_v62, %v10192_v13  ;;  %v10196_v51 = vld [vmem:[#allocation101_spill] sm:$0xff] }
 0x216   : > { %5382 = vmatprep.mubr.msk.f32.mxu0 %vm1795_vm12, %v1766_v63  ;;  %v1637_v17 = vsel %vm1625_vm7, %v1604_v16, %v10193_v40  ;;  %v1572_v34 = vsel %vm1559_vm4, %v1539_v44, %v10196_v51  ;;  %v10202_v62 = vld [vmem:[#allocation53_spill] sm:$0xff]  ;;  %v10204_v40 = vld [vmem:[#allocation83_spill] sm:$0xff] }
 0x217   : > { %v1449_v60 = vpop.permute.xlu1 %1448  ;;  %v1670_v0 = vsel %vm1658_vm8, %v1637_v17, %v7633_v12  ;;  %v10205_v17 = vld [vmem:[#allocation25_spill] sm:$0xff] }
 0x218   : > { %v1355_v26 = vpop.permute.xlu0 %1354  ;;  %v1767_v54 = vsel %vm1757_vm11, %v1734_v61, %v1449_v60  ;;  %v1703_v10 = vsel %vm1691_vm9, %v1670_v0, %v7857_v38  ;;  %v1605_v61 = vsel %vm1592_vm5, %v1572_v34, %v10197_v27  ;;  %v10201_v38 = vld [vmem:[#allocation102_spill] sm:$0xff] }
 0x219   : > { %5383 = vmatmul.mubr.msk.f32.gmra.mrb[8].mxu0 %vm1795_vm12, %v1767_v54  ;;  %v1735_v8 = vsel %vm1724_vm10, %v1702_v32, %v1355_v26  ;;  %v1638_v54 = vsel %vm1625_vm7, %v1605_v61, %v10198_v9  ;;  %v1573_v57 = vsel %vm1559_vm4, %v1540_v33, %v10201_v38  ;;  %v10207_v0 = vld [vmem:[#allocation122_spill] sm:$0xff]  ;;  %v10208_v61 = vld [vmem:[#allocation125_spill] sm:$0xff] }
 0x21a   : > { %v1671_v31 = vsel %vm1658_vm8, %v1638_v54, %v7635_v56  ;;  %v1606_v32 = vsel %vm1592_vm5, %v1573_v57, %v10202_v62  ;;  %v10211_v54 = vld [vmem:[#allocation23_spill] sm:$0xff]  ;;  %v10213_v33 = vld [vmem:[#allocation54_spill] sm:$0xff] }
 0x21b   : > { %v1357_v49 = vpop.permute.xlu1 %1356  ;;  %v1704_v35 = vsel %vm1691_vm9, %v1671_v31, %v7859_v25  ;;  %v10206_v25 = vld [vmem:[#allocation103_spill] sm:$0xff]  ;;  %v10214_v62 = vld [vmem:[#allocation126_spill] sm:$0xff] }
 0x21c   : > { %v1451_v63 = vpop.permute.xlu0 %1450  ;;  %v1736_v60 = vsel %vm1724_vm10, %v1703_v10, %v1357_v49  ;;  %v10203_v49 = vld [vmem:[#allocation124_spill] sm:$0xff] }
 0x21d   : > { %v1768_v5 = vsel %vm1757_vm11, %v1735_v8, %v1451_v63  ;;  %v1639_v63 = vsel %vm1625_vm7, %v1606_v32, %v10203_v49 }
 0x21e   : > { %5385 = vmatprep.mubr.msk.f32.mxu0 %vm1795_vm12, %v1768_v5  ;;  %v1541_v5 = vsel %vm1526_vm3, %v10205_v17, %v10204_v40  ;;  %v1672_v3 = vsel %vm1658_vm8, %v1639_v63, %v7642_v14  ;;  %v10217_v63 = vld [vmem:[#allocation24_spill] sm:$0xff] }
 0x21f   : > { %v1453_v26 = vpop.permute.xlu1 %1452  ;;  %v1574_v37 = vsel %vm1559_vm4, %v1541_v5, %v10206_v25  ;;  %v1705_v44 = vsel %vm1691_vm9, %v1672_v3, %v7869_v21  ;;  %v10212_v21 = vld [vmem:[#allocation104_spill] sm:$0xff]  ;;  %v10219_v5 = vld [vmem:[#allocation123_spill] sm:$0xff] }
 0x220   : > { %v1359_v55 = vpop.permute.xlu0 %1358  ;;  %v1769_v12 = vsel %vm1757_vm11, %v1736_v60, %v1453_v26  ;;  %v1607_v51 = vsel %vm1592_vm5, %v1574_v37, %v10207_v0  ;;  %v10209_v26 = vld [vmem:[#allocation84_spill] sm:$0xff]  ;;  %v10220_v0 = vld [vmem:[#allocation127_spill] sm:$0xff] }
 0x221   : > { %5386 = vmatmul.mubr.msk.f32.gmra.mrb[10].mxu0 %vm1795_vm12, %v1769_v12  ;;  %v1737_v13 = vsel %vm1724_vm10, %v1704_v35, %v1359_v55  ;;  %v1640_v60 = vsel %vm1625_vm7, %v1607_v51, %v10208_v61  ;;  %v10210_v55 = vld [vmem:[#allocation26_spill] sm:$0xff] }
 0x222   : > { %v1542_v9 = vsel %vm1526_vm3, %v10210_v55, %v10209_v26  ;;  %v1673_v12 = vsel %vm1658_vm8, %v1640_v60, %v10211_v54  ;;  %v1709_v55 = vsel %vm1691_vm9, %v7670_v20, %v7886_v58  ;;  %v1711_v20 = vsel %vm1691_vm9, %v7690_v4, %v7900_v45 }
 0x223   : > { %v1361_v16 = vpop.permute.xlu1 %1360  ;;  %v1575_v18 = vsel %vm1559_vm4, %v1542_v9, %v10212_v21  ;;  %v1706_v47 = vsel %vm1691_vm9, %v1673_v12, %v7871_v30  ;;  %v10218_v30 = vld [vmem:[#allocation105_spill] sm:$0xff]  ;;  %v1713_v4 = vsel %vm1691_vm9, %v7707_v52, %v7915_v15 }
 0x224   : > { %v1455_v8 = vpop.permute.xlu0 %1454  ;;  %v1738_v34 = vsel %vm1724_vm10, %v1705_v44, %v1361_v16  ;;  %v1608_v31 = vsel %vm1592_vm5, %v1575_v18, %v10213_v33  ;;  %v10215_v16 = vld [vmem:[#allocation85_spill] sm:$0xff] }
 0x225   : > { %v1770_v56 = vsel %vm1757_vm11, %v1737_v13, %v1455_v8  ;;  %v1641_v32 = vsel %vm1625_vm7, %v1608_v31, %v10214_v62  ;;  %v10216_v8 = vld [vmem:[#allocation27_spill] sm:$0xff] }
 0x226   : > { %5388 = vmatprep.mubr.msk.f32.mxu0 %vm1795_vm12, %v1770_v56  ;;  %v1543_v49 = vsel %vm1526_vm3, %v10216_v8, %v10215_v16  ;;  %v1674_v56 = vsel %vm1658_vm8, %v1641_v32, %v10217_v63 }
 0x227   : > { %v1457_v10 = vpop.permute.xlu1 %1456  ;;  %v1576_v40 = vsel %vm1559_vm4, %v1543_v49, %v10218_v30  ;;  %v1707_v17 = vsel %vm1691_vm9, %v1674_v56, %v7877_v42 }
 0x228   : > { %v1363_v27 = vpop.permute.xlu0 %1362  ;;  %v1771_v14 = vsel %vm1757_vm11, %v1738_v34, %v1457_v10  ;;  %v1609_v3 = vsel %vm1592_vm5, %v1576_v40, %v10219_v5  ;;  %v10221_v10 = vld [vmem:[#allocation28_spill] sm:$0xff] }
 0x229   : > { %5389 = vmatmul.mubr.msk.f32.gmra.mrb[12].mxu0 %vm1795_vm12, %v1771_v14  ;;  %v1739_v38 = vsel %vm1724_vm10, %v1706_v47, %v1363_v27  ;;  %v1642_v51 = vsel %vm1625_vm7, %v1609_v3, %v10220_v0 }
 0x22a   : > { %v1675_v27 = vsel %vm1658_vm8, %v1642_v51, %v10221_v10 }
 0x22b   : > { %v1365_v57 = vpop.permute.xlu1 %1364  ;;  %v1708_v42 = vsel %vm1691_vm9, %v1675_v27, %v7879_v50  ;;  %v1710_v50 = vsel %vm1691_vm9, %v7673_v2, %v7888_v46  ;;  %v1712_v2 = vsel %vm1691_vm9, %v7693_v39, %v7902_v36 }
 0x22c   : > { %v1459_v35 = vpop.permute.xlu0 %1458  ;;  %v1740_v25 = vsel %vm1724_vm10, %v1707_v17, %v1365_v57 }
 0x22d   : > { %v1772_v13 = vsel %vm1757_vm11, %v1739_v38, %v1459_v35 }
 0x22e   : > { %5391 = vmatprep.mubr.msk.f32.mxu0 %vm1795_vm12, %v1772_v13 }
 0x22f   : > { %v1461_v37 = vpop.permute.xlu1 %1460 }
 0x230   : > { %v1367_v44 = vpop.permute.xlu0 %1366  ;;  %v1773_v34 = vsel %vm1757_vm11, %v1740_v25, %v1461_v37 }
 0x231   : > { %5392 = vmatmul.mubr.msk.f32.gmra.mrb[14].mxu0 %vm1795_vm12, %v1773_v34  ;;  %v1741_v61 = vsel %vm1724_vm10, %v1708_v42, %v1367_v44 }
 0x233   : > { %v1369_v60 = vpop.permute.xlu1 %1368 }
 0x234   : > { %v1463_v14 = vpop.permute.xlu0 %1462  ;;  %v1742_v9 = vsel %vm1724_vm10, %v1709_v55, %v1369_v60 }
 0x235   : > { %v1774_v26 = vsel %vm1757_vm11, %v1741_v61, %v1463_v14 }
 0x236   : > { %5394 = vmatprep.mubr.msk.f32.mxu0 %vm1795_vm12, %v1774_v26 }
 0x237   : > { %v1465_v54 = vpop.permute.xlu1 %1464 }
 0x238   : > { %v1371_v12 = vpop.permute.xlu0 %1370  ;;  %v1775_v21 = vsel %vm1757_vm11, %v1742_v9, %v1465_v54 }
 0x239   : > { %5395 = vmatmul.mubr.msk.f32.gmra.mrb[16].mxu0 %vm1795_vm12, %v1775_v21  ;;  %v1743_v18 = vsel %vm1724_vm10, %v1710_v50, %v1371_v12 }
 0x23b   : > { %v1373_v47 = vpop.permute.xlu1 %1372 }
 0x23c   : > { %v1467_v33 = vpop.permute.xlu0 %1466  ;;  %v1744_v58 = vsel %vm1724_vm10, %v1711_v20, %v1373_v47 }
 0x23d   : > { %v1776_v31 = vsel %vm1757_vm11, %v1743_v18, %v1467_v33 }
 0x23e   : > { %5397 = vmatprep.mubr.msk.f32.mxu0 %vm1795_vm12, %v1776_v31 }
 0x23f   : > { %v1469_v38 = vpop.permute.xlu1 %1468 }
 0x240   : > { %v1375_v57 = vpop.permute.xlu0 %1374  ;;  %v1777_v35 = vsel %vm1757_vm11, %v1744_v58, %v1469_v38 }
 0x241   : > { %5398 = vmatmul.mubr.msk.f32.gmra.mrb[18].mxu0 %vm1795_vm12, %v1777_v35  ;;  %v1745_v46 = vsel %vm1724_vm10, %v1712_v2, %v1375_v57 }
 0x243   : > { %v1377_v62 = vpop.permute.xlu1 %1376 }
 0x244   : > { %v1471_v32 = vpop.permute.xlu0 %1470  ;;  %v1746_v45 = vsel %vm1724_vm10, %v1713_v4, %v1377_v62 }
 0x245   : > { %v1778_v13 = vsel %vm1757_vm11, %v1745_v46, %v1471_v32 }
 0x246   : > { %5400 = vmatprep.mubr.msk.f32.mxu0 %vm1795_vm12, %v1778_v13 }
 0x247   : > { %v1473_v16 = vpop.permute.xlu1 %1472 }
 0x248   : > { %v1283_v8 = vpop.permute.xlu0 %1282  ;;  %v1779_v49 = vsel %vm1757_vm11, %v1746_v45, %v1473_v16 }
 0x249   : > { %5401 = vmatmul.mubr.msk.f32.gmra.mrb[20].mxu0 %vm1795_vm12, %v1779_v49  ;;  %v1714_v63 = vsel %vm1691_vm9, %v7710_v41, %v1283_v8 }
 0x24b   : > { %v1285_v39 = vpop.permute.xlu1 %1284 }
 0x24c   : > { %v1379_v36 = vpop.permute.xlu0 %1378  ;;  %v1715_v52 = vsel %vm1691_vm9, %v7727_v28, %v1285_v39 }
 0x24d   : > { %v1747_v56 = vsel %vm1724_vm10, %v1714_v63, %v1379_v36 }
 0x24f   : > { %v1381_v30 = vpop.permute.xlu1 %1380 }
 0x250   : > { %v1475_v40 = vpop.permute.xlu0 %1474  ;;  %v1748_v15 = vsel %vm1724_vm10, %v1715_v52, %v1381_v30  ;;  %v8264_v37 = vpop.f32.mrb[0].mxu1 }
 0x251   : > { %v1780_v17 = vsel %vm1757_vm11, %v1747_v56, %v1475_v40  ;;  %v8267_v41 = vpop.f32.mrb[1].mxu1 }
 0x252   : > { %5403 = vmatprep.mubr.msk.f32.mxu0 %vm1795_vm12, %v1780_v17 }
 0x253   : > { %v1477_v5 = vpop.permute.xlu1 %1476 }
 0x254   : > { %v1287_v3 = vpop.permute.xlu0 %1286  ;;  %v1781_v25 = vsel %vm1757_vm11, %v1748_v15, %v1477_v5  ;;  %v8273_v42 = vpop.f32.mrb[2].mxu1 }
 0x255   : > { %5404 = vmatmul.mubr.msk.f32.gmra.mrb[22].mxu0 %vm1795_vm12, %v1781_v25  ;;  %v1716_v51 = vsel %vm1691_vm9, %v7730_v6, %v1287_v3  ;;  %v8278_v60 = vpop.f32.mrb[3].mxu1 }
 0x257   : > { %v1289_v44 = vpop.permute.xlu1 %1288 }
 0x258   : > { %v1383_v0 = vpop.permute.xlu0 %1382  ;;  %v1717_v61 = vsel %vm1691_vm9, %v7744_v19, %v1289_v44 }
 0x259   : > { %v1749_v34 = vsel %vm1724_vm10, %v1716_v51, %v1383_v0 }
 0x25b   : > { %v1385_v28 = vpop.permute.xlu1 %1384 }
 0x25c   : > { %v1479_v10 = vpop.permute.xlu0 %1478  ;;  %v1750_v14 = vsel %vm1724_vm10, %v1717_v61, %v1385_v28 }
 0x25d   : > { %v1782_v27 = vsel %vm1757_vm11, %v1749_v34, %v1479_v10 }
 0x25e   : > { %5406 = vmatprep.mubr.msk.f32.mxu0 %vm1795_vm12, %v1782_v27 }
 0x25f   : > { %v1481_v26 = vpop.permute.xlu1 %1480  ;;  %v8283_v12 = vpop.f32.mrb[4].mxu1 }
 0x260   : > { %v1291_v55 = vpop.permute.xlu0 %1290  ;;  %v1783_v6 = vsel %vm1757_vm11, %v1750_v14, %v1481_v26  ;;  %v8289_v21 = vpop.f32.mrb[5].mxu1 }
 0x261   : > { %5407 = vmatmul.mubr.msk.f32.gmra.mrb[24].mxu0 %vm1795_vm12, %v1783_v6  ;;  %v1718_v19 = vsel %vm1691_vm9, %v7747_v43, %v1291_v55 }
 0x263   : > { %v1293_v9 = vpop.permute.xlu1 %1292 }
 0x264   : > { %v1387_v54 = vpop.permute.xlu0 %1386  ;;  %v1719_v31 = vsel %vm1691_vm9, %v7764_v23, %v1293_v9 }
 0x265   : > { %v1751_v50 = vsel %vm1724_vm10, %v1718_v19, %v1387_v54 }
 0x267   : > { %v1389_v18 = vpop.permute.xlu1 %1388  ;;  %v8298_v43 = vpop.f32.mrb[6].mxu1 }
 0x268   : > { %v1483_v47 = vpop.permute.xlu0 %1482  ;;  %v1752_v20 = vsel %vm1724_vm10, %v1719_v31, %v1389_v18  ;;  %v8301_v35 = vpop.f32.mrb[7].mxu1  ;;  %v8366_v31 = vld [vmem:[%s9654_s4] ss:$0 sm:$0xff] }
 0x269   : > { %v1784_v33 = vsel %vm1757_vm11, %v1751_v50, %v1483_v47 }
 0x26a   : > { %5409 = vmatprep.mubr.msk.f32.mxu0 %vm1795_vm12, %v1784_v33 }
 0x26b   : > { %v1485_v58 = vpop.permute.xlu1 %1484 }
 0x26c   : > { %v1295_v38 = vpop.permute.xlu0 %1294  ;;  %v1785_v57 = vsel %vm1757_vm11, %v1752_v20, %v1485_v58  ;;  %v8371_v58 = vld [vmem:[%s9655_s5] ss:$0 sm:$0xff] }
 0x26d   : > { %5410 = vmatmul.mubr.msk.f32.gmra.mrb[26].mxu0 %vm1795_vm12, %v1785_v57  ;;  %v1720_v62 = vsel %vm1691_vm9, %v7767_v1, %v1295_v38 }
 0x26f   : > { %v1297_v2 = vpop.permute.xlu1 %1296  ;;  %v8307_v45 = vpop.f32.mrb[8].mxu1 }
 0x270   : > { %v1391_v46 = vpop.permute.xlu0 %1390  ;;  %v1721_v16 = vsel %vm1691_vm9, %v7781_v11, %v1297_v2  ;;  %v8312_v8 = vpop.f32.mrb[9].mxu1 }
 0x271   : > { %v1753_v32 = vsel %vm1724_vm10, %v1720_v62, %v1391_v46 }
 0x273   : > { %v1393_v23 = vpop.permute.xlu1 %1392 }
 0x274   : > { %v1487_v13 = vpop.permute.xlu0 %1486  ;;  %v1754_v49 = vsel %vm1724_vm10, %v1721_v16, %v1393_v23 }
 0x275   : > { %v1786_v4 = vsel %vm1757_vm11, %v1753_v32, %v1487_v13 }
 0x276   : > { %5412 = vmatprep.mubr.msk.f32.mxu0 %vm1795_vm12, %v1786_v4 }
 0x277   : > { %v1489_v39 = vpop.permute.xlu1 %1488  ;;  %v8317_v40 = vpop.f32.mrb[10].mxu1 }
 0x278   : > { %v5588_v36 = vpop.permute.xlu0 %5587  ;;  %v1787_v1 = vsel %vm1757_vm11, %v1754_v49, %v1489_v39  ;;  %v8325_v51 = vpop.f32.mrb[11].mxu1 }
 0x279   : > { %v5590_v63 = vunpack.i.h.bf16 %v5588_v36  ;;  %v5589_v56 = vunpack.i.l.bf16 %v5588_v36  ;;  %5413 = vmatmul.mubr.msk.f32.gmra.mrb[28].mxu0 %vm1795_vm12, %v1787_v1 }
 0x27b   : > { %v5593_v30 = vpop.permute.xlu1 %5592  ;;  %v1722_v3 = vsel %vm1691_vm9, %v7784_v53, %v5589_v56  ;;  %v1723_v25 = vsel %vm1691_vm9, %v7800_v7, %v5590_v63 }
 0x27c   : > { %v5595_v17 = vunpack.i.h.bf16 %v5593_v30  ;;  %v5594_v52 = vunpack.i.l.bf16 %v5593_v30  ;;  %v5598_v15 = vpop.permute.xlu0 %5597 }
 0x27d   : > { %v5600_v5 = vunpack.i.h.bf16 %v5598_v15  ;;  %v5599_v11 = vunpack.i.l.bf16 %v5598_v15 }
 0x27e   : > { %v1755_v44 = vsel %vm1724_vm10, %v1722_v3, %v5594_v52  ;;  %v1756_v0 = vsel %vm1724_vm10, %v1723_v25, %v5595_v17  ;;  %v8331_v10 = vpop.f32.mrb[12].mxu1 }
 0x27f   : > { %v1788_v34 = vsel %vm1757_vm11, %v1755_v44, %v5599_v11  ;;  %v1789_v28 = vsel %vm1757_vm11, %v1756_v0, %v5600_v5  ;;  %v8333_v53 = vpop.f32.mrb[13].mxu1 }
 0x280   : > { %5415 = vmatprep.mubr.msk.f32.mxu0 %vm1795_vm12, %v1788_v34 }
 0x281   : > { %5416 = vmatmul.mubr.msk.f32.gmra.mrb[30].mxu0 %vm1795_vm12, %v1789_v28 }
 0x282   : > { %v8335_v27 = vpop.f32.mrb[14].mxu1 }
 0x283   : > { %v8337_v7 = vpop.f32.mrb[15].mxu1 }
 0x287   : > { %v8339_v61 = vpop.f32.mrb[16].mxu1 }
 0x288   : > { %v8341_v14 = vpop.f32.mrb[17].mxu1 }
 0x298   : > { %v8343_v26 = vpop.f32.mrb[18].mxu1 }
 0x299   : > { %v8345_v55 = vpop.f32.mrb[19].mxu1 }
 0x29c   : > { %v8347_v6 = vpop.f32.mrb[20].mxu1 }
 0x29d   : > { %v8349_v9 = vpop.f32.mrb[21].mxu1 }
 0x2a0   : > { %v8351_v54 = vpop.f32.mrb[22].mxu1 }
 0x2a1   : > { %v8353_v19 = vpop.f32.mrb[23].mxu1 }
 0x2a4   : > { %v8355_v50 = vpop.f32.mrb[24].mxu1 }
 0x2a5   : > { %v8357_v18 = vpop.f32.mrb[25].mxu1 }
 0x2bb   : > { %v8359_v47 = vpop.f32.mrb[26].mxu1 }
 0x2bc   : > { %v8361_v33 = vpop.f32.mrb[27].mxu1 }
 0x2cc   : > { %v5372_v20 = vpop.f32.mrb[0].mxu0 }
 0x2cd   : > { %v2129_v38 = vmul.f32 %v5372_v20, %v8366_v31  ;;  %v1962_v57 = vpop.f32.mrb[1].mxu0  ;;  %v8378_v4 = vpop.f32.mrb[28].mxu1 }
 0x2ce   : > { %v2128_v2 = vmul.f32 %v8366_v31, %v1962_v57  ;;  %v8381_v39 = vpop.f32.mrb[29].mxu1 }
 0x2cf   : > { %v2168_v46 = vadd.f32 %v8371_v58, %v2129_v38 }
 0x2d0   : > { %v2167_v62 = vadd.f32 %v8371_v58, %v2128_v2 }
 0x2d1   : > { %v2200_v32 = vmax.f32 %v2168_v46, 0.0 }
 0x2d2   : > { %v2199_v23 = vmax.f32 %v2167_v62, 0.0  ;;  %v8405_v46 = vpop.f32.mrb[30].mxu1 }
 0x2d3   : > { %v3456_v13 = vadd.f32 %v8264_v37, %v2200_v32 }
 0x2d4   : > { %v3455_v16 = vadd.f32 %v8267_v41, %v2199_v23  ;;  %v5375_v49 = vpop.f32.mrb[2].mxu0 }
 0x2d5   : > { %v3520_v36 = vrot.slane %v3456_v13, 7  ;;  %v2131_v1 = vmul.f32 %v5375_v49, %v8366_v31  ;;  %v1972_v63 = vpop.f32.mrb[3].mxu0 }
 0x2d6   : > { %v3519_v56 = vrot.slane %v3455_v16, 7  ;;  %v2130_v30 = vmul.f32 %v8366_v31, %v1972_v63  ;;  %v8413_v16 = vpop.f32.mrb[31].mxu1 }
 0x2d7   : > { %v8386_v17 = vsel %vm418_vm0, %v3520_v36, 0.0  ;;  %v2170_v52 = vadd.f32 %v8371_v58, %v2131_v1 }
 0x2d8   : > { %v3679_v37 = vrot.slane %v8386_v17, 1  ;;  %v8391_v15 = vsel %vm418_vm0, %v3519_v56, %v3520_v36  ;;  %v8394_v41 = vsel %vm418_vm0, 0.0, %v3519_v56  ;;  %v2169_v3 = vadd.f32 %v8371_v58, %v2130_v30 }
 0x2d9   : > { %v3676_v5 = vrot.slane %v8394_v41, 1  ;;  %v3677_v11 = vrot.slane %v8391_v15, 1  ;;  %v2202_v25 = vmax.f32 %v2170_v52, 0.0 }
 0x2da   : > { %v2201_v20 = vmax.f32 %v2169_v3, 0.0 }
 0x2db   : > { %v3678_v0 = vsel %vm584_vm1, %v3676_v5, %v3677_v11  ;;  %v3680_v34 = vsel %vm584_vm1, %v3677_v11, %v3679_v37  ;;  %v3458_v28 = vadd.f32 %v8273_v42, %v2202_v25 }
 0x2dc   : > { %v5378_v44 = vpop.f32.mrb[4].mxu0  ;;  %v8403_v2 = vpack.i.bf16 %v3680_v34, %v3678_v0  ;;  %v3457_v23 = vadd.f32 %v8278_v60, %v2201_v20 }
 0x2dd   : > { %v2133_v38 = vmul.f32 %v5378_v44, %v8366_v31  ;;  %v1982_v57 = vpop.f32.mrb[5].mxu0  ;;  %v3523_v32 = vrot.slane %v3458_v28, 7 }
 0x2de   : > { %v2132_v62 = vmul.f32 %v8366_v31, %v1982_v57  ;;  %5607 = vrot.lane.b32.xlu0 %v8403_v2, %s6253_s16  ;;  %v3522_v36 = vrot.slane %v3457_v23, 7 }
 0x2df   : > { %v2172_v13 = vadd.f32 %v8371_v58, %v2133_v38  ;;  %v3631_v49 = vsel %vm418_vm0, %v3523_v32, 0.0 }
 0x2e0   : > { %v2171_v42 = vadd.f32 %v8371_v58, %v2132_v62  ;;  %v3684_v63 = vrot.slane %v3631_v49, 1  ;;  %v8417_v30 = vsel %vm418_vm0, %v3522_v36, %v3523_v32  ;;  %v8420_v60 = vsel %vm418_vm0, 0.0, %v3522_v36 }
 0x2e1   : > { %v2204_v1 = vmax.f32 %v2172_v13, 0.0  ;;  %v3759_v37 = vrot.slane %v3631_v49, 2  ;;  %v3681_v5 = vrot.slane %v8420_v60, 1  ;;  %v3682_v11 = vrot.slane %v8417_v30, 1 }
 0x2e2   : > { %v2203_v56 = vmax.f32 %v2171_v42, 0.0  ;;  %v3756_v25 = vrot.slane %v8420_v60, 2  ;;  %v3757_v20 = vrot.slane %v8417_v30, 2 }
 0x2e3   : > { %v3460_v52 = vadd.f32 %v8283_v12, %v2204_v1  ;;  %v3683_v12 = vsel %vm584_vm1, %v3681_v5, %v3682_v11  ;;  %v3685_v57 = vsel %vm584_vm1, %v3682_v11, %v3684_v63 }
 0x2e4   : > { %v5381_v3 = vpop.f32.mrb[6].mxu0  ;;  %v3459_v0 = vadd.f32 %v8289_v21, %v2203_v56  ;;  %v8434_v13 = vpack.i.bf16 %v3685_v57, %v3683_v12  ;;  %v3758_v11 = vsel %vm665_vm2, %v3756_v25, %v3757_v20 }
 0x2e5   : > { %v3526_v44 = vrot.slane %v3460_v52, 7  ;;  %v2135_v34 = vmul.f32 %v5381_v3, %v8366_v31  ;;  %v1992_v28 = vpop.f32.mrb[7].mxu0  ;;  %v3760_v3 = vsel %vm665_vm2, %v3757_v20, %v3759_v37 }
 0x2e6   : > { %v2134_v38 = vmul.f32 %v8366_v31, %v1992_v28  ;;  %v3525_v32 = vrot.slane %v3459_v0, 7  ;;  %10222 = vst [vmem:[#allocation30_spill] sm:$0xff] %v8434_v13  ;;  %5612 = vrot.lane.b32.xlu1 %v8434_v13, %s6253_s16  ;;  %v8459_v20 = vpack.i.bf16 %v3760_v3, %v3758_v11 }
 0x2e7   : > { %v3632_v62 = vsel %vm418_vm0, %v3526_v44, 0.0  ;;  %v2174_v23 = vadd.f32 %v8371_v58, %v2135_v34 }
 0x2e8   : > { %v3689_v42 = vrot.slane %v3632_v62, 1  ;;  %v2173_v21 = vadd.f32 %v8371_v58, %v2134_v38  ;;  %v8438_v49 = vsel %vm418_vm0, %v3525_v32, %v3526_v44  ;;  %v8441_v36 = vsel %vm418_vm0, 0.0, %v3525_v32 }
 0x2e9   : > { %10223 = vst [vmem:[#allocation31_spill] sm:$0xff] %v8438_v49  ;;  %10224 = vst [vmem:[#allocation32_spill] sm:$0xff] %v8441_v36  ;;  %v2206_v1 = vmax.f32 %v2174_v23, 0.0  ;;  %v3686_v63 = vrot.slane %v8441_v36, 1  ;;  %v3687_v56 = vrot.slane %v8438_v49, 1  ;;  %v3764_v44 = vrot.slane %v3632_v62, 2 }
 0x2ea   : > { %v2205_v5 = vmax.f32 %v2173_v21, 0.0  ;;  %v3761_v0 = vrot.slane %v8441_v36, 2  ;;  %v3762_v25 = vrot.slane %v8438_v49, 2 }
 0x2eb   : > { %v3462_v52 = vadd.f32 %v8298_v43, %v2206_v1  ;;  %v3688_v28 = vsel %vm584_vm1, %v3686_v63, %v3687_v56  ;;  %v3690_v38 = vsel %vm584_vm1, %v3687_v56, %v3689_v42 }
 0x2ec   : > { %v5384_v34 = vpop.f32.mrb[8].mxu0  ;;  %v3461_v57 = vadd.f32 %v8301_v35, %v2205_v5  ;;  %v8455_v43 = vpack.i.bf16 %v3690_v38, %v3688_v28  ;;  %v3763_v3 = vsel %vm665_vm2, %v3761_v0, %v3762_v25 }
 0x2ed   : > { %v3529_v12 = vrot.slane %v3462_v52, 7  ;;  %v2137_v32 = vmul.f32 %v5384_v34, %v8366_v31  ;;  %v2002_v23 = vpop.f32.mrb[9].mxu0  ;;  %v3765_v34 = vsel %vm665_vm2, %v3762_v25, %v3764_v44 }
 0x2ee   : > { %10225 = vst [vmem:[#allocation33_spill] sm:$0xff] %v8455_v43  ;;  %v2136_v37 = vmul.f32 %v8366_v31, %v2002_v23  ;;  %v3528_v21 = vrot.slane %v3461_v57, 7  ;;  %5617 = vrot.lane.b32.xlu0 %v8455_v43, %s6253_s16  ;;  %v8486_v25 = vpack.i.bf16 %v3765_v34, %v3763_v3 }
 0x2ef   : > { %v3633_v62 = vsel %vm418_vm0, %v3529_v12, 0.0  ;;  %v2176_v1 = vadd.f32 %v8371_v58, %v2137_v32 }
 0x2f0   : > { %v3694_v35 = vrot.slane %v3633_v62, 1  ;;  %v2175_v42 = vadd.f32 %v8371_v58, %v2136_v37  ;;  %v8467_v63 = vsel %vm418_vm0, %v3528_v21, %v3529_v12  ;;  %v8470_v56 = vsel %vm418_vm0, 0.0, %v3528_v21 }
 0x2f1   : > { %10226 = vst [vmem:[#allocation34_spill] sm:$0xff] %v8467_v63  ;;  %10227 = vst [vmem:[#allocation35_spill] sm:$0xff] %v8470_v56  ;;  %v2208_v52 = vmax.f32 %v2176_v1, 0.0  ;;  %v3691_v5 = vrot.slane %v8470_v56, 1  ;;  %v3692_v11 = vrot.slane %v8467_v63, 1  ;;  %v3769_v28 = vrot.slane %v3633_v62, 2 }
 0x2f2   : > { %v2207_v57 = vmax.f32 %v2175_v42, 0.0  ;;  %v3766_v32 = vrot.slane %v8470_v56, 2  ;;  %v3767_v12 = vrot.slane %v8467_v63, 2 }
 0x2f3   : > { %v3464_v38 = vadd.f32 %v8307_v45, %v2208_v52  ;;  %v3693_v37 = vsel %vm584_vm1, %v3691_v5, %v3692_v11  ;;  %v3695_v21 = vsel %vm584_vm1, %v3692_v11, %v3694_v35 }
 0x2f4   : > { %v5387_v23 = vpop.f32.mrb[10].mxu0  ;;  %v3463_v48 = vadd.f32 %v8312_v8, %v2207_v57  ;;  %v8483_v44 = vpack.i.bf16 %v3695_v21, %v3693_v37  ;;  %v3768_v5 = vsel %vm665_vm2, %v3766_v32, %v3767_v12  ;;  %v3770_v11 = vsel %vm665_vm2, %v3767_v12, %v3769_v28 }
 0x2f5   : > { %v3532_v1 = vrot.slane %v3464_v38, 7  ;;  %v2139_v0 = vmul.f32 %v5387_v23, %v8366_v31  ;;  %v2012_v24 = vpop.f32.mrb[11].mxu0  ;;  %v8506_v28 = vpack.i.bf16 %v3770_v11, %v3768_v5 }
 0x2f6   : > { %10228 = vst [vmem:[#allocation36_spill] sm:$0xff] %v8483_v44  ;;  %v2138_v45 = vmul.f32 %v8366_v31, %v2012_v24  ;;  %v3531_v42 = vrot.slane %v3463_v48, 7  ;;  %5622 = vrot.lane.b32.xlu1 %v8483_v44, %s6253_s16 }
 0x2f7   : > { %v3634_v62 = vsel %vm418_vm0, %v3532_v1, 0.0  ;;  %v2178_v52 = vadd.f32 %v8371_v58, %v2139_v0 }
 0x2f8   : > { %v3699_v35 = vrot.slane %v3634_v62, 1  ;;  %v2177_v8 = vadd.f32 %v8371_v58, %v2138_v45  ;;  %v8496_v38 = vsel %vm418_vm0, %v3531_v42, %v3532_v1  ;;  %v8499_v24 = vsel %vm418_vm0, 0.0, %v3531_v42 }
 0x2f9   : > { %10229 = vst [vmem:[#allocation37_spill] sm:$0xff] %v8496_v38  ;;  %10230 = vst [vmem:[#allocation38_spill] sm:$0xff] %v8499_v24  ;;  %v2210_v3 = vmax.f32 %v2178_v52, 0.0  ;;  %v3696_v48 = vrot.slane %v8499_v24, 1  ;;  %v3697_v34 = vrot.slane %v8496_v38, 1  ;;  %v3771_v57 = vrot.slane %v8499_v24, 2 }
 0x2fa   : > { %v3772_v23 = vrot.slane %v8496_v38, 2  ;;  %v3774_v37 = vrot.slane %v3634_v62, 2  ;;  %v2209_v21 = vmax.f32 %v2177_v8, 0.0 }
 0x2fb   : > { %v3466_v32 = vadd.f32 %v8317_v40, %v2210_v3  ;;  %v3698_v1 = vsel %vm584_vm1, %v3696_v48, %v3697_v34  ;;  %v3700_v0 = vsel %vm584_vm1, %v3697_v34, %v3699_v35 }
 0x2fc   : > { %v5390_v12 = vpop.f32.mrb[12].mxu0  ;;  %v3465_v42 = vadd.f32 %v8325_v51, %v2209_v21  ;;  %v8512_v29 = vpack.i.bf16 %v3700_v0, %v3698_v1  ;;  %v3773_v40 = vsel %vm665_vm2, %v3771_v57, %v3772_v23  ;;  %v3775_v35 = vsel %vm665_vm2, %v3772_v23, %v3774_v37 }
 0x2fd   : > { %v3535_v45 = vrot.slane %v3466_v32, 7  ;;  %v2141_v52 = vmul.f32 %v5390_v12, %v8366_v31  ;;  %v2022_v22 = vpop.f32.mrb[13].mxu0  ;;  %v8533_v0 = vpack.i.bf16 %v3775_v35, %v3773_v40 }
 0x2fe   : > { %10231 = vst [vmem:[#allocation39_spill] sm:$0xff] %v8512_v29  ;;  %v2140_v62 = vmul.f32 %v8366_v31, %v2022_v22  ;;  %v3534_v5 = vrot.slane %v3465_v42, 7  ;;  %5627 = vrot.lane.b32.xlu0 %v8512_v29, %s6253_s16 }
 0x2ff   : > { %v3635_v8 = vsel %vm418_vm0, %v3535_v45, 0.0  ;;  %v2180_v11 = vadd.f32 %v8371_v58, %v2141_v52 }
 0x300   : > { %v3704_v51 = vrot.slane %v3635_v8, 1  ;;  %v3779_v3 = vrot.slane %v3635_v8, 2  ;;  %v2179_v48 = vadd.f32 %v8371_v58, %v2140_v62  ;;  %v8523_v34 = vsel %vm418_vm0, %v3534_v5, %v3535_v45 }
 0x301   : > { %10232 = vst [vmem:[#allocation40_spill] sm:$0xff] %v8523_v34  ;;  %v8526_v22 = vsel %vm418_vm0, 0.0, %v3534_v5  ;;  %v2212_v57 = vmax.f32 %v2180_v11, 0.0  ;;  %v3702_v21 = vrot.slane %v8523_v34, 1  ;;  %v3777_v1 = vrot.slane %v8523_v34, 2 }
 0x302   : > { %10233 = vst [vmem:[#allocation41_spill] sm:$0xff] %v8526_v22  ;;  %v3701_v32 = vrot.slane %v8526_v22, 1  ;;  %v3776_v12 = vrot.slane %v8526_v22, 2  ;;  %v2211_v37 = vmax.f32 %v2179_v48, 0.0 }
 0x303   : > { %v3468_v23 = vadd.f32 %v8331_v10, %v2212_v57  ;;  %v3705_v52 = vsel %vm584_vm1, %v3702_v21, %v3704_v51  ;;  %v3780_v8 = vsel %vm665_vm2, %v3777_v1, %v3779_v3 }
 0x304   : > { %v5393_v42 = vpop.f32.mrb[14].mxu0  ;;  %v3703_v45 = vsel %vm584_vm1, %v3701_v32, %v3702_v21  ;;  %v3778_v62 = vsel %vm665_vm2, %v3776_v12, %v3777_v1  ;;  %v3467_v11 = vadd.f32 %v8333_v53, %v2211_v37 }
 0x305   : > { %v3538_v5 = vrot.slane %v3468_v23, 7  ;;  %v2143_v29 = vmul.f32 %v5393_v42, %v8366_v31  ;;  %v2032_v44 = vpop.f32.mrb[15].mxu0  ;;  %v8541_v43 = vpack.i.bf16 %v3705_v52, %v3703_v45  ;;  %v8549_v53 = vpack.i.bf16 %v3780_v8, %v3778_v62 }
 0x306   : > { %v2142_v10 = vmul.f32 %v8366_v31, %v2032_v44  ;;  %v3537_v35 = vrot.slane %v3467_v11, 7 }
 0x307   : > { %10234 = vst [vmem:[#allocation43_spill] sm:$0xff] %v8541_v43  ;;  %v3636_v40 = vsel %vm418_vm0, %v3538_v5, 0.0  ;;  %v2182_v48 = vadd.f32 %v8371_v58, %v2143_v29  ;;  %5632 = vrot.lane.b32.xlu1 %v8541_v43, %s6253_s16 }
 0x308   : > { %v3709_v51 = vrot.slane %v3636_v40, 1  ;;  %v3784_v3 = vrot.slane %v3636_v40, 2  ;;  %v2181_v57 = vadd.f32 %v8371_v58, %v2142_v10  ;;  %v8552_v32 = vsel %vm418_vm0, %v3537_v35, %v3538_v5 }
 0x309   : > { %10235 = vst [vmem:[#allocation44_spill] sm:$0xff] %v8552_v32  ;;  %v8555_v21 = vsel %vm418_vm0, 0.0, %v3537_v35  ;;  %v2214_v44 = vmax.f32 %v2182_v48, 0.0  ;;  %v3707_v29 = vrot.slane %v8552_v32, 1  ;;  %v3782_v23 = vrot.slane %v8552_v32, 2 }
 0x30a   : > { %10236 = vst [vmem:[#allocation42_spill] sm:$0xff] %v8555_v21  ;;  %v3706_v12 = vrot.slane %v8555_v21, 1  ;;  %v3781_v1 = vrot.slane %v8555_v21, 2  ;;  %v2213_v42 = vmax.f32 %v2181_v57, 0.0 }
 0x30b   : > { %v3470_v37 = vadd.f32 %v8335_v27, %v2214_v44  ;;  %v3710_v62 = vsel %vm584_vm1, %v3707_v29, %v3709_v51  ;;  %v3785_v5 = vsel %vm665_vm2, %v3782_v23, %v3784_v3 }
 0x30c   : > { %v5396_v45 = vpop.f32.mrb[16].mxu0  ;;  %v3708_v52 = vsel %vm584_vm1, %v3706_v12, %v3707_v29  ;;  %v3783_v8 = vsel %vm665_vm2, %v3781_v1, %v3782_v23  ;;  %v3469_v10 = vadd.f32 %v8337_v7, %v2213_v42 }
 0x30d   : > { %v3541_v11 = vrot.slane %v3470_v37, 7  ;;  %v2145_v40 = vmul.f32 %v5396_v45, %v8366_v31  ;;  %v2042_v35 = vpop.f32.mrb[17].mxu0  ;;  %v8568_v48 = vpack.i.bf16 %v3710_v62, %v3708_v52  ;;  %v8576_v7 = vpack.i.bf16 %v3785_v5, %v3783_v8 }
 0x30e   : > { %v2144_v27 = vmul.f32 %v8366_v31, %v2042_v35  ;;  %v3540_v44 = vrot.slane %v3469_v10, 7 }
 0x30f   : > { %10237 = vst [vmem:[#allocation47_spill] sm:$0xff] %v8568_v48  ;;  %v3637_v57 = vsel %vm418_vm0, %v3541_v11, 0.0  ;;  %v2184_v12 = vadd.f32 %v8371_v58, %v2145_v40  ;;  %5637 = vrot.lane.b32.xlu0 %v8568_v48, %s6253_s16 }
 0x310   : > { %v3714_v51 = vrot.slane %v3637_v57, 1  ;;  %v3789_v3 = vrot.slane %v3637_v57, 2  ;;  %v2183_v29 = vadd.f32 %v8371_v58, %v2144_v27  ;;  %v8579_v1 = vsel %vm418_vm0, %v3540_v44, %v3541_v11 }
 0x311   : > { %v8582_v23 = vsel %vm418_vm0, 0.0, %v3540_v44  ;;  %v2216_v37 = vmax.f32 %v2184_v12, 0.0  ;;  %v3712_v45 = vrot.slane %v8579_v1, 1  ;;  %v3787_v62 = vrot.slane %v8579_v1, 2 }
 0x312   : > { %v3711_v42 = vrot.slane %v8582_v23, 1  ;;  %v3786_v52 = vrot.slane %v8582_v23, 2  ;;  %v2215_v40 = vmax.f32 %v2183_v29, 0.0 }
 0x313   : > { %v3472_v10 = vadd.f32 %v8339_v61, %v2216_v37  ;;  %v3715_v11 = vsel %vm584_vm1, %v3712_v45, %v3714_v51  ;;  %v3790_v27 = vsel %vm665_vm2, %v3787_v62, %v3789_v3 }
 0x314   : > { %v5399_v8 = vpop.f32.mrb[18].mxu0  ;;  %v3713_v5 = vsel %vm584_vm1, %v3711_v42, %v3712_v45  ;;  %v3788_v35 = vsel %vm665_vm2, %v3786_v52, %v3787_v62  ;;  %v3471_v44 = vadd.f32 %v8341_v14, %v2215_v40 }
 0x315   : > { %v3544_v57 = vrot.slane %v3472_v10, 7  ;;  %v2147_v12 = vmul.f32 %v5399_v8, %v8366_v31  ;;  %v2052_v48 = vpop.f32.mrb[19].mxu0  ;;  %v8595_v43 = vpack.i.bf16 %v3715_v11, %v3713_v5  ;;  %v8598_v29 = vpack.i.bf16 %v3790_v27, %v3788_v35 }
 0x316   : > { %v2146_v61 = vmul.f32 %v8366_v31, %v2052_v48  ;;  %v3543_v42 = vrot.slane %v3471_v44, 7 }
 0x317   : > { %10238 = vst [vmem:[#allocation67_spill] sm:$0xff] %v8595_v43  ;;  %v3638_v37 = vsel %vm418_vm0, %v3544_v57, 0.0  ;;  %v2186_v51 = vadd.f32 %v8371_v58, %v2147_v12  ;;  %5642 = vrot.lane.b32.xlu1 %v8595_v43, %s6253_s16 }
 0x318   : > { %v3719_v3 = vrot.slane %v3638_v37, 1  ;;  %v3794_v45 = vrot.slane %v3638_v37, 2  ;;  %v2185_v14 = vadd.f32 %v8371_v58, %v2146_v61  ;;  %v8606_v52 = vsel %vm418_vm0, %v3543_v42, %v3544_v57 }
 0x319   : > { %v8609_v62 = vsel %vm418_vm0, 0.0, %v3543_v42  ;;  %v2218_v48 = vmax.f32 %v2186_v51, 0.0  ;;  %v3717_v40 = vrot.slane %v8606_v52, 1  ;;  %v3792_v5 = vrot.slane %v8606_v52, 2 }
 0x31a   : > { %v3716_v10 = vrot.slane %v8609_v62, 1  ;;  %v3791_v8 = vrot.slane %v8609_v62, 2  ;;  %v2217_v35 = vmax.f32 %v2185_v14, 0.0 }
 0x31b   : > { %v3474_v11 = vadd.f32 %v8343_v26, %v2218_v48  ;;  %v3720_v57 = vsel %vm584_vm1, %v3717_v40, %v3719_v3  ;;  %v3795_v61 = vsel %vm665_vm2, %v3792_v5, %v3794_v45 }
 0x31c   : > { %v5402_v27 = vpop.f32.mrb[20].mxu0  ;;  %v3718_v44 = vsel %vm584_vm1, %v3716_v10, %v3717_v40  ;;  %v3793_v12 = vsel %vm665_vm2, %v3791_v8, %v3792_v5  ;;  %v3473_v42 = vadd.f32 %v8345_v55, %v2217_v35 }
 0x31d   : > { %v3547_v37 = vrot.slane %v3474_v11, 7  ;;  %v2149_v51 = vmul.f32 %v5402_v27, %v8366_v31  ;;  %v2062_v43 = vpop.f32.mrb[21].mxu0  ;;  %v8622_v13 = vpack.i.bf16 %v3720_v57, %v3718_v44  ;;  %v8630_v55 = vpack.i.bf16 %v3795_v61, %v3793_v12 }
 0x31e   : > { %v2148_v26 = vmul.f32 %v8366_v31, %v2062_v43  ;;  %v3546_v48 = vrot.slane %v3473_v42, 7 }
 0x31f   : > { %10239 = vst [vmem:[#allocation48_spill] sm:$0xff] %v8622_v13  ;;  %v3639_v14 = vsel %vm418_vm0, %v3547_v37, 0.0  ;;  %v2188_v10 = vadd.f32 %v8371_v58, %v2149_v51  ;;  %5647 = vrot.lane.b32.xlu0 %v8622_v13, %s6253_s16 }
 0x320   : > { %v3724_v3 = vrot.slane %v3639_v14, 1  ;;  %v3799_v45 = vrot.slane %v3639_v14, 2  ;;  %v2187_v40 = vadd.f32 %v8371_v58, %v2148_v26  ;;  %v8633_v8 = vsel %vm418_vm0, %v3546_v48, %v3547_v37 }
 0x321   : > { %10240 = vst [vmem:[#allocation66_spill] sm:$0xff] %v8633_v8  ;;  %v8636_v5 = vsel %vm418_vm0, 0.0, %v3546_v48  ;;  %v2220_v43 = vmax.f32 %v2188_v10, 0.0  ;;  %v3722_v35 = vrot.slane %v8633_v8, 1  ;;  %v3797_v44 = vrot.slane %v8633_v8, 2 }
 0x322   : > { %v3721_v11 = vrot.slane %v8636_v5, 1  ;;  %v3796_v27 = vrot.slane %v8636_v5, 2  ;;  %v2219_v42 = vmax.f32 %v2187_v40, 0.0 }
 0x323   : > { %v3476_v57 = vadd.f32 %v8347_v6, %v2220_v43  ;;  %v3725_v61 = vsel %vm584_vm1, %v3722_v35, %v3724_v3  ;;  %v3800_v51 = vsel %vm665_vm2, %v3797_v44, %v3799_v45 }
 0x324   : > { %v3723_v12 = vsel %vm584_vm1, %v3721_v11, %v3722_v35  ;;  %v3798_v37 = vsel %vm665_vm2, %v3796_v27, %v3797_v44  ;;  %v3475_v14 = vadd.f32 %v8349_v9, %v2219_v42 }
 0x325   : > { %v3550_v26 = vrot.slane %v3476_v57, 7  ;;  %v8648_v48 = vpack.i.bf16 %v3725_v61, %v3723_v12  ;;  %v8650_v10 = vpack.i.bf16 %v3800_v51, %v3798_v37 }
 0x326   : > { %v3549_v8 = vrot.slane %v3475_v14, 7 }
 0x327   : > { %10241 = vst [vmem:[#allocation88_spill] sm:$0xff] %v8648_v48  ;;  %v3640_v13 = vsel %vm418_vm0, %v3550_v26, 0.0  ;;  %5652 = vrot.lane.b32.xlu1 %v8648_v48, %s6253_s16 }
 0x328   : > { %v3729_v6 = vrot.slane %v3640_v13, 1  ;;  %v3804_v40 = vrot.slane %v3640_v13, 2  ;;  %v5405_v3 = vpop.f32.mrb[22].mxu0  ;;  %v8656_v43 = vsel %vm418_vm0, %v3549_v8, %v3550_v26  ;;  %v8659_v45 = vsel %vm418_vm0, 0.0, %v3549_v8 }
 0x329   : > { %10242 = vst [vmem:[#allocation68_spill] sm:$0xff] %v8659_v45  ;;  %v2151_v9 = vmul.f32 %v5405_v3, %v8366_v31  ;;  %v2072_v11 = vpop.f32.mrb[23].mxu0  ;;  %v3726_v35 = vrot.slane %v8659_v45, 1  ;;  %v3727_v27 = vrot.slane %v8656_v43, 1  ;;  %v3801_v44 = vrot.slane %v8659_v45, 2 }
 0x32a   : > { %v3802_v57 = vrot.slane %v8656_v43, 2  ;;  %v2150_v42 = vmul.f32 %v8366_v31, %v2072_v11 }
 0x32b   : > { %v2190_v13 = vadd.f32 %v8371_v58, %v2151_v9  ;;  %v3728_v12 = vsel %vm584_vm1, %v3726_v35, %v3727_v27  ;;  %v3730_v8 = vsel %vm584_vm1, %v3727_v27, %v3729_v6 }
 0x32c   : > { %v3803_v61 = vsel %vm665_vm2, %v3801_v44, %v3802_v57  ;;  %v3805_v37 = vsel %vm665_vm2, %v3802_v57, %v3804_v40  ;;  %v2189_v51 = vadd.f32 %v8371_v58, %v2150_v42  ;;  %v8673_v14 = vpack.i.bf16 %v3730_v8, %v3728_v12 }
 0x32d   : > { %v2222_v26 = vmax.f32 %v2190_v13, 0.0  ;;  %v8675_v3 = vpack.i.bf16 %v3805_v37, %v3803_v61 }
 0x32e   : > { %5657 = vrot.lane.b32.xlu0 %v8673_v14, %s6253_s16  ;;  %v2221_v9 = vmax.f32 %v2189_v51, 0.0 }
 0x32f   : > { %v3478_v48 = vadd.f32 %v8351_v54, %v2222_v26 }
 0x330   : > { %v3477_v6 = vadd.f32 %v8353_v19, %v2221_v9 }
 0x331   : > { %v3553_v11 = vrot.slane %v3478_v48, 7 }
 0x332   : > { %v3552_v27 = vrot.slane %v3477_v6, 7 }
 0x333   : > { %v3641_v35 = vsel %vm418_vm0, %v3553_v11, 0.0 }
 0x334   : > { %v3734_v40 = vrot.slane %v3641_v35, 1  ;;  %v3809_v44 = vrot.slane %v3641_v35, 2  ;;  %v5408_v57 = vpop.f32.mrb[24].mxu0  ;;  %v8683_v13 = vsel %vm418_vm0, %v3552_v27, %v3553_v11  ;;  %v8686_v42 = vsel %vm418_vm0, 0.0, %v3552_v27 }
 0x335   : > { %10243 = vst [vmem:[#allocation46_spill] sm:$0xff] %v8683_v13  ;;  %10244 = vst [vmem:[#allocation108_spill] sm:$0xff] %v8686_v42  ;;  %v2153_v54 = vmul.f32 %v5408_v57, %v8366_v31  ;;  %v2082_v12 = vpop.f32.mrb[25].mxu0  ;;  %v3731_v8 = vrot.slane %v8686_v42, 1  ;;  %v3732_v48 = vrot.slane %v8683_v13, 1  ;;  %v3806_v19 = vrot.slane %v8686_v42, 2 }
 0x336   : > { %v3807_v61 = vrot.slane %v8683_v13, 2  ;;  %v2152_v51 = vmul.f32 %v8366_v31, %v2082_v12 }
 0x337   : > { %v2192_v37 = vadd.f32 %v8371_v58, %v2153_v54  ;;  %v3733_v26 = vsel %vm584_vm1, %v3731_v8, %v3732_v48  ;;  %v3735_v9 = vsel %vm584_vm1, %v3732_v48, %v3734_v40 }
 0x338   : > { %v3808_v11 = vsel %vm665_vm2, %v3806_v19, %v3807_v61  ;;  %v3810_v6 = vsel %vm665_vm2, %v3807_v61, %v3809_v44  ;;  %v2191_v35 = vadd.f32 %v8371_v58, %v2152_v51  ;;  %v8700_v57 = vpack.i.bf16 %v3735_v9, %v3733_v26 }
 0x339   : > { %v2224_v27 = vmax.f32 %v2192_v37, 0.0  ;;  %v8702_v42 = vpack.i.bf16 %v3810_v6, %v3808_v11 }
 0x33a   : > { %5662 = vrot.lane.b32.xlu1 %v8700_v57, %s6253_s16  ;;  %v2223_v54 = vmax.f32 %v2191_v35, 0.0 }
 0x33b   : > { %v3480_v13 = vadd.f32 %v8355_v50, %v2224_v27 }
 0x33c   : > { %v3479_v40 = vadd.f32 %v8357_v18, %v2223_v54 }
 0x33d   : > { %v3556_v12 = vrot.slane %v3480_v13, 7 }
 0x33e   : > { %v3555_v48 = vrot.slane %v3479_v40, 7 }
 0x33f   : > { %v3642_v8 = vsel %vm418_vm0, %v3556_v12, 0.0 }
 0x340   : > { %v3739_v44 = vrot.slane %v3642_v8, 1  ;;  %v3814_v19 = vrot.slane %v3642_v8, 2  ;;  %v5411_v61 = vpop.f32.mrb[26].mxu0  ;;  %v8710_v37 = vsel %vm418_vm0, %v3555_v48, %v3556_v12  ;;  %v8713_v51 = vsel %vm418_vm0, 0.0, %v3555_v48 }
 0x341   : > { %10245 = vst [vmem:[#allocation55_spill] sm:$0xff] %v8710_v37  ;;  %10246 = vst [vmem:[#allocation45_spill] sm:$0xff] %v8713_v51  ;;  %v2155_v50 = vmul.f32 %v5411_v61, %v8366_v31  ;;  %v2092_v26 = vpop.f32.mrb[27].mxu0  ;;  %v3736_v9 = vrot.slane %v8713_v51, 1  ;;  %v3737_v13 = vrot.slane %v8710_v37, 1  ;;  %v3811_v18 = vrot.slane %v8713_v51, 2 }
 0x342   : > { %v3812_v11 = vrot.slane %v8710_v37, 2  ;;  %v2154_v35 = vmul.f32 %v8366_v31, %v2092_v26 }
 0x343   : > { %v2194_v6 = vadd.f32 %v8371_v58, %v2155_v50  ;;  %v3738_v27 = vsel %vm584_vm1, %v3736_v9, %v3737_v13  ;;  %v3740_v54 = vsel %vm584_vm1, %v3737_v13, %v3739_v44 }
 0x344   : > { %v3813_v12 = vsel %vm665_vm2, %v3811_v18, %v3812_v11  ;;  %v3815_v40 = vsel %vm665_vm2, %v3812_v11, %v3814_v19  ;;  %v2193_v8 = vadd.f32 %v8371_v58, %v2154_v35  ;;  %v8727_v61 = vpack.i.bf16 %v3740_v54, %v3738_v27 }
 0x345   : > { %v2226_v48 = vmax.f32 %v2194_v6, 0.0  ;;  %v8729_v51 = vpack.i.bf16 %v3815_v40, %v3813_v12 }
 0x346   : > { %5667 = vrot.lane.b32.xlu0 %v8727_v61, %s6253_s16  ;;  %v2225_v50 = vmax.f32 %v2193_v8, 0.0 }
 0x347   : > { %v3482_v37 = vadd.f32 %v8359_v47, %v2226_v48 }
 0x348   : > { %v3481_v44 = vadd.f32 %v8361_v33, %v2225_v50 }
 0x349   : > { %v3559_v26 = vrot.slane %v3482_v37, 7 }
 0x34a   : > { %v3558_v13 = vrot.slane %v3481_v44, 7 }
 0x34b   : > { %v3643_v9 = vsel %vm418_vm0, %v3559_v26, 0.0 }
 0x34c   : > { %v3744_v19 = vrot.slane %v3643_v9, 1  ;;  %v3819_v18 = vrot.slane %v3643_v9, 2  ;;  %v5414_v11 = vpop.f32.mrb[28].mxu0  ;;  %v8737_v6 = vsel %vm418_vm0, %v3558_v13, %v3559_v26  ;;  %v8740_v35 = vsel %vm418_vm0, 0.0, %v3558_v13 }
 0x34d   : > { %10247 = vst [vmem:[#allocation49_spill] sm:$0xff] %v8737_v6  ;;  %10248 = vst [vmem:[#allocation109_spill] sm:$0xff] %v8740_v35  ;;  %v2157_v47 = vmul.f32 %v5414_v11, %v8366_v31  ;;  %v2102_v27 = vpop.f32.mrb[29].mxu0  ;;  %v3741_v54 = vrot.slane %v8740_v35, 1  ;;  %v3742_v37 = vrot.slane %v8737_v6, 1  ;;  %v3816_v33 = vrot.slane %v8740_v35, 2 }
 0x34e   : > { %v3817_v12 = vrot.slane %v8737_v6, 2  ;;  %v2156_v8 = vmul.f32 %v8366_v31, %v2102_v27 }
 0x34f   : > { %v2196_v40 = vadd.f32 %v8371_v58, %v2157_v47  ;;  %v3743_v48 = vsel %vm584_vm1, %v3741_v54, %v3742_v37  ;;  %v3745_v50 = vsel %vm584_vm1, %v3742_v37, %v3744_v19 }
 0x350   : > { %v3818_v26 = vsel %vm665_vm2, %v3816_v33, %v3817_v12  ;;  %v3820_v44 = vsel %vm665_vm2, %v3817_v12, %v3819_v18  ;;  %v2195_v9 = vadd.f32 %v8371_v58, %v2156_v8  ;;  %v8754_v11 = vpack.i.bf16 %v3745_v50, %v3743_v48 }
 0x351   : > { %v2228_v13 = vmax.f32 %v2196_v40, 0.0  ;;  %v8759_v47 = vpack.i.bf16 %v3820_v44, %v3818_v26  ;;  %v3751_v33 = vrot.slane %v8394_v41, 2  ;;  %v3752_v40 = vrot.slane %v8391_v15, 2 }
 0x352   : > { %v2227_v6 = vmax.f32 %v2195_v9, 0.0  ;;  %5672 = vrot.lane.b32.xlu1 %v8754_v11, %s6253_s16 }
 0x353   : > { %v3484_v35 = vadd.f32 %v8378_v4, %v2228_v13 }
 0x354   : > { %v5417_v27 = vpop.f32.mrb[30].mxu0  ;;  %v3483_v19 = vadd.f32 %v8381_v39, %v2227_v6 }
 0x355   : > { %v3562_v54 = vrot.slane %v3484_v35, 7  ;;  %v2159_v37 = vmul.f32 %v5417_v27, %v8366_v31  ;;  %v2112_v18 = vpop.f32.mrb[31].mxu0  ;;  %v3754_v35 = vrot.slane %v8386_v17, 2 }
 0x356   : > { %v2158_v12 = vmul.f32 %v8366_v31, %v2112_v18  ;;  %v3561_v8 = vrot.slane %v3483_v19, 7  ;;  %5682 = vrot.lane.b32.xlu1 %v10169_v59, %s6255_s18 }
 0x357   : > { %v3644_v4 = vsel %vm418_vm0, %v3562_v54, 0.0  ;;  %v2198_v48 = vadd.f32 %v8371_v58, %v2159_v37 }
 0x358   : > { %v3749_v39 = vrot.slane %v3644_v4, 1  ;;  %v2197_v6 = vadd.f32 %v8371_v58, %v2158_v12  ;;  %v3824_v50 = vrot.slane %v3644_v4, 2  ;;  %v8773_v26 = vsel %vm418_vm0, %v3561_v8, %v3562_v54 }
 0x359   : > { %10249 = vst [vmem:[#allocation56_spill] sm:$0xff] %v8773_v26  ;;  %v8776_v31 = vsel %vm418_vm0, 0.0, %v3561_v8  ;;  %v2230_v44 = vmax.f32 %v2198_v48, 0.0  ;;  %v3747_v13 = vrot.slane %v8773_v26, 1  ;;  %v3822_v19 = vrot.slane %v8773_v26, 2 }
 0x35a   : > { %10250 = vst [vmem:[#allocation71_spill] sm:$0xff] %v8776_v31  ;;  %v3746_v9 = vrot.slane %v8776_v31, 1  ;;  %v3821_v27 = vrot.slane %v8776_v31, 2  ;;  %5692 = vrot.lane.b32.xlu1 %v8459_v20, %s6255_s18  ;;  %v2229_v58 = vmax.f32 %v2197_v6, 0.0  ;;  %v3753_v54 = vsel %vm665_vm2, %v3751_v33, %v3752_v40 }
 0x35b   : > { %v3486_v17 = vadd.f32 %v8405_v46, %v2230_v44  ;;  %v3750_v18 = vsel %vm584_vm1, %v3747_v13, %v3749_v39  ;;  %v3755_v12 = vsel %vm665_vm2, %v3752_v40, %v3754_v35  ;;  %v3825_v46 = vsel %vm665_vm2, %v3822_v19, %v3824_v50 }
 0x35c   : > { %v3748_v37 = vsel %vm584_vm1, %v3746_v9, %v3747_v13  ;;  %v3485_v8 = vadd.f32 %v8413_v16, %v2229_v58  ;;  %v3823_v59 = vsel %vm665_vm2, %v3821_v27, %v3822_v19  ;;  %v5686_v40 = vpack.i.bf16 %v3755_v12, %v3753_v54 }
 0x35d   : > { %v3565_v4 = vrot.slane %v3486_v17, 7  ;;  %v8790_v48 = vpack.i.bf16 %v3750_v18, %v3748_v37  ;;  %v8799_v33 = vpack.i.bf16 %v3825_v46, %v3823_v59  ;;  %v8844_v46 = vpack.i.bf16 %v8496_v38, %v8499_v24  ;;  %v10270_v24 = vld [vmem:[#allocation55_spill] sm:$0xff] }
 0x35e   : > { %v3564_v6 = vrot.slane %v3485_v8, 7  ;;  %5702 = vrot.lane.b32.xlu1 %v8506_v28, %s6255_s18  ;;  %v5771_v8 = vpack.i.bf16 %v8438_v49, %v8441_v36 }
 0x35f   : > { %v3645_v44 = vsel %vm418_vm0, %v3565_v4, 0.0  ;;  %5677 = vrot.lane.b32.xlu0 %v8790_v48, %s6253_s16  ;;  %s6260_s16 = smov 40  }
 0x360   : > { %v3831_v35 = vrot.slane %v3645_v44, 1  ;;  %v3836_v16 = vrot.slane %v3645_v44, 2  ;;  %v3566_v39 = vsel %vm418_vm0, %v3564_v6, %v3565_v4  ;;  %v3629_v9 = vsel %vm418_vm0, 0.0, %v3564_v6 }
 0x361   : > { %v3828_v13 = vrot.slane %v3629_v9, 1  ;;  %v3833_v50 = vrot.slane %v3629_v9, 2  ;;  %v8803_v27 = vpack.i.bf16 %v3566_v39, %v3629_v9  ;;  %v3829_v19 = vrot.slane %v3566_v39, 1 }
 0x362   : > { %v3834_v17 = vrot.slane %v3566_v39, 2  ;;  %5712 = vrot.lane.b32.xlu1 %v8549_v53, %s6255_s18  ;;  %v5761_v4 = vpack.i.bf16 %v8391_v15, %v8394_v41  ;;  %v8852_v44 = vpack.i.bf16 %v8552_v32, %v8555_v21  ;;  %v5766_v6 = vpack.i.bf16 %v8417_v30, %v8420_v60  ;;  %v10264_v21 = vld [vmem:[#allocation108_spill] sm:$0xff]  ;;  %v10265_v32 = vld [vmem:[#allocation46_spill] sm:$0xff] }
 0x363   : > { %5687 = vrot.lane.b32.xlu0 %v5686_v40, %s6255_s18  ;;  %v3830_v59 = vsel %vm584_vm1, %v3828_v13, %v3829_v19  ;;  %v3832_v58 = vsel %vm584_vm1, %v3829_v19, %v3831_v35  ;;  %v8861_v35 = vpack.i.bf16 %v8606_v52, %v8609_v62  ;;  %v5811_v39 = vpack.i.bf16 %v8656_v43, %v8659_v45 }
 0x364   : > { %v8810_v54 = vpack.i.bf16 %v3832_v58, %v3830_v59  ;;  %v3835_v37 = vsel %vm665_vm2, %v3833_v50, %v3834_v17  ;;  %v3837_v18 = vsel %vm665_vm2, %v3834_v17, %v3836_v16  ;;  %v5776_v16 = vpack.i.bf16 %v8467_v63, %v8470_v56  ;;  %v10251_v50 = vld [vmem:[#allocation66_spill] sm:$0xff]  ;;  %v10252_v17 = vld [vmem:[#allocation48_spill] sm:$0xff]  ;;  %v8903_v59 = vpop.permute.xlu1 %5602  ;;  %v10289_v63 = vld [vmem:[#allocation3_spill] sm:$0xff] }
 0x365   : > { %v8818_v12 = vpack.i.bf16 %v3837_v18, %v3835_v37  ;;  %v8872_v9 = vpack.i.bf16 %v8523_v34, %v8526_v22  ;;  %v8879_v13 = vpack.i.bf16 %v8579_v1, %v8582_v23  ;;  %v5806_v19 = vpack.i.bf16 %v10251_v50, %v8636_v5  ;;  %v10255_v37 = vld [vmem:[#allocation33_spill] sm:$0xff] }
 0x366   : > { %5722 = vrot.lane.b32.xlu1 %v8598_v29, %s6255_s18  ;;  %vm4833_vm0 = vcmask 523264   ;;  %vm4867_vm1 = vcmask 588800  }
 0x367   : > { %5697 = vrot.lane.b32.xlu0 %v8486_v25, %s6255_s18  ;;  %vm9173_vm2 = vmpackc.low %vm4867_vm1, %vm4867_vm1 }
 0x368   : > { %v8912_v58 = vpop.permute.xlu1 %5612 }
 0x36a   : > { %5732 = vrot.lane.b32.xlu1 %v8650_v10, %s6255_s18 }
 0x36b   : > { %5707 = vrot.lane.b32.xlu0 %v8533_v0, %s6255_s18 }
 0x36c   : > { %v8918_v18 = vpop.permute.xlu1 %5622 }
 0x36d   : > { %10256 = vst [vmem:[#allocation6_spill] sm:$0xff] %v8918_v18 }
 0x36e   : > { %5742 = vrot.lane.b32.xlu1 %v8702_v42, %s6255_s18 }
 0x36f   : > { %5717 = vrot.lane.b32.xlu0 %v8576_v7, %s6255_s18 }
 0x372   : > { %5752 = vrot.lane.b32.xlu1 %v8759_v47, %s6255_s18 }
 0x373   : > { %5727 = vrot.lane.b32.xlu0 %v8630_v55, %s6255_s18 }
 0x376   : > { %5762 = vrot.lane.b32.xlu1 %v5761_v4, %s6257_s20 }
 0x377   : > { %5737 = vrot.lane.b32.xlu0 %v8675_v3, %s6255_s18 }
 0x379   : > { %v8925_v4 = vpop.permute.xlu1 %5632 }
 0x37a   : > { %5772 = vrot.lane.b32.xlu1 %v5771_v8, %s6257_s20  ;;  %10257 = vst [vmem:[#allocation11_spill] sm:$0xff] %v8925_v4  ;;  %v10269_v4 = vld [vmem:[#allocation45_spill] sm:$0xff] }
 0x37b   : > { %5747 = vrot.lane.b32.xlu0 %v8729_v51, %s6255_s18  ;;  %v5991_v38 = vpack.i.bf16 %v10270_v24, %v10269_v4  ;;  %v10276_v24 = vld [vmem:[#allocation39_spill] sm:$0xff] }
 0x37e   : > { %5782 = vrot.lane.b32.xlu1 %v8844_v46, %s6257_s20 }
 0x37f   : > { %5757 = vrot.lane.b32.xlu0 %v8799_v33, %s6255_s18  ;;  %s6261_s18 = smov 48  }
 0x382   : > { %5792 = vrot.lane.b32.xlu1 %v8852_v44, %s6257_s20 }
 0x383   : > { %5767 = vrot.lane.b32.xlu0 %v5766_v6, %s6257_s20 }
 0x386   : > { %5802 = vrot.lane.b32.xlu1 %v8861_v35, %s6257_s20 }
 0x387   : > { %5777 = vrot.lane.b32.xlu0 %v5776_v16, %s6257_s20 }
 0x38a   : > { %5812 = vrot.lane.b32.xlu1 %v5811_v39, %s6257_s20 }
 0x38b   : > { %5787 = vrot.lane.b32.xlu0 %v8872_v9, %s6257_s20 }
 0x38e   : > { %5822 = vrot.lane.b32.xlu1 %v8403_v2, %s6259_s24  ;;  %v10253_v2 = vld [vmem:[#allocation30_spill] sm:$0xff] }
 0x38f   : > { %5797 = vrot.lane.b32.xlu0 %v8879_v13, %s6257_s20 }
 0x392   : > { %5832 = vrot.lane.b32.xlu1 %v5686_v40, %s6260_s16  ;;  %v10254_v40 = vld [vmem:[#allocation88_spill] sm:$0xff] }
 0x393   : > { %5807 = vrot.lane.b32.xlu0 %v5806_v19, %s6257_s20 }
 0x396   : > { %5842 = vrot.lane.b32.xlu1 %v5766_v6, %s6261_s18 }
 0x397   : > { %5817 = vrot.lane.b32.xlu0 %v10252_v17, %s6259_s24 }
 0x39a   : > { %5852 = vrot.lane.b32.xlu1 %v10253_v2, %s6262_s29 }
 0x39b   : > { %5827 = vrot.lane.b32.xlu0 %v8630_v55, %s6260_s16 }
 0x39e   : > { %5862 = vrot.lane.b32.xlu1 %v8459_v20, %s6263_s11 }
 0x39f   : > { %5837 = vrot.lane.b32.xlu0 %v5806_v19, %s6261_s18 }
 0x3a2   : > { %5872 = vrot.lane.b32.xlu1 %v10253_v2, %s6259_s24 }
 0x3a3   : > { %5847 = vrot.lane.b32.xlu0 %v10254_v40, %s6262_s29 }
 0x3a6   : > { %5882 = vrot.lane.b32.xlu1 %v8459_v20, %s6260_s16  ;;  %v8923_v20 = vpop.permute.xlu0 %5607 }
 0x3a7   : > { %5857 = vrot.lane.b32.xlu0 %v8650_v10, %s6263_s11 }
 0x3aa   : > { %5892 = vrot.lane.b32.xlu1 %v5771_v8, %s6261_s18  ;;  %v8931_v8 = vpop.permute.xlu0 %5617 }
 0x3ab   : > { %5867 = vrot.lane.b32.xlu0 %v10254_v40, %s6259_s24  ;;  %10258 = vst [vmem:[#allocation50_spill] sm:$0xff] %v8931_v8  ;;  %v10262_v40 = vld [vmem:[#allocation36_spill] sm:$0xff] }
 0x3ae   : > { %5902 = vrot.lane.b32.xlu1 %v10255_v37, %s6262_s29  ;;  %v8939_v6 = vpop.permute.xlu0 %5627 }
 0x3af   : > { %5877 = vrot.lane.b32.xlu0 %v8650_v10, %s6260_s16  ;;  %v8933_v10 = vpop.permute.xlu1 %5642  ;;  %10259 = vst [vmem:[#allocation69_spill] sm:$0xff] %v8939_v6 }
 0x3b2   : > { %5912 = vrot.lane.b32.xlu1 %v8486_v25, %s6263_s11  ;;  %v8946_v19 = vpop.permute.xlu0 %5637 }
 0x3b3   : > { %5887 = vrot.lane.b32.xlu0 %v5811_v39, %s6261_s18  ;;  %v8941_v39 = vpop.permute.xlu1 %5652  ;;  %10260 = vst [vmem:[#allocation89_spill] sm:$0xff] %v8946_v19 }
 0x3b6   : > { %5922 = vrot.lane.b32.xlu1 %v10255_v37, %s6259_s24 }
 0x3b7   : > { %5897 = vrot.lane.b32.xlu0 %v8673_v14, %s6262_s29  ;;  %v8948_v2 = vpop.permute.xlu1 %5662 }
 0x3b8   : > { %10261 = vst [vmem:[#allocation110_spill] sm:$0xff] %v8948_v2 }
 0x3ba   : > { %5932 = vrot.lane.b32.xlu1 %v8486_v25, %s6260_s16  ;;  %v8954_v25 = vpop.permute.xlu0 %5647 }
 0x3bb   : > { %5907 = vrot.lane.b32.xlu0 %v8675_v3, %s6263_s11 }
 0x3be   : > { %5942 = vrot.lane.b32.xlu1 %v5776_v16, %s6261_s18  ;;  %v5936_v16 = vpack.i.bf16 %v10265_v32, %v10264_v21  ;;  %v10282_v21 = vld [vmem:[#allocation109_spill] sm:$0xff] }
 0x3bf   : > { %5917 = vrot.lane.b32.xlu0 %v8673_v14, %s6259_s24  ;;  %v8963_v14 = vpop.permute.xlu0 %5657  ;;  %v10283_v32 = vld [vmem:[#allocation49_spill] sm:$0xff] }
 0x3c2   : > { %5952 = vrot.lane.b32.xlu1 %v10262_v40, %s6262_s29 }
 0x3c3   : > { %5927 = vrot.lane.b32.xlu0 %v8675_v3, %s6260_s16  ;;  %v8971_v3 = vpop.permute.xlu0 %5667 }
 0x3c4   : > { %v8956_v37 = vpop.permute.xlu1 %5672  ;;  %10266 = vst [vmem:[#allocation70_spill] sm:$0xff] %v8971_v3 }
 0x3c5   : > { %10263 = vst [vmem:[#allocation57_spill] sm:$0xff] %v8956_v37 }
 0x3c6   : > { %5962 = vrot.lane.b32.xlu1 %v8506_v28, %s6263_s11 }
 0x3c7   : > { %5937 = vrot.lane.b32.xlu0 %v5936_v16, %s6261_s18 }
 0x3c8   : > { %v8965_v19 = vpop.permute.xlu1 %5682 }
 0x3c9   : > { %v5684_v2 = vunpack.i.l.bf16 %v8965_v19 }
 0x3ca   : > { %5972 = vrot.lane.b32.xlu1 %v8700_v57, %s6259_s24 }
 0x3cb   : > { %5947 = vrot.lane.b32.xlu0 %v8700_v57, %s6262_s29 }
 0x3cc   : > { %v8973_v22 = vpop.permute.xlu1 %5692 }
 0x3ce   : > { %5982 = vrot.lane.b32.xlu1 %v8702_v42, %s6260_s16 }
 0x3cf   : > { %5957 = vrot.lane.b32.xlu0 %v8702_v42, %s6263_s11 }
 0x3d0   : > { %v8979_v34 = vpop.permute.xlu1 %5702 }
 0x3d1   : > { %10267 = vst [vmem:[#allocation5_spill] sm:$0xff] %v8979_v34  ;;  %v8981_v37 = vpop.permute.xlu0 %5677  ;;  %v5644_v34 = vunpack.i.l.bf16 %v8933_v10 }
 0x3d2   : > { %10268 = vst [vmem:[#allocation12_spill] sm:$0xff] %v8981_v37  ;;  %5992 = vrot.lane.b32.xlu1 %v5991_v38, %s6261_s18 }
 0x3d3   : > { %5967 = vrot.lane.b32.xlu0 %v5936_v16, %s6257_s20 }
 0x3d4   : > { %v8987_v57 = vpop.permute.xlu1 %5712 }
 0x3d5   : > { %10271 = vst [vmem:[#allocation72_spill] sm:$0xff] %v8987_v57  ;;  %v8989_v6 = vpop.permute.xlu0 %5687 }
 0x3d6   : > { %6002 = vrot.lane.b32.xlu1 %v8727_v61, %s6262_s29 }
 0x3d7   : > { %5977 = vrot.lane.b32.xlu0 %v10262_v40, %s6259_s24 }
 0x3d8   : > { %v8995_v42 = vpop.permute.xlu1 %5722 }
 0x3d9   : > { %v8997_v37 = vpop.permute.xlu0 %5697  ;;  %v5725_v18 = vunpack.i.h.bf16 %v8995_v42  ;;  %v5724_v49 = vunpack.i.l.bf16 %v8995_v42  ;;  %v4622_v42 = vsel %vm1559_vm4, %v8582_v23, %v5644_v34 }
 0x3da   : > { %10272 = vst [vmem:[#allocation90_spill] sm:$0xff] %v8997_v37  ;;  %6012 = vrot.lane.b32.xlu1 %v8729_v51, %s6263_s11 }
 0x3db   : > { %5987 = vrot.lane.b32.xlu0 %v8506_v28, %s6260_s16  ;;  %v4654_v8 = vsel %vm1625_vm7, %v4622_v42, %v5724_v49 }
 0x3dc   : > { %v9003_v16 = vpop.permute.xlu1 %5732 }
 0x3dd   : > { %v9005_v57 = vpop.permute.xlu0 %5707 }
 0x3de   : > { %10273 = vst [vmem:[#allocation91_spill] sm:$0xff] %v9005_v57  ;;  %6022 = vrot.lane.b32.xlu1 %v5991_v38, %s6257_s20 }
 0x3df   : > { %5997 = vrot.lane.b32.xlu0 %v8844_v46, %s6261_s18 }
 0x3e0   : > { %v9010_v40 = vpop.permute.xlu1 %5742 }
 0x3e1   : > { %10274 = vst [vmem:[#allocation112_spill] sm:$0xff] %v9010_v40  ;;  %v9012_v4 = vpop.permute.xlu0 %5717 }
 0x3e2   : > { %10275 = vst [vmem:[#allocation59_spill] sm:$0xff] %v9012_v4  ;;  %6032 = vrot.lane.b32.xlu1 %v10276_v24, %s6259_s24 }
 0x3e3   : > { %6007 = vrot.lane.b32.xlu0 %v10276_v24, %s6262_s29 }
 0x3e4   : > { %v9018_v28 = vpop.permute.xlu1 %5752 }
 0x3e5   : > { %10277 = vst [vmem:[#allocation73_spill] sm:$0xff] %v9018_v28  ;;  %v9020_v3 = vpop.permute.xlu0 %5727  ;;  %v10279_v28 = vld [vmem:[#allocation43_spill] sm:$0xff] }
 0x3e6   : > { %6042 = vrot.lane.b32.xlu1 %v8533_v0, %s6260_s16 }
 0x3e7   : > { %6017 = vrot.lane.b32.xlu0 %v8533_v0, %s6263_s11 }
 0x3e8   : > { %v9026_v38 = vpop.permute.xlu1 %5762 }
 0x3e9   : > { %v9028_v46 = vpop.permute.xlu0 %5737 }
 0x3ea   : > { %6052 = vrot.lane.b32.xlu1 %v8872_v9, %s6261_s18  ;;  %v6046_v9 = vpack.i.bf16 %v10283_v32, %v10282_v21  ;;  %v6101_v32 = vpack.i.bf16 %v8773_v26, %v8776_v31 }
 0x3eb   : > { %6027 = vrot.lane.b32.xlu0 %v8727_v61, %s6259_s24 }
 0x3ec   : > { %v9034_v24 = vpop.permute.xlu1 %5772 }
 0x3ed   : > { %v9036_v4 = vpop.permute.xlu0 %5747 }
 0x3ee   : > { %10278 = vst [vmem:[#allocation7_spill] sm:$0xff] %v9036_v4  ;;  %6062 = vrot.lane.b32.xlu1 %v10279_v28, %s6262_s29 }
 0x3ef   : > { %6037 = vrot.lane.b32.xlu0 %v8729_v51, %s6260_s16 }
 0x3f0   : > { %v9042_v0 = vpop.permute.xlu1 %5782 }
 0x3f1   : > { %10280 = vst [vmem:[#allocation93_spill] sm:$0xff] %v9042_v0  ;;  %v9044_v57 = vpop.permute.xlu0 %5757 }
 0x3f2   : > { %10281 = vst [vmem:[#allocation111_spill] sm:$0xff] %v9044_v57  ;;  %6072 = vrot.lane.b32.xlu1 %v8549_v53, %s6263_s11 }
 0x3f3   : > { %6047 = vrot.lane.b32.xlu0 %v6046_v9, %s6261_s18 }
 0x3f4   : > { %v9051_v61 = vpop.permute.xlu1 %5792 }
 0x3f5   : > { %10284 = vst [vmem:[#allocation92_spill] sm:$0xff] %v9051_v61  ;;  %v9053_v4 = vpop.permute.xlu0 %5767 }
 0x3f6   : > { %6082 = vrot.lane.b32.xlu1 %v8754_v11, %s6259_s24 }
 0x3f7   : > { %6057 = vrot.lane.b32.xlu0 %v8754_v11, %s6262_s29 }
 0x3f8   : > { %v5803_v51 = vpop.permute.xlu1 %5802 }
 0x3f9   : > { %v9059_v57 = vpop.permute.xlu0 %5777 }
 0x3fa   : > { %10285 = vst [vmem:[#allocation113_spill] sm:$0xff] %v9059_v57  ;;  %6092 = vrot.lane.b32.xlu1 %v8759_v47, %s6260_s16 }
 0x3fb   : > { %6067 = vrot.lane.b32.xlu0 %v8759_v47, %s6263_s11 }
 0x3fc   : > { %v9065_v21 = vpop.permute.xlu1 %5812 }
 0x3fd   : > { %v9067_v61 = vpop.permute.xlu0 %5787 }
 0x3fe   : > { %10286 = vst [vmem:[#allocation60_spill] sm:$0xff] %v9067_v61  ;;  %6102 = vrot.lane.b32.xlu1 %v6101_v32, %s6261_s18  ;;  %v10288_v61 = vld [vmem:[#allocation2_spill] sm:$0xff] }
 0x3ff   : > { %6077 = vrot.lane.b32.xlu0 %v6046_v9, %s6257_s20  ;;  %v5605_v9 = vunpack.i.h.bf16 %v8903_v59 }
 0x400   : > { %v5823_v11 = vpop.permute.xlu1 %5822 }
 0x401   : > { %v9073_v0 = vpop.permute.xlu0 %5797  ;;  %v4607_v56 = vsel %vm1559_vm4, %v10288_v61, %v5605_v9  ;;  %v5804_v61 = vunpack.i.l.bf16 %v5803_v51  ;;  %v5825_v9 = vunpack.i.h.bf16 %v5823_v11  ;;  %v5824_v57 = vunpack.i.l.bf16 %v5823_v11 }
 0x402   : > { %10287 = vst [vmem:[#allocation74_spill] sm:$0xff] %v9073_v0  ;;  %6112 = vrot.lane.b32.xlu1 %v8790_v48, %s6262_s29  ;;  %v5604_v0 = vunpack.i.l.bf16 %v8903_v59  ;;  %v5685_v59 = vunpack.i.h.bf16 %v8965_v19  ;;  %v10290_v19 = vld [vmem:[#allocation47_spill] sm:$0xff] }
 0x403   : > { %6087 = vrot.lane.b32.xlu0 %v10279_v28, %s6259_s24  ;;  %v5645_v28 = vunpack.i.h.bf16 %v8933_v10  ;;  %v5765_v10 = vunpack.i.h.bf16 %v9026_v38 }
 0x404   : > { %v9079_v47 = vpop.permute.xlu1 %5832  ;;  %v4639_v37 = vsel %vm1625_vm7, %v4607_v56, %v5685_v59  ;;  %v4686_v56 = vsel %vm1691_vm9, %v4654_v8, %v5804_v61 }
 0x405   : > { %v9081_v40 = vpop.permute.xlu0 %5807  ;;  %v5835_v45 = vunpack.i.h.bf16 %v9079_v47  ;;  %v5834_v34 = vunpack.i.l.bf16 %v9079_v47  ;;  %v4671_v23 = vsel %vm1691_vm9, %v4639_v37, %v5765_v10 }
 0x406   : > { %6122 = vrot.lane.b32.xlu1 %v8799_v33, %s6263_s11  ;;  %v4703_v11 = vsel %vm1757_vm11, %v4671_v23, %v5825_v9 }
 0x407   : > { %6097 = vrot.lane.b32.xlu0 %v8549_v53, %s6260_s16  ;;  %v4606_v53 = vsel %vm1559_vm4, %v10289_v63, %v5604_v0  ;;  %v4623_v63 = vsel %vm1559_vm4, %v8579_v1, %v5645_v28  ;;  %v5805_v0 = vunpack.i.h.bf16 %v5803_v51 }
 0x408   : > { %v9089_v26 = vpop.permute.xlu1 %5842  ;;  %v4638_v1 = vsel %vm1625_vm7, %v4606_v53, %v5684_v2 }
 0x409   : > { %v9091_v31 = vpop.permute.xlu0 %5817  ;;  %v5845_v8 = vunpack.i.h.bf16 %v9089_v26 }
 0x40a   : > { %6132 = vrot.lane.b32.xlu1 %v6101_v32, %s6257_s20  ;;  %v5820_v47 = vunpack.i.h.bf16 %v9091_v31  ;;  %v5819_v37 = vunpack.i.l.bf16 %v9091_v31 }
 0x40b   : > { %6107 = vrot.lane.b32.xlu0 %v8852_v44, %s6261_s18  ;;  %v5764_v44 = vunpack.i.l.bf16 %v9026_v38  ;;  %v4655_v38 = vsel %vm1625_vm7, %v4623_v63, %v5725_v18  ;;  %v5844_v18 = vunpack.i.l.bf16 %v9089_v26 }
 0x40c   : > { %v9105_v36 = vpop.permute.xlu1 %5852  ;;  %v4687_v2 = vsel %vm1691_vm9, %v4655_v38, %v5805_v0 }
 0x40d   : > { %v5828_v32 = vpop.permute.xlu0 %5827  ;;  %v5854_v53 = vunpack.i.l.bf16 %v9105_v36  ;;  %v5855_v9 = vunpack.i.h.bf16 %v9105_v36  ;;  %v4719_v26 = vsel %vm1757_vm11, %v4687_v2, %v5820_v47 }
 0x40e   : > { %6142 = vrot.lane.b32.xlu1 %v10290_v19, %s6259_s24  ;;  %v5830_v59 = vunpack.i.h.bf16 %v5828_v32 }
 0x40f   : > { %6117 = vrot.lane.b32.xlu0 %v10290_v19, %s6262_s29  ;;  %v4670_v19 = vsel %vm1691_vm9, %v4638_v1, %v5764_v44  ;;  %v5829_v44 = vunpack.i.l.bf16 %v5828_v32  ;;  %v4718_v32 = vsel %vm1757_vm11, %v4686_v56, %v5819_v37  ;;  %v5610_v56 = vunpack.i.h.bf16 %v8923_v20  ;;  %v10291_v37 = vld [vmem:[#allocation67_spill] sm:$0xff] }
 0x410   : > { %v5863_v51 = vpop.permute.xlu1 %5862  ;;  %v4702_v49 = vsel %vm1757_vm11, %v4670_v19, %v5824_v57 }
 0x411   : > { %v5838_v28 = vpop.permute.xlu0 %5837  ;;  %v4735_v0 = vsel %vm4734_vm13, %v4702_v49, %v5834_v34  ;;  %v5865_v38 = vunpack.i.h.bf16 %v5863_v51  ;;  %v4751_v36 = vsel %vm4734_vm13, %v4718_v32, %v5829_v44  ;;  %v4752_v34 = vsel %vm4734_vm13, %v4719_v26, %v5830_v59 }
 0x412   : > { %6152 = vrot.lane.b32.xlu1 %v8576_v7, %s6260_s16  ;;  %v5840_v57 = vunpack.i.h.bf16 %v5838_v28  ;;  %v5839_v61 = vunpack.i.l.bf16 %v5838_v28  ;;  %v4768_v42 = vsel %vm4767_vm14, %v4735_v0, %v5844_v18  ;;  %v5609_v0 = vunpack.i.l.bf16 %v8923_v20 }
 0x413   : > { %6127 = vrot.lane.b32.xlu0 %v8576_v7, %s6263_s11  ;;  %v4736_v7 = vsel %vm4734_vm13, %v4703_v11, %v5835_v45  ;;  %v5864_v45 = vunpack.i.l.bf16 %v5863_v51  ;;  %v4801_v19 = vsel %vm4800_vm15, %v4768_v42, %v5854_v53  ;;  %v5690_v26 = vunpack.i.h.bf16 %v8989_v6 }
 0x414   : > { %v9139_v63 = vpop.permute.xlu1 %5872  ;;  %v4769_v28 = vsel %vm4767_vm14, %v4736_v7, %v5845_v8  ;;  %v4784_v18 = vsel %vm4767_vm14, %v4751_v36, %v5839_v61  ;;  %v5650_v61 = vunpack.i.h.bf16 %v8954_v25  ;;  %v4608_v20 = vsel %vm1559_vm4, %v8394_v41, %v5609_v0 }
 0x415   : > { %v5848_v10 = vpop.permute.xlu0 %5847  ;;  %v4802_v51 = vsel %vm4800_vm15, %v4769_v28, %v5855_v9  ;;  %v4834_v8 = vsel %vm4833_vm0, %v4801_v19, %v5864_v45  ;;  %v4609_v9 = vsel %vm1559_vm4, %v8391_v15, %v5610_v56  ;;  %v5689_v32 = vunpack.i.l.bf16 %v8989_v6 }
 0x416   : > { %v5850_v31 = vunpack.i.h.bf16 %v5848_v10  ;;  %v5849_v1 = vunpack.i.l.bf16 %v5848_v10  ;;  %6162 = vrot.lane.b32.xlu1 %v8879_v13, %s6261_s18  ;;  %v4835_v53 = vsel %vm4833_vm0, %v4802_v51, %v5865_v38  ;;  %v4625_v45 = vsel %vm1559_vm4, %v8606_v52, %v5650_v61 }
 0x417   : > { %6137 = vrot.lane.b32.xlu0 %v8790_v48, %s6259_s24  ;;  %v4785_v48 = vsel %vm4767_vm14, %v4752_v34, %v5840_v57  ;;  %v5509_v42 = vpack.c.bf16 %v4835_v53, %v4834_v8  ;;  %v5730_v28 = vunpack.i.h.bf16 %v9020_v3  ;;  %v5729_v41 = vunpack.i.l.bf16 %v9020_v3 }
 0x418   : > { %v9155_v23 = vpop.permute.xlu1 %5882  ;;  %v4817_v11 = vsel %vm4800_vm15, %v4784_v18, %v5849_v1  ;;  %v4818_v47 = vsel %vm4800_vm15, %v4785_v48, %v5850_v31  ;;  %v5649_v31 = vunpack.i.l.bf16 %v8954_v25  ;;  %v5615_v1 = vunpack.i.h.bf16 %v8912_v58 }
 0x419   : > { %v5858_v13 = vpop.permute.xlu0 %5857  ;;  %v5614_v25 = vunpack.i.l.bf16 %v8912_v58  ;;  %v5770_v19 = vunpack.i.h.bf16 %v9053_v4  ;;  %v5769_v36 = vunpack.i.l.bf16 %v9053_v4  ;;  %v5810_v6 = vunpack.i.h.bf16 %v9081_v40 }
 0x41a   : > { %v5860_v2 = vunpack.i.h.bf16 %v5858_v13  ;;  %v5859_v49 = vunpack.i.l.bf16 %v5858_v13  ;;  %6172 = vrot.lane.b32.xlu1 %v10291_v37, %s6262_s29  ;;  %v5809_v34 = vunpack.i.l.bf16 %v9081_v40  ;;  %v4624_v13 = vsel %vm1559_vm4, %v8609_v62, %v5649_v31 }
 0x41b   : > { %6147 = vrot.lane.b32.xlu0 %v8799_v33, %s6260_s16  ;;  %v5875_v52 = vunpack.i.h.bf16 %v9139_v63  ;;  %v5874_v18 = vunpack.i.l.bf16 %v9139_v63  ;;  %v4640_v3 = vsel %vm1625_vm7, %v4608_v20, %v5689_v32  ;;  %v4641_v4 = vsel %vm1625_vm7, %v4609_v9, %v5690_v26 }
 0x41c   : > { %v4850_v59 = vsel %vm4833_vm0, %v4817_v11, %v5859_v49  ;;  %v4851_v44 = vsel %vm4833_vm0, %v4818_v47, %v5860_v2  ;;  %v9178_v57 = vpop.permute.xlu1 %5892  ;;  %v4656_v40 = vsel %vm1625_vm7, %v4624_v13, %v5729_v41  ;;  %v4657_v49 = vsel %vm1625_vm7, %v4625_v45, %v5730_v28  ;;  %v10294_v28 = vld [vmem:[#allocation29_spill] sm:$0xff] }
 0x41d   : > { %v5506_v7 = vpack.c.bf16 %v4851_v44, %v4850_v59  ;;  %v9180_v33 = vpop.permute.xlu0 %5867  ;;  %v5885_v56 = vunpack.i.h.bf16 %v9155_v23  ;;  %v5884_v62 = vunpack.i.l.bf16 %v9155_v23  ;;  %v4672_v51 = vsel %vm1691_vm9, %v4640_v3, %v5769_v36 }
 0x41e   : > { %6182 = vrot.lane.b32.xlu1 %v8598_v29, %s6263_s11  ;;  %v4673_v63 = vsel %vm1691_vm9, %v4641_v4, %v5770_v19  ;;  %v4689_v11 = vsel %vm1691_vm9, %v4657_v49, %v5810_v6  ;;  %v4704_v47 = vsel %vm1757_vm11, %v4672_v51, %v5874_v18  ;;  %v5870_v53 = vunpack.i.h.bf16 %v9180_v33 }
 0x41f   : > { %5508 = vmatprep.subr.msk.bf16.mxu0 %vm9173_vm2, %v5506_v7  ;;  %6157 = vrot.lane.b32.xlu0 %v8803_v27, %s6261_s18  ;;  %v4705_v8 = vsel %vm1757_vm11, %v4673_v63, %v5875_v52  ;;  %v5869_v59 = vunpack.i.l.bf16 %v9180_v33  ;;  %v5895_v23 = vunpack.i.h.bf16 %v9178_v57  ;;  %v5894_v44 = vunpack.i.l.bf16 %v9178_v57 }
 0x420   : > { %5511 = vmatpush3.bf16.xpose.msk.msra.mxu0 %vm9173_vm2, %v5509_v42  ;;  %v9199_v38 = vpop.permute.xlu1 %5902  ;;  %v4737_v9 = vsel %vm4734_vm13, %v4704_v47, %v5884_v62  ;;  %v4738_v31 = vsel %vm4734_vm13, %v4705_v8, %v5885_v56  ;;  %v10295_v56 = vld [vmem:[#allocation4_spill] sm:$0xff] }
 0x421   : > { %v5878_v15 = vpop.permute.xlu0 %5877  ;;  %v5905_v33 = vunpack.i.h.bf16 %v9199_v38  ;;  %v5904_v32 = vunpack.i.l.bf16 %v9199_v38  ;;  %v4770_v36 = vsel %vm4767_vm14, %v4737_v9, %v5894_v44  ;;  %v4771_v6 = vsel %vm4767_vm14, %v4738_v31, %v5895_v23  ;;  %v10296_v44 = vld [vmem:[#allocation51_spill] sm:$0xff] }
 0x422   : > { %6192 = vrot.lane.b32.xlu1 %v8810_v54, %s6259_s24  ;;  %v5880_v0 = vunpack.i.h.bf16 %v5878_v15  ;;  %v5879_v7 = vunpack.i.l.bf16 %v5878_v15  ;;  %v4721_v15 = vsel %vm1757_vm11, %v4689_v11, %v5870_v53  ;;  %v5655_v11 = vunpack.i.h.bf16 %v8941_v39 }
 0x423   : > { %6167 = vrot.lane.b32.xlu0 %v8810_v54, %s6262_s29  ;;  %v4688_v54 = vsel %vm1691_vm9, %v4656_v40, %v5809_v34  ;;  %v5735_v9 = vunpack.i.h.bf16 %v9003_v16  ;;  %v5774_v31 = vunpack.i.l.bf16 %v9034_v24 }
 0x424   : > { %v5913_v48 = vpop.permute.xlu1 %5912  ;;  %v4720_v57 = vsel %vm1757_vm11, %v4688_v54, %v5869_v59  ;;  %v4754_v34 = vsel %vm4734_vm13, %v4721_v15, %v5880_v0  ;;  %v5654_v59 = vunpack.i.l.bf16 %v8941_v39  ;;  %v4610_v0 = vsel %vm1559_vm4, %v8420_v60, %v5614_v25 }
 0x425   : > { %v5888_v2 = vpop.permute.xlu0 %5887  ;;  %v5915_v41 = vunpack.i.h.bf16 %v5913_v48  ;;  %v5914_v19 = vunpack.i.l.bf16 %v5913_v48  ;;  %v4753_v38 = vsel %vm4734_vm13, %v4720_v57, %v5879_v7  ;;  %v5694_v7 = vunpack.i.l.bf16 %v8973_v22 }
 0x426   : > { %6202 = vrot.lane.b32.xlu1 %v8818_v12, %s6260_s16  ;;  %v5890_v20 = vunpack.i.h.bf16 %v5888_v2  ;;  %v5889_v26 = vunpack.i.l.bf16 %v5888_v2  ;;  %v4803_v2 = vsel %vm4800_vm15, %v4770_v36, %v5904_v32  ;;  %v4627_v39 = vsel %vm1559_vm4, %v10251_v50, %v5655_v11 }
 0x427   : > { %6177 = vrot.lane.b32.xlu0 %v8818_v12, %s6263_s11  ;;  %v4836_v62 = vsel %vm4833_vm0, %v4803_v2, %v5914_v19  ;;  %v4626_v60 = vsel %vm1559_vm4, %v8636_v5, %v5654_v59  ;;  %v5814_v25 = vunpack.i.l.bf16 %v9065_v21  ;;  %v5659_v32 = vunpack.i.l.bf16 %v8963_v14 }
 0x428   : > { %v9238_v61 = vpop.permute.xlu1 %5922  ;;  %v4786_v18 = vsel %vm4767_vm14, %v4753_v38, %v5889_v26  ;;  %v4787_v3 = vsel %vm4767_vm14, %v4754_v34, %v5890_v20  ;;  %v4642_v5 = vsel %vm1625_vm7, %v4610_v0, %v5694_v7 }
 0x429   : > { %v5898_v42 = vpop.permute.xlu0 %5897  ;;  %v5924_v50 = vunpack.i.l.bf16 %v9238_v61  ;;  %v5925_v20 = vunpack.i.h.bf16 %v9238_v61  ;;  %v4659_v61 = vsel %vm1625_vm7, %v4627_v39, %v5735_v9 }
 0x42a   : > { %v5900_v12 = vunpack.i.h.bf16 %v5898_v42  ;;  %v5899_v45 = vunpack.i.l.bf16 %v5898_v42  ;;  %6212 = vrot.lane.b32.xlu1 %v10294_v28, %s6261_s18  ;;  %v5695_v42 = vunpack.i.h.bf16 %v8973_v22  ;;  %v5815_v22 = vunpack.i.h.bf16 %v9065_v21 }
 0x42b   : > { %6187 = vrot.lane.b32.xlu0 %v8803_v27, %s6257_s20  ;;  %v4804_v27 = vsel %vm4800_vm15, %v4771_v6, %v5905_v33  ;;  %v5660_v33 = vunpack.i.h.bf16 %v8963_v14 }
 0x42c   : > { %v9254_v13 = vpop.permute.xlu1 %5932  ;;  %v4819_v40 = vsel %vm4800_vm15, %v4786_v18, %v5899_v45  ;;  %v4820_v49 = vsel %vm4800_vm15, %v4787_v3, %v5900_v12  ;;  %v4837_v51 = vsel %vm4833_vm0, %v4804_v27, %v5915_v41  ;;  %v4674_v12 = vsel %vm1691_vm9, %v4642_v5, %v5774_v31  ;;  %v5046_v31 = vld [vmem:[%s9658_s8] sm:$0xff] }
 0x42d   : > { %v5908_v52 = vpop.permute.xlu0 %5907  ;;  %v5515_v23 = vpack.c.bf16 %v4837_v51, %v4836_v62  ;;  %v5934_v26 = vunpack.i.l.bf16 %v9254_v13  ;;  %v4706_v41 = vsel %vm1757_vm11, %v4674_v12, %v5924_v50  ;;  %v4691_v6 = vsel %vm1691_vm9, %v4659_v61, %v5815_v22 }
 0x42e   : > { %v5910_v4 = vunpack.i.h.bf16 %v5908_v52  ;;  %v5909_v48 = vunpack.i.l.bf16 %v5908_v52  ;;  %6222 = vrot.lane.b32.xlu1 %v10295_v56, %s6262_s29 }
 0x42f   : > { %6197 = vrot.lane.b32.xlu0 %v10291_v37, %s6259_s24  ;;  %v4611_v37 = vsel %vm1559_vm4, %v8417_v30, %v5615_v1  ;;  %v5734_v1 = vunpack.i.l.bf16 %v9003_v16  ;;  %v5935_v16 = vunpack.i.h.bf16 %v9254_v13  ;;  %v4739_v34 = vsel %vm4734_vm13, %v4706_v41, %v5934_v26 }
 0x430   : > { %v4852_v63 = vsel %vm4833_vm0, %v4819_v40, %v5909_v48  ;;  %v4853_v54 = vsel %vm4833_vm0, %v4820_v49, %v5910_v4  ;;  %v5943_v8 = vpop.permute.xlu1 %5942  ;;  %v4643_v21 = vsel %vm1625_vm7, %v4611_v37, %v5695_v42  ;;  %v5739_v37 = vunpack.i.l.bf16 %v9028_v46 }
 0x431   : > { %v5512_v47 = vpack.c.bf16 %v4853_v54, %v4852_v63  ;;  %v9271_v53 = vpop.permute.xlu0 %5917  ;;  %v5944_v45 = vunpack.i.l.bf16 %v5943_v8  ;;  %v4658_v15 = vsel %vm1625_vm7, %v4626_v60, %v5734_v1  ;;  %v5945_v19 = vunpack.i.h.bf16 %v5943_v8  ;;  %v5038_v8 = vld [vmem:[%s9657_s7] sm:$0xff] }
 0x432   : > { %6232 = vrot.lane.b32.xlu1 %v10296_v44, %s6263_s11  ;;  %v4690_v36 = vsel %vm1691_vm9, %v4658_v15, %v5814_v25  ;;  %v5920_v52 = vunpack.i.h.bf16 %v9271_v53  ;;  %v5919_v18 = vunpack.i.l.bf16 %v9271_v53  ;;  %v6264_v44 = vmov 0  }
 0x433   : > { %5514 = vmatprep.subr.msk.bf16.mxu0 %vm9173_vm2, %v5512_v47  ;;  %6207 = vrot.lane.b32.xlu0 %v8598_v29, %s6260_s16  ;;  %v5775_v29 = vunpack.i.h.bf16 %v9034_v24  ;;  %v9314_v24 = vld [vmem:[%s9656_s6] sm:$0xff]  ;;  %v4772_v4 = vsel %vm4767_vm14, %v4739_v34, %v5944_v45 }
 0x434   : > { %5517 = vmatpush3.bf16.xpose.msk.msra.mxu0 %vm9173_vm2, %v5515_v23  ;;  %v5953_v30 = vpop.permute.xlu1 %5952  ;;  %5358 = vmatprep.mubr.msk.f32.mxu0 %vm4867_vm1, %v9314_v24  ;;  %v4723_v53 = vsel %vm1757_vm11, %v4691_v6, %v5920_v52  ;;  %v4722_v59 = vsel %vm1757_vm11, %v4690_v36, %v5919_v18 }
 0x435   : > { %v5928_v58 = vpop.permute.xlu0 %5927  ;;  %v5954_v3 = vunpack.i.l.bf16 %v5953_v30  ;;  %v5955_v48 = vunpack.i.h.bf16 %v5953_v30  ;;  %6241 = vset.pattern.permute.xlu1 %v6264_v44  ;;  %6242 = vset.pattern.permute.xlu0 %v6264_v44 }
 0x436   : > { %v5930_v2 = vunpack.i.h.bf16 %v5928_v58  ;;  %v5929_v27 = vunpack.i.l.bf16 %v5928_v58  ;;  %5041 = vperm.xlu1 %6241, %v5038_v8  }
 0x437   : > { %6217 = vrot.lane.b32.xlu0 %v8861_v35, %s6261_s18  ;;  %v4675_v35 = vsel %vm1691_vm9, %v4643_v21, %v5775_v29  ;;  %v4805_v23 = vsel %vm4800_vm15, %v4772_v4, %v5954_v3  ;;  %v10297_v21 = vld [vmem:[#allocation68_spill] sm:$0xff] }
 0x438   : > { %v5963_v28 = vpop.permute.xlu1 %5962  ;;  %v4707_v38 = vsel %vm1757_vm11, %v4675_v35, %v5925_v20  ;;  %v4755_v7 = vsel %vm4734_vm13, %v4722_v59, %v5929_v27  ;;  %v4756_v39 = vsel %vm4734_vm13, %v4723_v53, %v5930_v2  ;;  %v4629_v20 = vsel %vm1559_vm4, %v8656_v43, %v5660_v33 }
 0x439   : > { %v5938_v57 = vpop.permute.xlu0 %5937  ;;  %v4740_v13 = vsel %vm4734_vm13, %v4707_v38, %v5935_v16  ;;  %v5965_v62 = vunpack.i.h.bf16 %v5963_v28  ;;  %v5964_v54 = vunpack.i.l.bf16 %v5963_v28  ;;  %v4628_v61 = vsel %vm1559_vm4, %v10297_v21, %v5659_v32 }
 0x43a   : > { %v4773_v56 = vsel %vm4767_vm14, %v4740_v13, %v5945_v19  ;;  %v5940_v51 = vunpack.i.h.bf16 %v5938_v57  ;;  %v5939_v63 = vunpack.i.l.bf16 %v5938_v57  ;;  %v4660_v57 = vsel %vm1625_vm7, %v4628_v61, %v5739_v37 }
 0x43b   : > { %6227 = vrot.lane.b32.xlu0 %v10252_v17, %s6262_s29  ;;  %v5740_v17 = vunpack.i.h.bf16 %v9028_v46  ;;  %v4806_v0 = vsel %vm4800_vm15, %v4773_v56, %v5955_v48  ;;  %v4838_v60 = vsel %vm4833_vm0, %v4805_v23, %v5964_v54  ;;  %v10299_v23 = vld [vmem:[#allocation90_spill] sm:$0xff] }
 0x43c   : > { %v5973_v40 = vpop.permute.xlu1 %5972  ;;  %v4789_v30 = vsel %vm4767_vm14, %v4756_v39, %v5940_v51  ;;  %v4839_v1 = vsel %vm4833_vm0, %v4806_v0, %v5965_v62  ;;  %v5700_v44 = vunpack.i.h.bf16 %v10299_v23  ;;  %v5699_v37 = vunpack.i.l.bf16 %v10299_v23  ;;  %v10300_v0 = vld [vmem:[#allocation113_spill] sm:$0xff]  ;;  %v10310_v23 = vld [vmem:[#allocation108_spill] sm:$0xff] }
 0x43d   : > { %v5948_v49 = vpop.permute.xlu0 %5947  ;;  %v5521_v12 = vpack.c.bf16 %v4839_v1, %v4838_v60  ;;  %v4661_v15 = vsel %vm1625_vm7, %v4629_v20, %v5740_v17  ;;  %v5975_v35 = vunpack.i.h.bf16 %v5973_v40  ;;  %v5974_v41 = vunpack.i.l.bf16 %v5973_v40 }
 0x43e   : > { %v5950_v11 = vunpack.i.h.bf16 %v5948_v49  ;;  %v5949_v47 = vunpack.i.l.bf16 %v5948_v49  ;;  %v5779_v39 = vunpack.i.l.bf16 %v10300_v0 }
 0x43f   : > { %6237 = vrot.lane.b32.xlu0 %v8630_v55, %s6263_s11  ;;  %v4788_v55 = vsel %vm4767_vm14, %v4755_v7, %v5939_v63  ;;  %v5780_v7 = vunpack.i.h.bf16 %v10300_v0 }
 0x440   : > { %v5983_v42 = vpop.permute.xlu1 %5982  ;;  %v4821_v29 = vsel %vm4800_vm15, %v4788_v55, %v5949_v47  ;;  %v4822_v50 = vsel %vm4800_vm15, %v4789_v30, %v5950_v11  ;;  %v10298_v11 = vld [vmem:[#allocation50_spill] sm:$0xff]  ;;  %v10302_v30 = vld [vmem:[#allocation32_spill] sm:$0xff] }
 0x441   : > { %v5958_v9 = vpop.permute.xlu0 %5957  ;;  %v5985_v43 = vunpack.i.h.bf16 %v5983_v42  ;;  %v5984_v33 = vunpack.i.l.bf16 %v5983_v42  ;;  %v5620_v47 = vunpack.i.h.bf16 %v10298_v11  ;;  %v5619_v8 = vunpack.i.l.bf16 %v10298_v11 }
 0x442   : > { %v5960_v58 = vunpack.i.h.bf16 %v5958_v9  ;;  %v5959_v46 = vunpack.i.l.bf16 %v5958_v9 }
 0x443   : > { %5049 = vperm.xlu0 %6242, %v5046_v31   ;;  %v10301_v31 = vld [vmem:[#allocation31_spill] sm:$0xff] }
 0x444   : > { %v4854_v22 = vsel %vm4833_vm0, %v4821_v29, %v5959_v46  ;;  %v4855_v25 = vsel %vm4833_vm0, %v4822_v50, %v5960_v58  ;;  %v5993_v5 = vpop.permute.xlu1 %5992  ;;  %v4613_v55 = vsel %vm1559_vm4, %v10301_v31, %v5620_v47  ;;  %v4612_v58 = vsel %vm1559_vm4, %v10302_v30, %v5619_v8 }
 0x445   : > { %v5518_v26 = vpack.c.bf16 %v4855_v25, %v4854_v22  ;;  %v5968_v16 = vpop.permute.xlu0 %5967  ;;  %v5995_v34 = vunpack.i.h.bf16 %v5993_v5  ;;  %v5994_v13 = vunpack.i.l.bf16 %v5993_v5  ;;  %v4644_v50 = vsel %vm1625_vm7, %v4612_v58, %v5699_v37  ;;  %v10311_v37 = vld [vmem:[#allocation93_spill] sm:$0xff] }
 0x446   : > { %v5970_v45 = vunpack.i.h.bf16 %v5968_v16  ;;  %v5969_v28 = vunpack.i.l.bf16 %v5968_v16  ;;  %v4645_v22 = vsel %vm1625_vm7, %v4613_v55, %v5700_v44  ;;  %v5785_v0 = vunpack.i.h.bf16 %v10311_v37  ;;  %v10312_v55 = vld [vmem:[#allocation70_spill] sm:$0xff] }
 0x447   : > { %5520 = vmatprep.subr.msk.bf16.mxu0 %vm9173_vm2, %v5518_v26  ;;  %v4676_v26 = vsel %vm1691_vm9, %v4644_v50, %v5779_v39  ;;  %v4677_v5 = vsel %vm1691_vm9, %v4645_v22, %v5780_v7  ;;  %v5784_v7 = vunpack.i.l.bf16 %v10311_v37  ;;  %v5670_v30 = vunpack.i.h.bf16 %v10312_v55  ;;  %v10313_v22 = vld [vmem:[#allocation7_spill] sm:$0xff] }
 0x448   : > { %v4692_v19 = vsel %vm1691_vm9, %v4660_v57, %v5969_v28  ;;  %v4693_v14 = vsel %vm1691_vm9, %v4661_v15, %v5970_v45  ;;  %5523 = vmatpush3.bf16.xpose.msk.msra.mxu0 %vm9173_vm2, %v5521_v12  ;;  %v6003_v6 = vpop.permute.xlu1 %6002  ;;  %v5669_v58 = vunpack.i.l.bf16 %v10312_v55 }
 0x449   : > { %v4724_v32 = vsel %vm1757_vm11, %v4692_v19, %v5974_v41  ;;  %v4725_v36 = vsel %vm1757_vm11, %v4693_v14, %v5975_v35  ;;  %v5978_v38 = vpop.permute.xlu0 %5977  ;;  %v6005_v3 = vunpack.i.h.bf16 %v6003_v6  ;;  %v6004_v4 = vunpack.i.l.bf16 %v6003_v6  ;;  %v10303_v6 = vld [vmem:[#allocation6_spill] sm:$0xff] }
 0x44a   : > { %v4757_v52 = vsel %vm4734_vm13, %v4724_v32, %v5984_v33  ;;  %v4758_v18 = vsel %vm4734_vm13, %v4725_v36, %v5985_v43  ;;  %v5980_v42 = vunpack.i.h.bf16 %v5978_v38  ;;  %v5979_v9 = vunpack.i.l.bf16 %v5978_v38 }
 0x44b   : > { %v4790_v48 = vsel %vm4767_vm14, %v4757_v52, %v5994_v13  ;;  %v4791_v2 = vsel %vm4767_vm14, %v4758_v18, %v5995_v34  ;;  %v5625_v38 = vunpack.i.h.bf16 %v10303_v6  ;;  %v5624_v34 = vunpack.i.l.bf16 %v10303_v6 }
 0x44c   : > { %v6013_v27 = vpop.permute.xlu1 %6012  ;;  %v4823_v62 = vsel %vm4800_vm15, %v4790_v48, %v6004_v4  ;;  %v4824_v51 = vsel %vm4800_vm15, %v4791_v2, %v6005_v3  ;;  %v4708_v61 = vsel %vm1757_vm11, %v4676_v26, %v5979_v9  ;;  %v4709_v12 = vsel %vm1757_vm11, %v4677_v5, %v5980_v42  ;;  %v10304_v3 = vld [vmem:[#allocation110_spill] sm:$0xff]  ;;  %v10305_v2 = vld [vmem:[#allocation5_spill] sm:$0xff] }
 0x44d   : > { %v5988_v40 = vpop.permute.xlu0 %5987  ;;  %v6015_v49 = vunpack.i.h.bf16 %v6013_v27  ;;  %v6014_v56 = vunpack.i.l.bf16 %v6013_v27  ;;  %v5665_v4 = vunpack.i.h.bf16 %v10304_v3  ;;  %v5664_v48 = vunpack.i.l.bf16 %v10304_v3 }
 0x44e   : > { %v5990_v46 = vunpack.i.h.bf16 %v5988_v40  ;;  %v5989_v60 = vunpack.i.l.bf16 %v5988_v40  ;;  %v5705_v27 = vunpack.i.h.bf16 %v10305_v2  ;;  %v5704_v40 = vunpack.i.l.bf16 %v10305_v2 }
 0x44f   : > { %v4856_v63 = vsel %vm4833_vm0, %v4823_v62, %v6014_v56  ;;  %v4857_v54 = vsel %vm4833_vm0, %v4824_v51, %v6015_v49  ;;  %v10306_v49 = vld [vmem:[#allocation34_spill] sm:$0xff]  ;;  %v10307_v62 = vld [vmem:[#allocation35_spill] sm:$0xff]  ;;  %v4630_v44 = vsel %vm1559_vm4, %v10310_v23, %v5664_v48 }
 0x450   : > { %v5524_v17 = vpack.c.bf16 %v4857_v54, %v4856_v63  ;;  %v9387_v53 = vpop.permute.xlu1 %6022  ;;  %v4741_v45 = vsel %vm4734_vm13, %v4708_v61, %v5989_v60  ;;  %v4742_v28 = vsel %vm4734_vm13, %v4709_v12, %v5990_v46  ;;  %v4615_v56 = vsel %vm1559_vm4, %v10306_v49, %v5625_v38  ;;  %v10308_v63 = vld [vmem:[#allocation112_spill] sm:$0xff] }
 0x451   : > { %v5998_v59 = vpop.permute.xlu0 %5997  ;;  %v4614_v51 = vsel %vm1559_vm4, %v10307_v62, %v5624_v34  ;;  %v5745_v54 = vunpack.i.h.bf16 %v10308_v63  ;;  %v5744_v11 = vunpack.i.l.bf16 %v10308_v63  ;;  %v6025_v39 = vunpack.i.h.bf16 %v9387_v53 }
 0x452   : > { %5526 = vmatprep.subr.msk.bf16.mxu0 %vm9173_vm2, %v5524_v17  ;;  %v6000_v25 = vunpack.i.h.bf16 %v5998_v59  ;;  %v5999_v20 = vunpack.i.l.bf16 %v5998_v59  ;;  %v10309_v17 = vld [vmem:[#allocation46_spill] sm:$0xff]  ;;  %v6024_v42 = vunpack.i.l.bf16 %v9387_v53  ;;  %v4647_v46 = vsel %vm1625_vm7, %v4615_v56, %v5705_v27 }
 0x453   : > { %v4631_v59 = vsel %vm1559_vm4, %v10309_v17, %v5665_v4  ;;  %v4646_v60 = vsel %vm1625_vm7, %v4614_v51, %v5704_v40  ;;  %v4662_v50 = vsel %vm1625_vm7, %v4630_v44, %v5744_v11  ;;  %v5749_v53 = vunpack.i.l.bf16 %v10313_v22 }
 0x454   : > { %v9399_v1 = vpop.permute.xlu1 %6032  ;;  %v4774_v35 = vsel %vm4767_vm14, %v4741_v45, %v5999_v20  ;;  %v4775_v41 = vsel %vm4767_vm14, %v4742_v28, %v6000_v25  ;;  %v5750_v25 = vunpack.i.h.bf16 %v10313_v22  ;;  %v4679_v5 = vsel %vm1691_vm9, %v4647_v46, %v5785_v0  ;;  %v10315_v46 = vld [vmem:[#allocation45_spill] sm:$0xff] }
 0x455   : > { %v6008_v29 = vpop.permute.xlu0 %6007  ;;  %v6035_v9 = vunpack.i.h.bf16 %v9399_v1  ;;  %v6034_v31 = vunpack.i.l.bf16 %v9399_v1  ;;  %v4678_v1 = vsel %vm1691_vm9, %v4646_v60, %v5784_v7  ;;  %v4694_v61 = vsel %vm1691_vm9, %v4662_v50, %v6024_v42 }
 0x456   : > { %v6010_v16 = vunpack.i.h.bf16 %v6008_v29  ;;  %v6009_v21 = vunpack.i.l.bf16 %v6008_v29  ;;  %v4663_v29 = vsel %vm1625_vm7, %v4631_v59, %v5745_v54  ;;  %v4632_v60 = vsel %vm1559_vm4, %v10315_v46, %v5669_v58 }
 0x457   : > { %v4695_v12 = vsel %vm1691_vm9, %v4663_v29, %v6025_v39  ;;  %v4710_v45 = vsel %vm1757_vm11, %v4678_v1, %v6034_v31  ;;  %v4711_v28 = vsel %vm1757_vm11, %v4679_v5, %v6035_v9  ;;  %v10314_v39 = vld [vmem:[#allocation55_spill] sm:$0xff] }
 0x458   : > { %v9409_v57 = vpop.permute.xlu1 %6042  ;;  %v4807_v19 = vsel %vm4800_vm15, %v4774_v35, %v6009_v21  ;;  %v4808_v14 = vsel %vm4800_vm15, %v4775_v41, %v6010_v16  ;;  %v4633_v42 = vsel %vm1559_vm4, %v10314_v39, %v5670_v30 }
 0x459   : > { %v6018_v15 = vpop.permute.xlu0 %6017  ;;  %v6045_v16 = vunpack.i.h.bf16 %v9409_v57  ;;  %v6044_v21 = vunpack.i.l.bf16 %v9409_v57 }
 0x45a   : > { %v6020_v43 = vunpack.i.h.bf16 %v6018_v15  ;;  %v6019_v33 = vunpack.i.l.bf16 %v6018_v15 }
 0x45b   : > { %v4743_v57 = vsel %vm4734_vm13, %v4710_v45, %v6044_v21  ;;  %v4744_v38 = vsel %vm4734_vm13, %v4711_v28, %v6045_v16 }
 0x45c   : > { %v4840_v32 = vsel %vm4833_vm0, %v4807_v19, %v6019_v33  ;;  %v4841_v36 = vsel %vm4833_vm0, %v4808_v14, %v6020_v43  ;;  %v6053_v52 = vpop.permute.xlu1 %6052 }
 0x45d   : > { %v5527_v13 = vpack.c.bf16 %v4841_v36, %v4840_v32  ;;  %v6028_v18 = vpop.permute.xlu0 %6027  ;;  %v6055_v15 = vunpack.i.h.bf16 %v6053_v52  ;;  %v6054_v35 = vunpack.i.l.bf16 %v6053_v52 }
 0x45e   : > { %v6030_v41 = vunpack.i.h.bf16 %v6028_v18  ;;  %v6029_v43 = vunpack.i.l.bf16 %v6028_v18 }
 0x45f   : > { %5529 = vmatpush3.bf16.xpose.msk.msra.mxu0 %vm9173_vm2, %v5527_v13  ;;  %v4776_v52 = vsel %vm4767_vm14, %v4743_v57, %v6054_v35  ;;  %v4777_v18 = vsel %vm4767_vm14, %v4744_v38, %v6055_v15 }
 0x460   : > { %v6063_v47 = vpop.permute.xlu1 %6062  ;;  %v4727_v27 = vsel %vm1757_vm11, %v4695_v12, %v6030_v41  ;;  %v4726_v40 = vsel %vm1757_vm11, %v4694_v61, %v6029_v43 }
 0x461   : > { %v6038_v8 = vpop.permute.xlu0 %6037  ;;  %v6065_v33 = vunpack.i.h.bf16 %v6063_v47  ;;  %v6064_v19 = vunpack.i.l.bf16 %v6063_v47 }
 0x462   : > { %v6040_v14 = vunpack.i.h.bf16 %v6038_v8  ;;  %v6039_v32 = vunpack.i.l.bf16 %v6038_v8 }
 0x463   : > { %v4809_v49 = vsel %vm4800_vm15, %v4776_v52, %v6064_v19  ;;  %v4810_v56 = vsel %vm4800_vm15, %v4777_v18, %v6065_v33 }
 0x464   : > { %v6073_v20 = vpop.permute.xlu1 %6072  ;;  %v4759_v62 = vsel %vm4734_vm13, %v4726_v40, %v6039_v32  ;;  %v4760_v51 = vsel %vm4734_vm13, %v4727_v27, %v6040_v14  ;;  %v10317_v27 = vld [vmem:[#allocation91_spill] sm:$0xff] }
 0x465   : > { %v6048_v26 = vpop.permute.xlu0 %6047  ;;  %v6075_v3 = vunpack.i.h.bf16 %v6073_v20  ;;  %v6074_v4 = vunpack.i.l.bf16 %v6073_v20  ;;  %v4664_v20 = vsel %vm1625_vm7, %v4632_v60, %v5749_v53  ;;  %v5710_v40 = vunpack.i.h.bf16 %v10317_v27 }
 0x466   : > { %v6050_v34 = vunpack.i.h.bf16 %v6048_v26  ;;  %v6049_v13 = vunpack.i.l.bf16 %v6048_v26  ;;  %v4665_v26 = vsel %vm1625_vm7, %v4633_v42, %v5750_v25 }
 0x467   : > { %v4842_v59 = vsel %vm4833_vm0, %v4809_v49, %v6074_v4  ;;  %v4843_v23 = vsel %vm4833_vm0, %v4810_v56, %v6075_v3  ;;  %v10316_v3 = vld [vmem:[#allocation69_spill] sm:$0xff]  ;;  %v5709_v49 = vunpack.i.l.bf16 %v10317_v27  ;;  %v10318_v56 = vld [vmem:[#allocation60_spill] sm:$0xff] }
 0x468   : > { %v6083_v36 = vpop.permute.xlu1 %6082  ;;  %v4792_v11 = vsel %vm4767_vm14, %v4759_v62, %v6049_v13  ;;  %v4793_v47 = vsel %vm4767_vm14, %v4760_v51, %v6050_v34  ;;  %v5533_v29 = vpack.c.bf16 %v4843_v23, %v4842_v59  ;;  %v5630_v4 = vunpack.i.h.bf16 %v10316_v3  ;;  %v10328_v27 = vld [vmem:[#allocation109_spill] sm:$0xff] }
 0x469   : > { %v6058_v6 = vpop.permute.xlu0 %6057  ;;  %v6085_v1 = vunpack.i.h.bf16 %v6083_v36  ;;  %v6084_v5 = vunpack.i.l.bf16 %v6083_v36  ;;  %v5790_v62 = vunpack.i.h.bf16 %v10318_v56  ;;  %v5789_v51 = vunpack.i.l.bf16 %v10318_v56 }
 0x46a   : > { %v6060_v48 = vunpack.i.h.bf16 %v6058_v6  ;;  %v6059_v2 = vunpack.i.l.bf16 %v6058_v6 }
 0x46c   : > { %v6093_v63 = vpop.permute.xlu1 %6092  ;;  %v4825_v44 = vsel %vm4800_vm15, %v4792_v11, %v6059_v2  ;;  %v4826_v37 = vsel %vm4800_vm15, %v4793_v47, %v6060_v48  ;;  %v5629_v48 = vunpack.i.l.bf16 %v10316_v3  ;;  %v10319_v11 = vld [vmem:[#allocation37_spill] sm:$0xff] }
 0x46d   : > { %v6068_v54 = vpop.permute.xlu0 %6067  ;;  %v6095_v16 = vunpack.i.h.bf16 %v6093_v63  ;;  %v6094_v30 = vunpack.i.l.bf16 %v6093_v63  ;;  %v4617_v47 = vsel %vm1559_vm4, %v10319_v11, %v5630_v4  ;;  %v10326_v3 = vld [vmem:[#allocation73_spill] sm:$0xff] }
 0x46e   : > { %v6070_v8 = vunpack.i.h.bf16 %v6068_v54  ;;  %v6069_v17 = vunpack.i.l.bf16 %v6068_v54  ;;  %v5755_v4 = vunpack.i.h.bf16 %v10326_v3 }
 0x470   : > { %v4858_v0 = vsel %vm4833_vm0, %v4825_v44, %v6069_v17  ;;  %v4859_v7 = vsel %vm4833_vm0, %v4826_v37, %v6070_v8  ;;  %v6103_v31 = vpop.permute.xlu1 %6102  ;;  %v10320_v8 = vld [vmem:[#allocation38_spill] sm:$0xff] }
 0x471   : > { %v5530_v9 = vpack.c.bf16 %v4859_v7, %v4858_v0  ;;  %v6078_v55 = vpop.permute.xlu0 %6077  ;;  %v6105_v45 = vunpack.i.h.bf16 %v6103_v31  ;;  %v6104_v28 = vunpack.i.l.bf16 %v6103_v31  ;;  %v4616_v17 = vsel %vm1559_vm4, %v10320_v8, %v5629_v48 }
 0x472   : > { %v6080_v50 = vunpack.i.h.bf16 %v6078_v55  ;;  %v6079_v22 = vunpack.i.l.bf16 %v6078_v55  ;;  %v4648_v0 = vsel %vm1625_vm7, %v4616_v17, %v5709_v49  ;;  %v4649_v7 = vsel %vm1625_vm7, %v4617_v47, %v5710_v40  ;;  %v10329_v49 = vld [vmem:[#allocation92_spill] sm:$0xff] }
 0x473   : > { %5532 = vmatprep.subr.msk.bf16.mxu0 %vm9173_vm2, %v5530_v9  ;;  %v4680_v9 = vsel %vm1691_vm9, %v4648_v0, %v5789_v51  ;;  %v4681_v31 = vsel %vm1691_vm9, %v4649_v7, %v5790_v62  ;;  %v5754_v48 = vunpack.i.l.bf16 %v10326_v3  ;;  %v5795_v56 = vunpack.i.h.bf16 %v10329_v49  ;;  %v10330_v47 = vld [vmem:[#allocation12_spill] sm:$0xff] }
 0x474   : > { %v4696_v21 = vsel %vm1691_vm9, %v4664_v20, %v6079_v22  ;;  %v4697_v61 = vsel %vm1691_vm9, %v4665_v26, %v6080_v50  ;;  %5535 = vmatpush3.bf16.xpose.msk.msra.mxu0 %vm9173_vm2, %v5533_v29  ;;  %v6113_v12 = vpop.permute.xlu1 %6112  ;;  %v5794_v62 = vunpack.i.l.bf16 %v10329_v49  ;;  %v5680_v8 = vunpack.i.h.bf16 %v10330_v47 }
 0x475   : > { %v4728_v58 = vsel %vm1757_vm11, %v4696_v21, %v6084_v5  ;;  %v4729_v53 = vsel %vm1757_vm11, %v4697_v61, %v6085_v1  ;;  %v6088_v25 = vpop.permute.xlu0 %6087  ;;  %v6115_v41 = vunpack.i.h.bf16 %v6113_v12  ;;  %v6114_v43 = vunpack.i.l.bf16 %v6113_v12 }
 0x476   : > { %v4761_v15 = vsel %vm4734_vm13, %v4728_v58, %v6094_v30  ;;  %v4762_v35 = vsel %vm4734_vm13, %v4729_v53, %v6095_v16  ;;  %v6090_v63 = vunpack.i.h.bf16 %v6088_v25  ;;  %v6089_v54 = vunpack.i.l.bf16 %v6088_v25 }
 0x477   : > { %v4794_v33 = vsel %vm4767_vm14, %v4761_v15, %v6104_v28  ;;  %v4795_v19 = vsel %vm4767_vm14, %v4762_v35, %v6105_v45  ;;  %v10321_v28 = vld [vmem:[#allocation11_spill] sm:$0xff]  ;;  %v5679_v17 = vunpack.i.l.bf16 %v10330_v47 }
 0x478   : > { %v6123_v14 = vpop.permute.xlu1 %6122  ;;  %v4827_v57 = vsel %vm4800_vm15, %v4794_v33, %v6114_v43  ;;  %v4828_v38 = vsel %vm4800_vm15, %v4795_v19, %v6115_v41  ;;  %v4712_v60 = vsel %vm1757_vm11, %v4680_v9, %v6089_v54  ;;  %v4713_v29 = vsel %vm1757_vm11, %v4681_v31, %v6090_v63  ;;  %v10322_v41 = vld [vmem:[#allocation57_spill] sm:$0xff]  ;;  %v10323_v19 = vld [vmem:[#allocation72_spill] sm:$0xff] }
 0x479   : > { %v6098_v32 = vpop.permute.xlu0 %6097  ;;  %v6125_v36 = vunpack.i.h.bf16 %v6123_v14  ;;  %v6124_v6 = vunpack.i.l.bf16 %v6123_v14  ;;  %v5635_v15 = vunpack.i.h.bf16 %v10321_v28  ;;  %v5634_v35 = vunpack.i.l.bf16 %v10321_v28 }
 0x47a   : > { %v6100_v59 = vunpack.i.h.bf16 %v6098_v32  ;;  %v6099_v23 = vunpack.i.l.bf16 %v6098_v32  ;;  %v5675_v43 = vunpack.i.h.bf16 %v10322_v41  ;;  %v5674_v33 = vunpack.i.l.bf16 %v10322_v41 }
 0x47b   : > { %v4860_v34 = vsel %vm4833_vm0, %v4827_v57, %v6124_v6  ;;  %v4861_v13 = vsel %vm4833_vm0, %v4828_v38, %v6125_v36  ;;  %v5715_v14 = vunpack.i.h.bf16 %v10323_v19  ;;  %v5714_v32 = vunpack.i.l.bf16 %v10323_v19  ;;  %v10324_v57 = vld [vmem:[#allocation40_spill] sm:$0xff] }
 0x47c   : > { %v5536_v2 = vpack.c.bf16 %v4861_v13, %v4860_v34  ;;  %v9499_v52 = vpop.permute.xlu1 %6132  ;;  %v4745_v50 = vsel %vm4734_vm13, %v4712_v60, %v6099_v23  ;;  %v4746_v22 = vsel %vm4734_vm13, %v4713_v29, %v6100_v59  ;;  %v4619_v38 = vsel %vm1559_vm4, %v10324_v57, %v5635_v15  ;;  %v10325_v34 = vld [vmem:[#allocation41_spill] sm:$0xff] }
 0x47d   : > { %v6108_v18 = vpop.permute.xlu0 %6107  ;;  %v4618_v13 = vsel %vm1559_vm4, %v10325_v34, %v5634_v35  ;;  %v4634_v40 = vsel %vm1559_vm4, %v10328_v27, %v5674_v33  ;;  %v6135_v51 = vunpack.i.h.bf16 %v9499_v52  ;;  %v6134_v63 = vunpack.i.l.bf16 %v9499_v52 }
 0x47e   : > { %5538 = vmatprep.subr.msk.bf16.mxu0 %vm9173_vm2, %v5536_v2  ;;  %v6110_v39 = vunpack.i.h.bf16 %v6108_v18  ;;  %v6109_v42 = vunpack.i.l.bf16 %v6108_v18  ;;  %v10327_v2 = vld [vmem:[#allocation49_spill] sm:$0xff]  ;;  %v4651_v59 = vsel %vm1625_vm7, %v4619_v38, %v5715_v14  ;;  %v4650_v23 = vsel %vm1625_vm7, %v4618_v13, %v5714_v32 }
 0x47f   : > { %v4635_v18 = vsel %vm1559_vm4, %v10327_v2, %v5675_v43  ;;  %v4666_v0 = vsel %vm1625_vm7, %v4634_v40, %v5754_v48  ;;  %v4683_v31 = vsel %vm1691_vm9, %v4651_v59, %v5795_v56  ;;  %v10332_v56 = vld [vmem:[#allocation71_spill] sm:$0xff] }
 0x480   : > { %v9511_v44 = vpop.permute.xlu1 %6142  ;;  %v4778_v1 = vsel %vm4767_vm14, %v4745_v50, %v6109_v42  ;;  %v4779_v5 = vsel %vm4767_vm14, %v4746_v22, %v6110_v39  ;;  %v4667_v7 = vsel %vm1625_vm7, %v4635_v18, %v5755_v4  ;;  %v10331_v39 = vld [vmem:[#allocation111_spill] sm:$0xff]  ;;  %v4698_v29 = vsel %vm1691_vm9, %v4666_v0, %v6134_v63 }
 0x481   : > { %v6118_v37 = vpop.permute.xlu0 %6117  ;;  %v6145_v54 = vunpack.i.h.bf16 %v9511_v44  ;;  %v6144_v11 = vunpack.i.l.bf16 %v9511_v44  ;;  %v5760_v42 = vunpack.i.h.bf16 %v10331_v39  ;;  %v5759_v52 = vunpack.i.l.bf16 %v10331_v39 }
 0x482   : > { %v6120_v55 = vunpack.i.h.bf16 %v6118_v37  ;;  %v6119_v46 = vunpack.i.l.bf16 %v6118_v37  ;;  %v4682_v44 = vsel %vm1691_vm9, %v4650_v23, %v5794_v62  ;;  %v4699_v60 = vsel %vm1691_vm9, %v4667_v7, %v6135_v51 }
 0x483   : > { %v4715_v50 = vsel %vm1757_vm11, %v4683_v31, %v6145_v54  ;;  %v4714_v22 = vsel %vm1757_vm11, %v4682_v44, %v6144_v11  ;;  %v4636_v62 = vsel %vm1559_vm4, %v10332_v56, %v5679_v17  ;;  %v10333_v11 = vld [vmem:[#allocation56_spill] sm:$0xff] }
 0x484   : > { %v9521_v20 = vpop.permute.xlu1 %6152  ;;  %v4811_v21 = vsel %vm4800_vm15, %v4778_v1, %v6119_v46  ;;  %v4812_v61 = vsel %vm4800_vm15, %v4779_v5, %v6120_v55  ;;  %v4637_v47 = vsel %vm1559_vm4, %v10333_v11, %v5680_v8  ;;  %v4668_v59 = vsel %vm1625_vm7, %v4636_v62, %v5759_v52 }
 0x485   : > { %v6128_v26 = vpop.permute.xlu0 %6127  ;;  %v6155_v55 = vunpack.i.h.bf16 %v9521_v20  ;;  %v6154_v46 = vunpack.i.l.bf16 %v9521_v20  ;;  %v4669_v0 = vsel %vm1625_vm7, %v4637_v47, %v5760_v42 }
 0x486   : > { %v6130_v16 = vunpack.i.h.bf16 %v6128_v26  ;;  %v6129_v30 = vunpack.i.l.bf16 %v6128_v26 }
 0x487   : > { %v4748_v28 = vsel %vm4734_vm13, %v4715_v50, %v6155_v55 }
 0x488   : > { %v4844_v58 = vsel %vm4833_vm0, %v4811_v21, %v6129_v30  ;;  %v4845_v53 = vsel %vm4833_vm0, %v4812_v61, %v6130_v16  ;;  %v6163_v25 = vpop.permute.xlu1 %6162 }
 0x489   : > { %v5539_v12 = vpack.c.bf16 %v4845_v53, %v4844_v58  ;;  %v9529_v45 = vpop.permute.xlu0 %6137  ;;  %v6165_v26 = vunpack.i.h.bf16 %v6163_v25  ;;  %v6164_v1 = vunpack.i.l.bf16 %v6163_v25 }
 0x48a   : > { %v6140_v5 = vunpack.i.h.bf16 %v9529_v45  ;;  %v6139_v16 = vunpack.i.l.bf16 %v9529_v45 }
 0x48b   : > { %5541 = vmatpush3.bf16.xpose.msk.msra.mxu0 %vm9173_vm2, %v5539_v12  ;;  %v4747_v12 = vsel %vm4734_vm13, %v4714_v22, %v6154_v46  ;;  %v4781_v45 = vsel %vm4767_vm14, %v4748_v28, %v6165_v26 }
 0x48c   : > { %v6173_v36 = vpop.permute.xlu1 %6172  ;;  %v4780_v19 = vsel %vm4767_vm14, %v4747_v12, %v6164_v1  ;;  %v4731_v14 = vsel %vm1757_vm11, %v4699_v60, %v6140_v5  ;;  %v4730_v32 = vsel %vm1757_vm11, %v4698_v29, %v6139_v16 }
 0x48d   : > { %v6148_v6 = vpop.permute.xlu0 %6147  ;;  %v6175_v21 = vunpack.i.h.bf16 %v6173_v36  ;;  %v6174_v61 = vunpack.i.l.bf16 %v6173_v36 }
 0x48e   : > { %v6150_v58 = vunpack.i.h.bf16 %v6148_v6  ;;  %v6149_v53 = vunpack.i.l.bf16 %v6148_v6 }
 0x48f   : > { %v4813_v6 = vsel %vm4800_vm15, %v4780_v19, %v6174_v61  ;;  %v4814_v57 = vsel %vm4800_vm15, %v4781_v45, %v6175_v21  ;;  %v10335_v45 = vld [vmem:[#allocation59_spill] sm:$0xff] }
 0x490   : > { %v6183_v37 = vpop.permute.xlu1 %6182  ;;  %v4763_v38 = vsel %vm4734_vm13, %v4730_v32, %v6149_v53  ;;  %v4764_v34 = vsel %vm4734_vm13, %v4731_v14, %v6150_v58  ;;  %v5720_v14 = vunpack.i.h.bf16 %v10335_v45  ;;  %v5719_v32 = vunpack.i.l.bf16 %v10335_v45 }
 0x491   : > { %v6158_v9 = vpop.permute.xlu0 %6157  ;;  %v6185_v41 = vunpack.i.h.bf16 %v6183_v37  ;;  %v6184_v43 = vunpack.i.l.bf16 %v6183_v37 }
 0x492   : > { %v6160_v15 = vunpack.i.h.bf16 %v6158_v9  ;;  %v6159_v35 = vunpack.i.l.bf16 %v6158_v9 }
 0x493   : > { %v4846_v18 = vsel %vm4833_vm0, %v4813_v6, %v6184_v43  ;;  %v4847_v27 = vsel %vm4833_vm0, %v4814_v57, %v6185_v41  ;;  %v10334_v43 = vld [vmem:[#allocation89_spill] sm:$0xff] }
 0x494   : > { %v6193_v30 = vpop.permute.xlu1 %6192  ;;  %v4797_v3 = vsel %vm4767_vm14, %v4764_v34, %v6160_v15  ;;  %v4796_v4 = vsel %vm4767_vm14, %v4763_v38, %v6159_v35  ;;  %v5545_v7 = vpack.c.bf16 %v4847_v27, %v4846_v18 }
 0x495   : > { %v6168_v20 = vpop.permute.xlu0 %6167  ;;  %v6195_v44 = vunpack.i.h.bf16 %v6193_v30  ;;  %v6194_v31 = vunpack.i.l.bf16 %v6193_v30 }
 0x496   : > { %v6170_v33 = vunpack.i.h.bf16 %v6168_v20  ;;  %v6169_v25 = vunpack.i.l.bf16 %v6168_v20 }
 0x498   : > { %v6203_v36 = vpop.permute.xlu1 %6202  ;;  %v4830_v40 = vsel %vm4800_vm15, %v4797_v3, %v6170_v33  ;;  %v4829_v49 = vsel %vm4800_vm15, %v4796_v4, %v6169_v25  ;;  %v5640_v33 = vunpack.i.h.bf16 %v10334_v43  ;;  %v5639_v25 = vunpack.i.l.bf16 %v10334_v43  ;;  %v10338_v4 = vld [vmem:[#allocation42_spill] sm:$0xff] }
 0x499   : > { %v6178_v13 = vpop.permute.xlu0 %6177  ;;  %v6205_v46 = vunpack.i.h.bf16 %v6203_v36  ;;  %v6204_v60 = vunpack.i.l.bf16 %v6203_v36  ;;  %v10336_v36 = vld [vmem:[#allocation74_spill] sm:$0xff] }
 0x49a   : > { %v6180_v48 = vunpack.i.h.bf16 %v6178_v13  ;;  %v6179_v2 = vunpack.i.l.bf16 %v6178_v13  ;;  %v5800_v6 = vunpack.i.h.bf16 %v10336_v36  ;;  %v5799_v57 = vunpack.i.l.bf16 %v10336_v36  ;;  %v10337_v13 = vld [vmem:[#allocation44_spill] sm:$0xff] }
 0x49b   : > { %v4621_v3 = vsel %vm1559_vm4, %v10337_v13, %v5640_v33 }
 0x49c   : > { %v4862_v51 = vsel %vm4833_vm0, %v4829_v49, %v6179_v2  ;;  %v4863_v63 = vsel %vm4833_vm0, %v4830_v40, %v6180_v48  ;;  %v6213_v54 = vpop.permute.xlu1 %6212  ;;  %v4620_v48 = vsel %vm1559_vm4, %v10338_v4, %v5639_v25  ;;  %v4653_v49 = vsel %vm1625_vm7, %v4621_v3, %v5720_v14 }
 0x49d   : > { %v5542_v23 = vpack.c.bf16 %v4863_v63, %v4862_v51  ;;  %v6188_v37 = vpop.permute.xlu0 %6187  ;;  %v6215_v17 = vunpack.i.h.bf16 %v6213_v54  ;;  %v6214_v55 = vunpack.i.l.bf16 %v6213_v54  ;;  %v4652_v40 = vsel %vm1625_vm7, %v4620_v48, %v5719_v32 }
 0x49e   : > { %v6190_v39 = vunpack.i.h.bf16 %v6188_v37  ;;  %v6189_v9 = vunpack.i.l.bf16 %v6188_v37  ;;  %v4684_v51 = vsel %vm1691_vm9, %v4652_v40, %v5799_v57  ;;  %v4685_v63 = vsel %vm1691_vm9, %v4653_v49, %v5800_v6 }
 0x49f   : > { %5544 = vmatprep.subr.msk.bf16.mxu0 %vm9173_vm2, %v5542_v23 }
 0x4a0   : > { %v4701_v8 = vsel %vm1691_vm9, %v4669_v0, %v6190_v39  ;;  %v4700_v52 = vsel %vm1691_vm9, %v4668_v59, %v6189_v9  ;;  %5547 = vmatpush3.bf16.xpose.msk.msra.mxu0 %vm9173_vm2, %v5545_v7  ;;  %v6223_v42 = vpop.permute.xlu1 %6222 }
 0x4a1   : > { %v4733_v29 = vsel %vm1757_vm11, %v4701_v8, %v6195_v44  ;;  %v4732_v50 = vsel %vm1757_vm11, %v4700_v52, %v6194_v31  ;;  %v6198_v22 = vpop.permute.xlu0 %6197  ;;  %v6225_v26 = vunpack.i.h.bf16 %v6223_v42  ;;  %v6224_v1 = vunpack.i.l.bf16 %v6223_v42 }
 0x4a2   : > { %v4765_v5 = vsel %vm4734_vm13, %v4732_v50, %v6204_v60  ;;  %v4766_v16 = vsel %vm4734_vm13, %v4733_v29, %v6205_v46  ;;  %v6200_v38 = vunpack.i.h.bf16 %v6198_v22  ;;  %v6199_v34 = vunpack.i.l.bf16 %v6198_v22 }
 0x4a3   : > { %v4798_v30 = vsel %vm4767_vm14, %v4765_v5, %v6214_v55  ;;  %v4799_v21 = vsel %vm4767_vm14, %v4766_v16, %v6215_v17 }
 0x4a4   : > { %v6233_v61 = vpop.permute.xlu1 %6232  ;;  %v4831_v12 = vsel %vm4800_vm15, %v4798_v30, %v6224_v1  ;;  %v4832_v28 = vsel %vm4800_vm15, %v4799_v21, %v6225_v26  ;;  %v4717_v47 = vsel %vm1757_vm11, %v4685_v63, %v6200_v38  ;;  %v4716_v59 = vsel %vm1757_vm11, %v4684_v51, %v6199_v34 }
 0x4a5   : > { %v6235_v58 = vunpack.i.h.bf16 %v6233_v61  ;;  %v6234_v53 = vunpack.i.l.bf16 %v6233_v61  ;;  %v6208_v20 = vpop.permute.xlu0 %6207 }
 0x4a6   : > { %v6210_v2 = vunpack.i.h.bf16 %v6208_v20  ;;  %v6209_v18 = vunpack.i.l.bf16 %v6208_v20 }
 0x4a7   : > { %v4864_v15 = vsel %vm4833_vm0, %v4831_v12, %v6234_v53  ;;  %v4865_v35 = vsel %vm4833_vm0, %v4832_v28, %v6235_v58 }
 0x4a8   : > { %v5548_v41 = vpack.c.bf16 %v4865_v35, %v4864_v15  ;;  %v4749_v23 = vsel %vm4734_vm13, %v4716_v59, %v6209_v18  ;;  %v4750_v37 = vsel %vm4734_vm13, %v4717_v47, %v6210_v2 }
 0x4a9   : > { %v6218_v19 = vpop.permute.xlu0 %6217 }
 0x4aa   : > { %5550 = vmatprep.subr.msk.bf16.mxu0 %vm9173_vm2, %v5548_v41  ;;  %v6220_v56 = vunpack.i.h.bf16 %v6218_v19  ;;  %v6219_v62 = vunpack.i.l.bf16 %v6218_v19 }
 0x4ac   : > { %v4782_v7 = vsel %vm4767_vm14, %v4749_v23, %v6219_v62  ;;  %v4783_v39 = vsel %vm4767_vm14, %v4750_v37, %v6220_v56 }
 0x4ad   : > { %v6228_v27 = vpop.permute.xlu0 %6227 }
 0x4ae   : > { %v6230_v54 = vunpack.i.h.bf16 %v6228_v27  ;;  %v6229_v11 = vunpack.i.l.bf16 %v6228_v27 }
 0x4b0   : > { %v4815_v31 = vsel %vm4800_vm15, %v4782_v7, %v6229_v11  ;;  %v4816_v17 = vsel %vm4800_vm15, %v4783_v39, %v6230_v54 }
 0x4b1   : > { %v6238_v0 = vpop.permute.xlu0 %6237 }
 0x4b2   : > { %v6240_v9 = vunpack.i.h.bf16 %v6238_v0  ;;  %v6239_v44 = vunpack.i.l.bf16 %v6238_v0 }
 0x4b4   : > { %v4848_v55 = vsel %vm4833_vm0, %v4815_v31, %v6239_v44  ;;  %v4849_v46 = vsel %vm4833_vm0, %v4816_v17, %v6240_v9 }
 0x4b5   : > { %v5551_v60 = vpack.c.bf16 %v4849_v46, %v4848_v55  ;;  %v5042_v8 = vpop.permute.xlu1 %5041 }
 0x4b7   : > { %5553 = vmatpush3.bf16.xpose.msk.msra.mxu0 %vm9173_vm2, %v5551_v60 }
 0x4be   : > { %5359 = vmatmul.mubr.msk.f32.vlgmr.msra.gmra.mrb[32].mxu0 %vm4867_vm1, %v9314_v24 }
 0x4c2   : > { %v5050_v42 = vpop.permute.xlu0 %5049 }
 0x591   : > { %v5033_v52 = vpop.f32.mrb[32].mxu0 }
 0x592   : > { %v5044_v29 = vmul.f32 %v5042_v8, %v5033_v52  ;;  %v5035_v50 = vpop.f32.mrb[33].mxu0 }
 0x593   : > { %v5045_v22 = vmul.f32 %v5042_v8, %v5035_v50 }
 0x594   : > { %v5052_v26 = vadd.f32 %v5050_v42, %v5044_v29 }
 0x595   : > { %v5053_v1 = vadd.f32 %v5050_v42, %v5045_v22 }
 0x596   : > { %v5054_v5 = vmax.f32 %v5052_v26, 0.0 }
 0x597   : > { %v5055_v16 = vmax.f32 %v5053_v1, 0.0 }
 0x598   : > { %5056 = vst [vmem:[%s352_s23] sm:$0xff] %v5054_v5 }
 0x599   : > { %5057 = vst [vmem:[%s352_s23 + $0x8] sm:$0xff] %v5055_v16 }
 0x59a PF: > { %s19_s30 = sadd.s32 1, %s6249_s30  }
 0x59b   : > { %p16_p4 = scmp.ge.s32.totalorder %s19_s30, 4  }
 0x59d   :  { %18 = sbr.rel (!%p16_p4) target bundleno = 1 (0x1), region = 89 }

</bundles_post_ra>
